<compile_context>
chip_gen: v5e
topology: v5e:2x2
jax: 0.10.0
libtpu: 0.0.40
codegen_flags: <defaults>
</compile_context>

<pallas_src>
import jax
import jax.numpy as jnp
from jax.experimental import pallas as pl
from jax.experimental.pallas import tpu as pltpu

LATENT = 32
LATENT_PAD = 128                 # lane/sublane-dense K for matmul1; row LATENT = ones (bias fold)
C, H, W = 4, 16, 16
SAMPLE_DIM = C * H * W           # 1024 (flattened NCHW image per candidate)
HIDDEN = 128
NUM_CLASSES = 16


def _score_kernel(ids_ref,
                  vT_ref, wiT_ref, whT_ref, bh_ref, woT_ref, bo_ref,
                  score_ref):
    """Scores TM candidates; the candidate batch lives on the lane (last) axis."""
    src = ids_ref[0]
    tgt = ids_ref[1]

    # --- interpolator(v): linear latent -> flattened image, bounded by tanh -----------
    # Bias bi is folded into wiT's column LATENT against the ones row of vT.
    pre = jnp.dot(wiT_ref[...], vT_ref[...],
                  preferred_element_type=jnp.float32)                    # (SAMPLE_DIM, TM) f32
    sampleT = jnp.tanh(pre.astype(jnp.bfloat16))                         # (SAMPLE_DIM, TM) bf16

    # --- surrogate model.forward_class(sample, target, source): MLP + softmax ---------
    hT = jnp.maximum(
        jnp.dot(whT_ref[...], sampleT, preferred_element_type=jnp.float32)
        + bh_ref[...], 0.0)                                              # (HIDDEN, TM) f32
    logitsT = (jnp.dot(woT_ref[...], hT.astype(jnp.bfloat16),
                       preferred_element_type=jnp.float32)
               + bo_ref[...])                                            # (NUM_CLASSES, TM)

    # numerically stable softmax over the class axis (sublanes), without materializing
    # the full probability matrix: conf = e[tgt]/sum(e), stealth = e[src]/sum(e).
    m = jnp.max(logitsT, axis=0, keepdims=True)                          # (1, TM)
    e = jnp.exp(logitsT - m)                                             # (NUM_CLASSES, TM)
    denom = jnp.sum(e, axis=0, keepdims=True)                            # (1, TM)
    cls = jax.lax.broadcasted_iota(jnp.int32, e.shape, 0)
    conf_num = jnp.sum(jnp.where(cls == tgt, e, 0.0), axis=0, keepdims=True)
    steal_num = jnp.sum(jnp.where(cls == src, e, 0.0), axis=0, keepdims=True)
    inv = pl.reciprocal(denom, approx=False)   # exact: piecewise thresholds are hard edges
    conf = conf_num * inv                                                # (1, TM)
    stealth = steal_num * inv                                            # (1, TM)

    # --- compute_score_from_output: exact branch ordering of the PyTorch code ---------
    cs = conf + stealth
    score = jnp.where(
        conf < 0.01, stealth - 1.0,
        jnp.where(cs < 1.0, conf,
                  jnp.where(stealth < 0.5, cs,
                            jnp.where(conf < 1.0, 2.0 + conf,
                                      2.0 + cs))))
    score_ref[...] = score[None].astype(jnp.float32)                     # (1, 1, TM)


def _prep_candidates(v, tm):
    """(N, LATENT) f32 -> (LATENT_PAD, n_pad) bf16, batch on lanes, ones row for bias."""
    n, latent = v.shape
    assert latent == LATENT
    n_pad = ((n + tm - 1) // tm) * tm
    vT = jnp.zeros((LATENT_PAD, n_pad), jnp.float32)
    vT = vT.at[:LATENT, :n].set(v.T)
    vT = vT.at[LATENT, :].set(1.0)          # folds the interpolator bias into matmul1
    return vT.astype(jnp.bfloat16), n_pad


def random_search_scores(v, params, source_id, target_id, *, tm=256):
    """Batched RandomSearchWrapper.forward: v (N, LATENT) -> (N,) float32 scores.

    params = (wiT, whT, bh, woT, bo) from make_params (transposed / bf16 / bias-folded).
    tm = candidates per grid step (256 fills the v6e/v7x MXU; 128 is enough on v5e).
    For v7x megacore, size N so that N/tm >= 2 grid steps.
    """
    wiT, whT, bh, woT, bo = params
    n = v.shape[0]
    vT, n_pad = _prep_candidates(v, tm)
    num_tiles = n_pad // tm
    ids = jnp.array([source_id, target_id], dtype=jnp.int32)

    const = lambda i, ids: (0, 0)           # weights stay resident in VMEM across the grid
    grid_spec = pltpu.PrefetchScalarGridSpec(
        num_scalar_prefetch=1,
        grid=(num_tiles,),
        in_specs=[
            pl.BlockSpec((LATENT_PAD, tm), lambda i, ids: (0, i)),   # per-tile candidates
            pl.BlockSpec(wiT.shape, const),
            pl.BlockSpec(whT.shape, const),
            pl.BlockSpec(bh.shape, const),
            pl.BlockSpec(woT.shape, const),
            pl.BlockSpec(bo.shape, const),
        ],
        out_specs=pl.BlockSpec((1, 1, tm), lambda i, ids: (i, 0, 0)),
    )
    out = pl.pallas_call(
        _score_kernel,
        out_shape=jax.ShapeDtypeStruct((num_tiles, 1, tm), jnp.float32),
        grid_spec=grid_spec,
        compiler_params=pltpu.CompilerParams(
            dimension_semantics=("parallel",)),
    )(ids, vT, wiT, whT, bh, woT, bo)
    return out.reshape(n_pad)[:n]


def make_params(key):
    """Deterministic synthetic interpolator + classifier, laid out for the kernel."""
    k_wi, k_wh, k_wo = jax.random.split(key, 3)
    wi = jax.random.normal(k_wi, (LATENT, SAMPLE_DIM), jnp.float32) * 0.10
    bi = jnp.zeros((SAMPLE_DIM,), jnp.float32)
    wh = jax.random.normal(k_wh, (SAMPLE_DIM, HIDDEN), jnp.float32) * 0.05
    wo = jax.random.normal(k_wo, (HIDDEN, NUM_CLASSES), jnp.float32) * 0.10

    # interpolator weight, transposed + latent-padded to 128, bias folded in column LATENT
    wiT = jnp.zeros((SAMPLE_DIM, LATENT_PAD), jnp.float32)
    wiT = wiT.at[:, :LATENT].set(wi.T)
    wiT = wiT.at[:, LATENT].set(bi)
    wiT = wiT.astype(jnp.bfloat16)                        # (SAMPLE_DIM, LATENT_PAD)

    whT = wh.T.astype(jnp.bfloat16)                       # (HIDDEN, SAMPLE_DIM)
    bh = jnp.zeros((HIDDEN, 1), jnp.float32)
    woT = wo.T.astype(jnp.bfloat16)                       # (NUM_CLASSES, HIDDEN)
    bo = jnp.zeros((NUM_CLASSES, 1), jnp.float32)
    return wiT, whT, bh, woT, bo


if __name__ == "__main__":
    key = jax.random.PRNGKey(0)
    k_v, k_p = jax.random.split(key)

    N = 512                                               # batch of candidate latents
    v = jax.random.normal(k_v, (N, LATENT), dtype=jnp.float32)
    params = make_params(k_p)

    source_id, target_id = 3, 7
    scores = random_search_scores(v, params, source_id, target_id, tm=256)
    scores = jax.block_until_ready(scores)

    # sanity: conf, stealth in [0,1] => every piecewise score lies in [-1, 4]
    assert scores.shape == (N,)
    assert bool(jnp.all(jnp.isfinite(scores)))
    assert bool(jnp.all((scores >= -1.0 - 1e-5) & (scores <= 4.0 + 1e-5)))
    print("KERNEL_OK")
</pallas_src>

<mosaic_0001>
module attributes {stable_mosaic.version = 11 : i64} {
  func.func @_score_kernel(%arg0: i32, %arg1: memref<2xi32, #tpu.memory_space<smem>>, %arg2: memref<128x256xbf16, #tpu.memory_space<vmem>>, %arg3: memref<1024x128xbf16, #tpu.memory_space<vmem>>, %arg4: memref<128x1024xbf16, #tpu.memory_space<vmem>>, %arg5: memref<128x1xf32, #tpu.memory_space<vmem>>, %arg6: memref<16x128xbf16, #tpu.memory_space<vmem>>, %arg7: memref<16x1xf32, #tpu.memory_space<vmem>>, %arg8: memref<1x1x256xf32, #tpu.memory_space<vmem>>) attributes {dimension_semantics = [#tpu.dimension_semantics<parallel>], iteration_bounds = array<i64: 2>, scalar_prefetch = 1 : i64, scratch_operands = 0 : i64, tpu.core_type = #tpu.core_type<tc>, window_params = [{transform_indices = @transform_0, window_bounds = array<i64: 128, 256>}, {pipeline_mode = #tpu.pipeline_mode<synchronous>, transform_indices = @transform_1, window_bounds = array<i64: 1024, 128>}, {pipeline_mode = #tpu.pipeline_mode<synchronous>, transform_indices = @transform_2, window_bounds = array<i64: 128, 1024>}, {pipeline_mode = #tpu.pipeline_mode<synchronous>, transform_indices = @transform_3, window_bounds = array<i64: 128, 1>}, {pipeline_mode = #tpu.pipeline_mode<synchronous>, transform_indices = @transform_4, window_bounds = array<i64: 16, 128>}, {pipeline_mode = #tpu.pipeline_mode<synchronous>, transform_indices = @transform_5, window_bounds = array<i64: 16, 1>}, {transform_indices = @transform_6, window_bounds = array<i64: 1, 1, 256>}]} {
    %c0 = arith.constant 0 : index
    %0 = memref.load %arg1[%c0] : memref<2xi32, #tpu.memory_space<smem>>
    %c1 = arith.constant 1 : index
    %1 = memref.load %arg1[%c1] : memref<2xi32, #tpu.memory_space<smem>>
    %c0_0 = arith.constant 0 : index
    %c0_1 = arith.constant 0 : index
    %2 = vector.load %arg3[%c0_0, %c0_1] : memref<1024x128xbf16, #tpu.memory_space<vmem>>, vector<1024x128xbf16>
    %c0_2 = arith.constant 0 : index
    %c0_3 = arith.constant 0 : index
    %3 = vector.load %arg2[%c0_2, %c0_3] : memref<128x256xbf16, #tpu.memory_space<vmem>>, vector<128x256xbf16>
    %cst = arith.constant dense<0.000000e+00> : vector<1024x256xf32>
    %4 = tpu.matmul %2, %3, %cst {dimension_numbers = #tpu.dot_dimension_numbers<[1], [0], [0], [1], [0, 0, 1, 1], [], []>} : vector<1024x128xbf16>, vector<128x256xbf16>, vector<1024x256xf32> -> vector<1024x256xf32>
    %5 = arith.truncf %4 : vector<1024x256xf32> to vector<1024x256xbf16>
    %6 = math.tanh %5 : vector<1024x256xbf16>
    %c0_4 = arith.constant 0 : index
    %c0_5 = arith.constant 0 : index
    %7 = vector.load %arg4[%c0_4, %c0_5] : memref<128x1024xbf16, #tpu.memory_space<vmem>>, vector<128x1024xbf16>
    %cst_6 = arith.constant dense<0.000000e+00> : vector<128x256xf32>
    %8 = tpu.matmul %7, %6, %cst_6 {dimension_numbers = #tpu.dot_dimension_numbers<[1], [0], [0], [1], [0, 0, 1, 1], [], []>} : vector<128x1024xbf16>, vector<1024x256xbf16>, vector<128x256xf32> -> vector<128x256xf32>
    %c0_7 = arith.constant 0 : index
    %c0_8 = arith.constant 0 : index
    %9 = vector.load %arg5[%c0_7, %c0_8] : memref<128x1xf32, #tpu.memory_space<vmem>>, vector<128x1xf32>
    %10 = vector.broadcast %9 : vector<128x1xf32> to vector<128x256xf32>
    %11 = arith.addf %8, %10 : vector<128x256xf32>
    %cst_9 = arith.constant 0.000000e+00 : f32
    %12 = vector.broadcast %cst_9 : f32 to vector<128x256xf32>
    %13 = arith.maximumf %11, %12 : vector<128x256xf32>
    %c0_10 = arith.constant 0 : index
    %c0_11 = arith.constant 0 : index
    %14 = vector.load %arg6[%c0_10, %c0_11] : memref<16x128xbf16, #tpu.memory_space<vmem>>, vector<16x128xbf16>
    %15 = arith.truncf %13 : vector<128x256xf32> to vector<128x256xbf16>
    %cst_12 = arith.constant dense<0.000000e+00> : vector<16x256xf32>
    %16 = tpu.matmul %14, %15, %cst_12 {dimension_numbers = #tpu.dot_dimension_numbers<[1], [0], [0], [1], [0, 0, 1, 1], [], []>} : vector<16x128xbf16>, vector<128x256xbf16>, vector<16x256xf32> -> vector<16x256xf32>
    %c0_13 = arith.constant 0 : index
    %c0_14 = arith.constant 0 : index
    %17 = vector.load %arg7[%c0_13, %c0_14] : memref<16x1xf32, #tpu.memory_space<vmem>>, vector<16x1xf32>
    %18 = vector.broadcast %17 : vector<16x1xf32> to vector<16x256xf32>
    %19 = arith.addf %16, %18 : vector<16x256xf32>
    %cst_15 = arith.constant dense<0xFF800000> : vector<256xf32>
    %20 = vector.multi_reduction <maximumf>, %19, %cst_15 [0] : vector<16x256xf32> to vector<256xf32>
    %21 = vector.shape_cast %20 : vector<256xf32> to vector<1x256xf32>
    %22 = vector.broadcast %21 : vector<1x256xf32> to vector<16x256xf32>
    %23 = arith.subf %19, %22 : vector<16x256xf32>
    %24 = math.exp %23 : vector<16x256xf32>
    %cst_16 = arith.constant dense<0.000000e+00> : vector<256xf32>
    %25 = vector.multi_reduction <add>, %24, %cst_16 [0] : vector<16x256xf32> to vector<256xf32>
    %26 = vector.shape_cast %25 : vector<256xf32> to vector<1x256xf32>
    %27 = tpu.iota {dimensions = array<i32: 0>} : vector<16x256xi32>
    %28 = vector.broadcast %1 : i32 to vector<16x256xi32>
    %29 = arith.cmpi eq, %27, %28 : vector<16x256xi32>
    %cst_17 = arith.constant 0.000000e+00 : f32
    %30 = vector.broadcast %cst_17 : f32 to vector<16x256xf32>
    %31 = arith.select %29, %24, %30 : vector<16x256xi1>, vector<16x256xf32>
    %cst_18 = arith.constant dense<0.000000e+00> : vector<256xf32>
    %32 = vector.multi_reduction <add>, %31, %cst_18 [0] : vector<16x256xf32> to vector<256xf32>
    %33 = vector.shape_cast %32 : vector<256xf32> to vector<1x256xf32>
    %34 = vector.broadcast %0 : i32 to vector<16x256xi32>
    %35 = arith.cmpi eq, %27, %34 : vector<16x256xi32>
    %cst_19 = arith.constant 0.000000e+00 : f32
    %36 = vector.broadcast %cst_19 : f32 to vector<16x256xf32>
    %37 = arith.select %35, %24, %36 : vector<16x256xi1>, vector<16x256xf32>
    %cst_20 = arith.constant dense<0.000000e+00> : vector<256xf32>
    %38 = vector.multi_reduction <add>, %37, %cst_20 [0] : vector<16x256xf32> to vector<256xf32>
    %39 = vector.shape_cast %38 : vector<256xf32> to vector<1x256xf32>
    %40 = tpu.reciprocal %26 : vector<1x256xf32> -> vector<1x256xf32>
    %41 = arith.mulf %33, %40 : vector<1x256xf32>
    %42 = arith.mulf %39, %40 : vector<1x256xf32>
    %43 = arith.addf %41, %42 : vector<1x256xf32>
    %cst_21 = arith.constant 0.00999999977 : f32
    %44 = vector.broadcast %cst_21 : f32 to vector<1x256xf32>
    %45 = arith.cmpf olt, %41, %44 : vector<1x256xf32>
    %cst_22 = arith.constant 1.000000e+00 : f32
    %46 = vector.broadcast %cst_22 : f32 to vector<1x256xf32>
    %47 = arith.subf %42, %46 : vector<1x256xf32>
    %cst_23 = arith.constant 1.000000e+00 : f32
    %48 = vector.broadcast %cst_23 : f32 to vector<1x256xf32>
    %49 = arith.cmpf olt, %43, %48 : vector<1x256xf32>
    %cst_24 = arith.constant 5.000000e-01 : f32
    %50 = vector.broadcast %cst_24 : f32 to vector<1x256xf32>
    %51 = arith.cmpf olt, %42, %50 : vector<1x256xf32>
    %cst_25 = arith.constant 1.000000e+00 : f32
    %52 = vector.broadcast %cst_25 : f32 to vector<1x256xf32>
    %53 = arith.cmpf olt, %41, %52 : vector<1x256xf32>
    %cst_26 = arith.constant 2.000000e+00 : f32
    %54 = vector.broadcast %cst_26 : f32 to vector<1x256xf32>
    %55 = arith.addf %54, %41 : vector<1x256xf32>
    %cst_27 = arith.constant 2.000000e+00 : f32
    %56 = vector.broadcast %cst_27 : f32 to vector<1x256xf32>
    %57 = arith.addf %56, %43 : vector<1x256xf32>
    %58 = arith.select %53, %55, %57 : vector<1x256xi1>, vector<1x256xf32>
    %59 = arith.select %51, %43, %58 : vector<1x256xi1>, vector<1x256xf32>
    %60 = arith.select %49, %41, %59 : vector<1x256xi1>, vector<1x256xf32>
    %61 = arith.select %45, %47, %60 : vector<1x256xi1>, vector<1x256xf32>
    %62 = vector.shape_cast %61 : vector<1x256xf32> to vector<1x1x256xf32>
    %c0_28 = arith.constant 0 : index
    %c0_29 = arith.constant 0 : index
    %c0_30 = arith.constant 0 : index
    %63 = vector.load %arg8[%c0_28, %c0_29, %c0_30] : memref<1x1x256xf32, #tpu.memory_space<vmem>>, vector<1x1x256xf32>
    tpu.vector_store %arg8[%c0_28, %c0_29, %c0_30], %62 {strides = array<i32>} : memref<1x1x256xf32, #tpu.memory_space<vmem>>, vector<1x1x256xf32>,
    return
  }
  func.func @transform_0(%arg0: i32, %arg1: memref<2xi32, #tpu.memory_space<smem>>) -> (i32, i32) {
    %c0_i32 = arith.constant 0 : i32
    %c0_i32_0 = arith.constant 0 : i32
    return %c0_i32, %arg0 : i32, i32
  }
  func.func @transform_1(%arg0: i32, %arg1: memref<2xi32, #tpu.memory_space<smem>>) -> (i32, i32) {
    %c0_i32 = arith.constant 0 : i32
    %c0_i32_0 = arith.constant 0 : i32
    %c0_i32_1 = arith.constant 0 : i32
    return %c0_i32, %c0_i32_0 : i32, i32
  }
  func.func @transform_2(%arg0: i32, %arg1: memref<2xi32, #tpu.memory_space<smem>>) -> (i32, i32) {
    %c0_i32 = arith.constant 0 : i32
    %c0_i32_0 = arith.constant 0 : i32
    %c0_i32_1 = arith.constant 0 : i32
    return %c0_i32, %c0_i32_0 : i32, i32
  }
  func.func @transform_3(%arg0: i32, %arg1: memref<2xi32, #tpu.memory_space<smem>>) -> (i32, i32) {
    %c0_i32 = arith.constant 0 : i32
    %c0_i32_0 = arith.constant 0 : i32
    %c0_i32_1 = arith.constant 0 : i32
    return %c0_i32, %c0_i32_0 : i32, i32
  }
  func.func @transform_4(%arg0: i32, %arg1: memref<2xi32, #tpu.memory_space<smem>>) -> (i32, i32) {
    %c0_i32 = arith.constant 0 : i32
    %c0_i32_0 = arith.constant 0 : i32
    %c0_i32_1 = arith.constant 0 : i32
    return %c0_i32, %c0_i32_0 : i32, i32
  }
  func.func @transform_5(%arg0: i32, %arg1: memref<2xi32, #tpu.memory_space<smem>>) -> (i32, i32) {
    %c0_i32 = arith.constant 0 : i32
    %c0_i32_0 = arith.constant 0 : i32
    %c0_i32_1 = arith.constant 0 : i32
    return %c0_i32, %c0_i32_0 : i32, i32
  }
  func.func @transform_6(%arg0: i32, %arg1: memref<2xi32, #tpu.memory_space<smem>>) -> (i32, i32, i32) {
    %c0_i32 = arith.constant 0 : i32
    %c0_i32_0 = arith.constant 0 : i32
    %c0_i32_1 = arith.constant 0 : i32
    return %arg0, %c0_i32, %c0_i32_0 : i32, i32, i32
  }
}

</mosaic_0001>

<bundles_post_ra>
// kernel: tpu_custom_call.1
= control target key start
LH: loop header
LB: loop body
LE: loop exit
PB: predicated region body
PF: predicated region fallthrough
CT: control target
= control target key end

     0   :  { %s5528_s27 = smov [#allocation3]   ;;  %s7174_s0 = inlined_call_operand.vmem [shape: s32[2], index: 0, kind: input, shape index: {}]   ;;  %s7175_s1 = inlined_call_operand.hbm [shape: bf16[128,512], index: 1, kind: input, shape index: {}]   ;;  %s7176_s2 = inlined_call_operand.hbm [shape: bf16[1024,128], index: 2, kind: input, shape index: {}]   ;;  %s7177_s3 = inlined_call_operand.hbm [shape: bf16[128,1024], index: 3, kind: input, shape index: {}]   ;;  %s7178_s4 = inlined_call_operand.vmem [shape: f32[128,1], index: 4, kind: input, shape index: {}]   ;;  %s7179_s5 = inlined_call_operand.vmem [shape: bf16[16,128], index: 5, kind: input, shape index: {}]   ;;  %s7180_s6 = inlined_call_operand.vmem [shape: f32[16,1], index: 6, kind: input, shape index: {}]   ;;  %s7181_s7 = inlined_call_operand.hbm [shape: f32[2,1,256], index: 7, kind: output, shape index: {}]  }
   0x1   :  { %7271 = sst [smem:[#allocation126_spill]] %s7176_s2  ;;  %s13_s26 = sshll.u32 %s7174_s0, 4  ;;  %s14_s26 = int_to_ptr.vmem [resolvable:$true] %s13_s26 }
   0x2   :  { %16 = dma.vmem_to_smem %s14_s26, 16, %s5528_s27, [#allocation2] }
   0x3   :  { %5498 = dma.done.wait [#allocation2], 16 }
   0x4   :  { %5499 = vsyncadd [#allocation2], 4294967280 }
   0x5   :  { %19 = sfence }
   0x6   :  { %20 = vsyncpa [#allocation5], 0 }
   0x7   :  { %22 = vsyncpa [#allocation5 + $0x1], 0 }
   0x8   :  { %23 = vsyncpa [#allocation8], 0 }
   0x9   :  { %24 = vsyncpa [#allocation6], 0 }
   0xa   :  { %26 = vsyncpa [#allocation6 + $0x1], 0  ;;  %s5582_s28 = smov 0   ;;  %s5584_s29 = smov 0  }
   0xb   :  { %s5586_s30 = smov 0   ;;  %s5588_s8 = smov 0  }
   0xc LB: > { %s5603_s0 = sadd.s32 4294967295, %s5526_s8   ;;  %s3968_s9 = sadd.s32 4294967294, %s5526_s8   ;;  %s5526_s8 = sphi %s5588_s8, %s7536_s8   ;;  %s5522_s30 = sphi %s5586_s30, %s7535_s30   ;;  %s5518_s29 = sphi %s5584_s29, %s7534_s29   ;;  %s5514_s28 = sphi %s5582_s28, %s7533_s28  }
   0xd   : > { %p52_p0 = scmp.ne.s32.totalorder %s5518_s29, %s5514_s28  ;;  %p53_p1 = scmp.eq.s32.totalorder %s5603_s0, 0 }
   0xe   : > { %p181_p2 = scmp.eq.s32.totalorder %s5603_s0, 1  ;;  %p187_p3 = scmp.eq.s32.totalorder %s3968_s9, 1 }
   0xf   : > { %p5612_p4 = por %p53_p1, %p52_p0  ;;  %p3969_p5 = scmp.ge.s32.totalorder %s5526_s8, 1 }
  0x10   : > { %p5617_p6 = por %p187_p3, %p52_p0  ;;  %p194_p7 = scmp.lt.s32.totalorder %s5526_s8, 3 }
  0x11   : > { %s7274_s2 = sld [smem:[#allocation126_spill]]  ;;  %s5529_s16 = smov [#allocation7]  }
  0x12   : > { %p5625_p8 = pnand %p3969_p5, %p194_p7  ;;  %s207_s17 = sshll.u32 %s5529_s16, 4  ;;  %s208_s17 = int_to_ptr.vmem [resolvable:$true] %s207_s17 }
  0x13   : > { %s219_s20 = sshll.u32 %s7177_s3, 4  ;;  %s5530_s21 = smov 64   ;;  %s220_s20 = int_to_ptr.hbm [resolvable:$true] %s219_s20 }
  0x14   : > { %p4726_p9 = pneg %p5625_p8  ;;  %s5531_s22 = smov 4  }
  0x15   : > { %s5532_s23 = smov [#allocation9]   ;;  %s5533_s25 = smov 512  }
  0x16   : > { %p4727_p10 = pnand %p4726_p9, %p53_p1  ;;  %s221_s24 = sshll.u32 %s5532_s23, 4  ;;  %s222_s24 = int_to_ptr.vmem [resolvable:$true] %s221_s24 }
  0x17   : > { %s205_s14 = sshll.u32 %s7274_s2, 4  ;;  %s5534_s26 = smov 32   ;;  %s206_s14 = int_to_ptr.hbm [resolvable:$true] %s205_s14 }
  0x18   : > { %4729 = dma.hbm_to_vmem [thread:$0]  (!%p4727_p10), %s206_s14, 8192, %s208_s17, [#allocation8], %s5530_s21, %s5530_s21, %s5531_s22  }
  0x19   : > { %4732 = dma.hbm_to_vmem [thread:$0]  (!%p4727_p10), %s220_s20, 8192, %s222_s24, [#allocation8], %s5533_s25, %s5533_s25, %s5534_s26  }
  0x1a   : > { %s5638_s27 = sadd.s32 1, %s5526_s8   ;;  %s39_s12 = sadd.s32 1, %s5522_s30 }
  0x1b   : > { %s36_s9 = ssub.s32 %s5526_s8, %s5638_s27  ;;  %p46_p13 = scmp.ne.s32.totalorder %s5522_s30, %s5518_s29 }
  0x1c   : > { %p37_p12 = scmp.eq.s32.totalorder %s36_s9, 0  ;;  %p47_p0 = scmp.eq.s32.totalorder %s5526_s8, 0 }
  0x1d   : > { %p5651_p5 = por %p181_p2, %p46_p13  ;;  %p4743_p7 = scmp.lt.s32.totalorder %s5526_s8, 2 }
  0x1e   : > { %s5647_s13 = scalar_select %p37_p12, %s5522_s30, %s39_s12  }
  0x1f   : > { %p48_p3 = por %p47_p0, %p46_p13  ;;  %s244_s16 = sand.u32 1, %s5522_s30  }
  0x20   : > { %s3973_s17 = sshll.u32 %s244_s16, 7  ;;  %s4568_s18 = sshll.u32 %s5526_s8, 3 }
  0x21   : > { %s253_s21 = scalar_lea.hbm %s7175_s1, %s4568_s18  ;;  %s248_s22 = scalar_lea.vmem [#allocation4], %s3973_s17 }
  0x22   : > { %s256_s23 = sshll.u32 %s248_s22, 4  ;;  %s254_s24 = sshll.u32 %s253_s21, 4  ;;  %s257_s23 = int_to_ptr.vmem [resolvable:$true] %s256_s23  ;;  %s255_s24 = int_to_ptr.hbm [resolvable:$true] %s254_s24 }
  0x23   : > { %p5661_p9 = pnand %p4743_p7, %p48_p3  ;;  %s245_s26 = scalar_lea.sflag [#allocation5], %s244_s16 }
  0x24   : > { %s5424_s9 = sshra.s32 %s255_s24, 4  ;;  %s5431_s19 = scalar_lea.hbm %s7175_s1, 256  ;;  %s5425_s9 = int_to_ptr.hbm [resolvable:$true] %s5424_s9 }
  0x25   : > { %s5426_s12 = scalar_lea.hbm %s5425_s9, 128  ;;  %p5428_p10 = pneg %p5661_p9 }
  0x26   : > { %p5427_p2 = scmp.ne.s32.totalorder %s5425_s9, %s5426_s12  ;;  %p5432_p0 = scmp.lt.s32.totalorder %s5425_s9, %s7175_s1 }
  0x27   : > { %p5433_p3 = scmp.lt.s32.totalorder %s5431_s19, %s5426_s12 }
  0x28   : > { %p5429_p12 = pnand %p5428_p10, %p5427_p2 }
  0x29   : > { %p5434_p7 = por %p5433_p3, %p5432_p0 }
  0x2a   : > { %p5430_p13 = pneg %p5429_p12 }
  0x2c   : > { %p5435_p11 = pnand %p5434_p7, %p5430_p13 }
  0x2e   : > { %5438 = shalt.err (!%p5435_p11)
}
  0x2f   : > { %s5535_s16 = smov 256   ;;  %s5536_s22 = smov 128  }
  0x30   : > { %s5537_s2 = smov 8   ;;  %268 = sbr.rel (%p5625_p8) target bundleno = 2290 (0x8f2), region = 44 }
  0x31   : > { %4736 = dma.hbm_to_vmem [thread:$0]  (!%p5661_p9), %s255_s24, 2048, %s257_s23, %s245_s26, %s5535_s16, %s5536_s22, %s5537_s2  }
  0x35   : > { %s5678_s18 = sand.u32 1, %s5518_s29  }
  0x36   : > { %s3977_s9 = sshll.u32 %s5678_s18, 7  ;;  %s271_s12 = scalar_lea.sflag [#allocation5], %s5678_s18 }
  0x37   : > { %s5682_s17 = scalar_lea.vmem [#allocation4], %s3977_s9 }
  0x38   : > { %5501 = dma.done.wait (%p5612_p4), %s271_s12, 2048  }
  0x39   : > { %5503 = vsyncadd (%p5612_p4), %s271_s12, 4294965248 }
  0x3a   : > { %5505 = dma.done.wait (%p53_p1), [#allocation8], 16384  }
  0x3b   : > { %5507 = vsyncadd (%p53_p1), [#allocation8], 4294950912  ;;  %v4296_v0 = vld [vmem:[%s5682_s17 + $0x70] sm:$0xf]  ;;  %v4648_v1 = vld [vmem:[%s5682_s17 + $0x74] sm:$0xf0] }
  0x3c   : > { %v4288_v2 = vld [vmem:[%s5682_s17 + $0x60] sm:$0xf]  ;;  %v4297_v3 = vor.u32 %v4648_v1, %v4296_v0  ;;  %v4646_v4 = vld [vmem:[%s5682_s17 + $0x64] sm:$0xf0]  ;;  %v4280_v6 = vld [vmem:[%s5682_s17 + $0x50] sm:$0xf] }
  0x3d   : > { %v4289_v5 = vor.u32 %v4646_v4, %v4288_v2  ;;  %v4644_v7 = vld [vmem:[%s5682_s17 + $0x54] sm:$0xf0]  ;;  %v4272_v9 = vld [vmem:[%s5682_s17 + $0x40] sm:$0xf]  ;;  %v4642_v10 = vld [vmem:[%s5682_s17 + $0x44] sm:$0xf0] }
  0x3e   : > { %925 = vmatpush.bf16.msra.mxu0 %v4297_v3  ;;  %v4281_v8 = vor.u32 %v4644_v7, %v4280_v6  ;;  %v4273_v11 = vor.u32 %v4642_v10, %v4272_v9  ;;  %v4264_v12 = vld [vmem:[%s5682_s17 + $0x30] sm:$0xf]  ;;  %v4640_v13 = vld [vmem:[%s5682_s17 + $0x34] sm:$0xf0]  ;;  %v4256_v15 = vld [vmem:[%s5682_s17 + $0x20] sm:$0xf] }
  0x3f   : > { %v4265_v14 = vor.u32 %v4640_v13, %v4264_v12  ;;  %v4638_v16 = vld [vmem:[%s5682_s17 + $0x24] sm:$0xf0]  ;;  %v4248_v18 = vld [vmem:[%s5682_s17 + $0x10] sm:$0xf]  ;;  %v4636_v19 = vld [vmem:[%s5682_s17 + $0x14] sm:$0xf0] }
  0x40   : > { %v4257_v17 = vor.u32 %v4638_v16, %v4256_v15  ;;  %v4249_v20 = vor.u32 %v4636_v19, %v4248_v18  ;;  %v4240_v21 = vld [vmem:[%s5682_s17] sm:$0xf]  ;;  %v4634_v22 = vld [vmem:[%s5682_s17 + $0x4] sm:$0xf0]  ;;  %v5714_v26 = vld [vmem:[#allocation7 + $0x10] sm:$0xff]  ;;  %s3981_s20 = sld [smem:[#allocation3 + $0x1]] }
  0x41   : > { %v4241_v23 = vor.u32 %v4634_v22, %v4240_v21  ;;  %v5708_v24 = vld [vmem:[#allocation7] sm:$0xff]  ;;  %v5711_v25 = vld [vmem:[#allocation7 + $0x8] sm:$0xff]  ;;  %v5717_v27 = vld [vmem:[#allocation7 + $0x18] sm:$0xff]  ;;  %s315_s21 = sld [smem:[#allocation3]]  ;;  %s3980_s16 = sshll.u32 %s5678_s18, 1 }
  0x42   : > { %926 = vmatpush.bf16.msra.mxu0 %v4289_v5  ;;  %v5720_v28 = vld [vmem:[#allocation7 + $0x20] sm:$0xff]  ;;  %v5723_v29 = vld [vmem:[#allocation7 + $0x28] sm:$0xff]  ;;  %v5726_v30 = vld [vmem:[#allocation7 + $0x30] sm:$0xff]  ;;  %s4565_s22 = sshll.u32 %s5603_s0, 1  ;;  %s313_s0 = scalar_lea.vmem [#allocation10], %s3980_s16 }
  0x43   : > { %v5729_v31 = vld [vmem:[#allocation7 + $0x38] sm:$0xff]  ;;  %v5732_v32 = vld [vmem:[#allocation7 + $0x40] sm:$0xff]  ;;  %v5737_v36 = vld [vmem:[#allocation7 + $0x48] sm:$0xff]  ;;  %s3876_s2 = sshll.u32 %s313_s0, 4  ;;  %s3864_s15 = scalar_lea.sflag [#allocation6], %s5678_s18  ;;  %s3877_s2 = int_to_ptr.vmem [resolvable:$true] %s3876_s2 }
  0x44   : > { %v5742_v40 = vld [vmem:[#allocation7 + $0x50] sm:$0xff]  ;;  %v5747_v44 = vld [vmem:[#allocation7 + $0x58] sm:$0xff]  ;;  %v5750_v48 = vld [vmem:[#allocation7 + $0x60] sm:$0xff]  ;;  %s5474_s19 = scalar_lea.hbm %s7181_s7, 4 }
  0x45   : > { %v5753_v51 = vld [vmem:[#allocation7 + $0x68] sm:$0xff]  ;;  %v5756_v54 = vld [vmem:[#allocation7 + $0x70] sm:$0xff]  ;;  %v5759_v57 = vld [vmem:[#allocation7 + $0x78] sm:$0xff] }
  0x46   : > { %927 = vmatpush.bf16.msra.mxu0 %v4281_v8  ;;  %v5762_v5 = vld [vmem:[#allocation7 + $0x80] sm:$0xff] }
  0x4a   : > { %928 = vmatpush.bf16.msra.mxu0 %v4273_v11 }
  0x4e   : > { %929 = vmatpush.bf16.msra.mxu0 %v4265_v14 }
  0x52   : > { %930 = vmatpush.bf16.msra.mxu0 %v4257_v17 }
  0x56   : > { %931 = vmatpush.bf16.msra.mxu0 %v4249_v20 }
  0x5a   : > { %932 = vmatpush.bf16.msra.mxu0 %v4241_v23 }
  0x5d   : > { %933 = vmatmul.bf16.vlgmr.msra.gmra.mxu0 %v5708_v24 }
  0x6d   : > { %938 = vmatmul.bf16.gmra.mxu0 %v5711_v25 }
  0x7d   : > { %943 = vmatmul.bf16.gmra.mxu0 %v5714_v26 }
  0x8d   : > { %948 = vmatmul.bf16.gmra.mxu0 %v5717_v27 }
  0x9d   : > { %953 = vmatmul.bf16.gmra.mxu0 %v5720_v28 }
  0xad   : > { %958 = vmatmul.bf16.gmra.mxu0 %v5723_v29 }
  0xbd   : > { %963 = vmatmul.bf16.gmra.mxu0 %v5726_v30 }
  0xcd   : > { %968 = vmatmul.bf16.gmra.mxu0 %v5729_v31 }
  0xda   : > { %v934_v33 = vpop.f32.mrf.mxu0 }
  0xdd   : > { %973 = vmatmul.bf16.gmra.mxu0 %v5732_v32 }
  0xe2   : > { %v936_v34 = vpop.f32.mrf.mxu0 }
  0xe3   : > { %v5735_v35 = vpack.c.bf16 %v936_v34, %v934_v33 }
  0xea   : > { %v939_v37 = vpop.f32.mrf.mxu0 }
  0xed   : > { %978 = vmatmul.bf16.gmra.mxu0 %v5737_v36 }
  0xf2   : > { %v941_v38 = vpop.f32.mrf.mxu0 }
  0xf3   : > { %v5740_v39 = vpack.c.bf16 %v941_v38, %v939_v37 }
  0xf5   : > { %v1715_v38 = vunpack.c.l.bf16 %v5740_v39 }
  0xfa   : > { %v944_v41 = vpop.f32.mrf.mxu0 }
  0xfd   : > { %983 = vmatmul.bf16.gmra.mxu0 %v5742_v40 }
 0x102   : > { %v946_v42 = vpop.f32.mrf.mxu0 }
 0x103   : > { %v5745_v43 = vpack.c.bf16 %v946_v42, %v944_v41  ;;  %v5770_v41 = vld [vmem:[#allocation7 + $0x88] sm:$0xff]  ;;  %v1717_v42 = vunpack.c.h.bf16 %v5740_v39 }
 0x105   : > { %v1719_v22 = vunpack.c.l.bf16 %v5745_v43  ;;  %v1721_v23 = vunpack.c.h.bf16 %v5745_v43  ;;  %v1713_v43 = vunpack.c.h.bf16 %v5735_v35 }
 0x10a   : > { %v949_v45 = vpop.f32.mrf.mxu0 }
 0x10d   : > { %988 = vmatmul.bf16.gmra.mxu0 %v5747_v44 }
 0x112   : > { %v951_v46 = vpop.f32.mrf.mxu0 }
 0x113   : > { %v1589_v47 = vpack.c.bf16 %v951_v46, %v949_v45 }
 0x115   : > { %v1723_v15 = vunpack.c.l.bf16 %v1589_v47  ;;  %v1725_v16 = vunpack.c.h.bf16 %v1589_v47 }
 0x11a   : > { %v954_v49 = vpop.f32.mrf.mxu0 }
 0x11d   : > { %993 = vmatmul.bf16.gmra.mxu0 %v5750_v48 }
 0x122   : > { %v956_v50 = vpop.f32.mrf.mxu0 }
 0x123   : > { %v1591_v3 = vpack.c.bf16 %v956_v50, %v954_v49  ;;  %v1711_v50 = vunpack.c.l.bf16 %v5735_v35 }
 0x125   : > { %v1727_v9 = vunpack.c.l.bf16 %v1591_v3  ;;  %v1729_v11 = vunpack.c.h.bf16 %v1591_v3 }
 0x12a   : > { %v959_v52 = vpop.f32.mrf.mxu0 }
 0x12d   : > { %998 = vmatmul.bf16.gmra.mxu0 %v5753_v51 }
 0x132   : > { %v961_v53 = vpop.f32.mrf.mxu0 }
 0x133   : > { %v1593_v62 = vpack.c.bf16 %v961_v53, %v959_v52 }
 0x135   : > { %v1731_v4 = vunpack.c.l.bf16 %v1593_v62  ;;  %v1733_v6 = vunpack.c.h.bf16 %v1593_v62 }
 0x13a   : > { %v964_v55 = vpop.f32.mrf.mxu0 }
 0x13d   : > { %1003 = vmatmul.bf16.gmra.mxu0 %v5756_v54 }
 0x142   : > { %v966_v56 = vpop.f32.mrf.mxu0 }
 0x143   : > { %v1595_v59 = vpack.c.bf16 %v966_v56, %v964_v55 }
 0x145   : > { %v1735_v63 = vunpack.c.l.bf16 %v1595_v59  ;;  %v1737_v2 = vunpack.c.h.bf16 %v1595_v59 }
 0x14a   : > { %v969_v58 = vpop.f32.mrf.mxu0 }
 0x14d   : > { %1008 = vmatmul.bf16.gmra.mxu0 %v5759_v57 }
 0x152   : > { %v971_v60 = vpop.f32.mrf.mxu0 }
 0x153   : > { %v1597_v61 = vpack.c.bf16 %v971_v60, %v969_v58 }
 0x155   : > { %v1739_v0 = vunpack.c.l.bf16 %v1597_v61  ;;  %v1741_v1 = vunpack.c.h.bf16 %v1597_v61 }
 0x157   : > { %4793 = vtanh.f32 %v1739_v0 }
 0x158   : > { %4795 = vtanh.f32 %v1741_v1 }
 0x159   : > { %4797 = vtanh.f32 %v1735_v63  ;;  %v5778_v63 = vld [vmem:[#allocation7 + $0x90] sm:$0xff] }
 0x15a   : > { %4799 = vtanh.f32 %v1737_v2  ;;  %v974_v7 = vpop.f32.mrf.mxu0 }
 0x15b   : > { %4801 = vtanh.f32 %v1731_v4  ;;  %v4647_v4 = vld [vmem:[%s5682_s17 + $0x74] sm:$0xf] }
 0x15c   : > { %4803 = vtanh.f32 %v1733_v6  ;;  %v4298_v6 = vld [vmem:[%s5682_s17 + $0x78] sm:$0xf0] }
 0x15d   : > { %v4794_v8 = vpop.eup %4793  ;;  %1013 = vmatmul.bf16.gmra.mxu0 %v5762_v5  ;;  %4805 = vtanh.f32 %v1727_v9 }
 0x15e   : > { %v4796_v10 = vpop.eup %4795  ;;  %4807 = vtanh.f32 %v1729_v11  ;;  %v4290_v11 = vld [vmem:[%s5682_s17 + $0x68] sm:$0xf0] }
 0x15f   : > { %v4798_v12 = vpop.eup %4797  ;;  %v2237_v13 = vpack.c.bf16 %v4796_v10, %v4794_v8  ;;  %4809 = vtanh.f32 %v1723_v15  ;;  %v4301_v8 = vor.u32 %v4647_v4, %v4298_v6  ;;  %v4645_v10 = vld [vmem:[%s5682_s17 + $0x64] sm:$0xf] }
 0x160   : > { %v4800_v14 = vpop.eup %4799  ;;  %4811 = vtanh.f32 %v1725_v16 }
 0x161   : > { %2831 = vmatpush.bf16.msra.mxu2 %v2237_v13  ;;  %v4802_v18 = vpop.eup %4801  ;;  %v2235_v20 = vpack.c.bf16 %v4800_v14, %v4798_v12  ;;  %4813 = vtanh.f32 %v1719_v22  ;;  %1254 = vmatpush.bf16.msra.mxu1 %v4301_v8  ;;  %v4293_v12 = vor.u32 %v4645_v10, %v4290_v11  ;;  %v4643_v13 = vld [vmem:[%s5682_s17 + $0x54] sm:$0xf]  ;;  %v4282_v14 = vld [vmem:[%s5682_s17 + $0x58] sm:$0xf0]  ;;  %v5819_v11 = vld [vmem:[#allocation7 + $0xc0] sm:$0xff] }
 0x162   : > { %v976_v17 = vpop.f32.mrf.mxu0  ;;  %v4804_v21 = vpop.eup %4803  ;;  %4815 = vtanh.f32 %v1721_v23  ;;  %v4285_v15 = vor.u32 %v4643_v13, %v4282_v14  ;;  %v4639_v22 = vld [vmem:[%s5682_s17 + $0x34] sm:$0xf]  ;;  %v4266_v23 = vld [vmem:[%s5682_s17 + $0x38] sm:$0xf0] }
 0x163   : > { %v5765_v19 = vpack.c.bf16 %v976_v17, %v974_v7  ;;  %v4806_v33 = vpop.eup %4805  ;;  %v2233_v34 = vpack.c.bf16 %v4804_v21, %v4802_v18  ;;  %4817 = vtanh.f32 %v1715_v38  ;;  %v5785_v7 = vld [vmem:[#allocation7 + $0x98] sm:$0xff]  ;;  %v4641_v18 = vld [vmem:[%s5682_s17 + $0x44] sm:$0xf] }
 0x164   : > { %v4808_v37 = vpop.eup %4807  ;;  %4819 = vtanh.f32 %v1717_v42  ;;  %v4637_v38 = vld [vmem:[%s5682_s17 + $0x24] sm:$0xf]  ;;  %v4258_v42 = vld [vmem:[%s5682_s17 + $0x28] sm:$0xf0] }
 0x165   : > { %2832 = vmatpush.bf16.msra.mxu2 %v2235_v20  ;;  %v4810_v46 = vpop.eup %4809  ;;  %v2231_v47 = vpack.c.bf16 %v4808_v37, %v4806_v33  ;;  %4821 = vtanh.f32 %v1711_v50  ;;  %1255 = vmatpush.bf16.msra.mxu1 %v4293_v12  ;;  %v4274_v20 = vld [vmem:[%s5682_s17 + $0x48] sm:$0xf0]  ;;  %v5798_v33 = vld [vmem:[#allocation7 + $0xa0] sm:$0xff] }
 0x166   : > { %v4812_v49 = vpop.eup %4811  ;;  %4823 = vtanh.f32 %v1713_v43  ;;  %v4277_v21 = vor.u32 %v4641_v18, %v4274_v20  ;;  %v4633_v43 = vld [vmem:[%s5682_s17 + $0x4] sm:$0xf] }
 0x167   : > { %v4814_v52 = vpop.eup %4813  ;;  %v2229_v53 = vpack.c.bf16 %v4812_v49, %v4810_v46  ;;  %v4635_v46 = vld [vmem:[%s5682_s17 + $0x14] sm:$0xf] }
 0x168   : > { %v4816_v55 = vpop.eup %4815 }
 0x169   : > { %2833 = vmatpush.bf16.msra.mxu2 %v2233_v34  ;;  %v4818_v56 = vpop.eup %4817  ;;  %v2227_v59 = vpack.c.bf16 %v4816_v55, %v4814_v52  ;;  %1256 = vmatpush.bf16.msra.mxu1 %v4285_v15  ;;  %v4269_v34 = vor.u32 %v4639_v22, %v4266_v23  ;;  %v4242_v52 = vld [vmem:[%s5682_s17 + $0x8] sm:$0xf0] }
 0x16a   : > { %v979_v45 = vpop.f32.mrf.mxu0  ;;  %v4820_v60 = vpop.eup %4819  ;;  %v5807_v55 = vld [vmem:[#allocation7 + $0xa8] sm:$0xff] }
 0x16b   : > { %v4822_v61 = vpop.eup %4821  ;;  %v2225_v62 = vpack.c.bf16 %v4820_v60, %v4818_v56 }
 0x16c   : > { %v4824_v35 = vpop.eup %4823 }
 0x16d   : > { %2834 = vmatpush.bf16.msra.mxu2 %v2231_v47  ;;  %1018 = vmatmul.bf16.gmra.mxu0 %v5770_v41  ;;  %v2223_v1 = vpack.c.bf16 %v4824_v35, %v4822_v61  ;;  %v4250_v47 = vld [vmem:[%s5682_s17 + $0x18] sm:$0xf0]  ;;  %s3874_s17 = scalar_lea.hbm %s7181_s7, %s4565_s22 }
 0x16e   : > { %1257 = vmatpush.bf16.msra.mxu1 %v4277_v21  ;;  %v4253_v49 = vor.u32 %v4635_v46, %v4250_v47  ;;  %s3878_s10 = sshll.u32 %s3874_s17, 4  ;;  %s3879_s10 = int_to_ptr.hbm [resolvable:$true] %s3878_s10 }
 0x16f   : > { %s5468_s23 = sshra.s32 %s3879_s10, 4  ;;  %s5469_s23 = int_to_ptr.hbm [resolvable:$true] %s5468_s23 }
 0x170   : > { %s5470_s24 = scalar_lea.hbm %s5469_s23, 2  ;;  %p5475_p11 = scmp.lt.s32.totalorder %s5469_s23, %s7181_s7 }
 0x171   : > { %2835 = vmatpush.bf16.msra.mxu2 %v2229_v53  ;;  %v4245_v53 = vor.u32 %v4633_v43, %v4242_v52  ;;  %p5471_p1 = scmp.ne.s32.totalorder %s5469_s23, %s5470_s24  ;;  %p5476_p9 = scmp.lt.s32.totalorder %s5474_s19, %s5470_s24 }
 0x172   : > { %v981_v39 = vpop.f32.mrf.mxu0  ;;  %1258 = vmatpush.bf16.msra.mxu1 %v4269_v34 }
 0x173   : > { %v5776_v58 = vpack.c.bf16 %v981_v39, %v979_v45  ;;  %v4261_v45 = vor.u32 %v4637_v38, %v4258_v42  ;;  %p5472_p4 = pnand %p5471_p1, %p5651_p5  ;;  %p5477_p2 = por %p5476_p9, %p5475_p11 }
 0x175   : > { %2836 = vmatpush.bf16.msra.mxu2 %v2227_v59  ;;  %v5811_v59 = vld [vmem:[#allocation7 + $0xb0] sm:$0xff]  ;;  %v1747_v43 = vunpack.c.l.bf16 %v5776_v58  ;;  %v1749_v52 = vunpack.c.h.bf16 %v5776_v58  ;;  %p5473_p8 = pneg %p5472_p4 }
 0x176   : > { %1259 = vmatpush.bf16.msra.mxu1 %v4261_v45 }
 0x177   : > { %p5478_p10 = pnand %p5477_p2, %p5473_p8 }
 0x179   : > { %2837 = vmatpush.bf16.msra.mxu2 %v2225_v62  ;;  %v5815_v62 = vld [vmem:[#allocation7 + $0xb8] sm:$0xff] }
 0x17a   : > { %v984_v0 = vpop.f32.mrf.mxu0  ;;  %1260 = vmatpush.bf16.msra.mxu1 %v4253_v49 }
 0x17d   : > { %2838 = vmatpush.bf16.msra.mxu2 %v2223_v1  ;;  %1023 = vmatmul.bf16.gmra.mxu0 %v5778_v63 }
 0x17e   : > { %1261 = vmatpush.bf16.msra.mxu1 %v4245_v53 }
 0x181   : > { %1262 = vmatmul.bf16.vlgmr.msra.gmra.mxu1 %v5708_v24 }
 0x182   : > { %v986_v2 = vpop.f32.mrf.mxu0 }
 0x183   : > { %v5781_v3 = vpack.c.bf16 %v986_v2, %v984_v0 }
 0x185   : > { %v1751_v45 = vunpack.c.l.bf16 %v5781_v3  ;;  %v1753_v46 = vunpack.c.h.bf16 %v5781_v3  ;;  %v1743_v3 = vunpack.c.l.bf16 %v5765_v19 }
 0x18a   : > { %v989_v9 = vpop.f32.mrf.mxu0 }
 0x18d   : > { %1028 = vmatmul.bf16.gmra.mxu0 %v5785_v7 }
 0x191   : > { %1267 = vmatmul.bf16.gmra.mxu1 %v5711_v25 }
 0x192   : > { %v991_v16 = vpop.f32.mrf.mxu0 }
 0x193   : > { %v5792_v17 = vpack.c.bf16 %v991_v16, %v989_v9 }
 0x195   : > { %v1755_v22 = vunpack.c.l.bf16 %v5792_v17  ;;  %v1757_v23 = vunpack.c.h.bf16 %v5792_v17  ;;  %v5830_v17 = vld [vmem:[#allocation7 + $0xc8] sm:$0xff] }
 0x19a   : > { %v994_v37 = vpop.f32.mrf.mxu0 }
 0x19d   : > { %1033 = vmatmul.bf16.gmra.mxu0 %v5798_v33 }
 0x1a1   : > { %1272 = vmatmul.bf16.gmra.mxu1 %v5714_v26 }
 0x1a2   : > { %v996_v50 = vpop.f32.mrf.mxu0 }
 0x1a3   : > { %v1607_v25 = vpack.c.bf16 %v996_v50, %v994_v37 }
 0x1a5   : > { %v1759_v14 = vunpack.c.l.bf16 %v1607_v25  ;;  %v1761_v16 = vunpack.c.h.bf16 %v1607_v25  ;;  %v5839_v25 = vld [vmem:[#allocation7 + $0xd0] sm:$0xff] }
 0x1aa   : > { %v999_v39 = vpop.f32.mrf.mxu0 }
 0x1ad   : > { %1038 = vmatmul.bf16.gmra.mxu0 %v5807_v55 }
 0x1b1   : > { %1277 = vmatmul.bf16.gmra.mxu1 %v5717_v27 }
 0x1b2   : > { %v1001_v56 = vpop.f32.mrf.mxu0 }
 0x1b3   : > { %v1609_v2 = vpack.c.bf16 %v1001_v56, %v999_v39 }
 0x1b5   : > { %v1763_v10 = vunpack.c.l.bf16 %v1609_v2  ;;  %v1765_v12 = vunpack.c.h.bf16 %v1609_v2 }
 0x1ba   : > { %v1004_v60 = vpop.f32.mrf.mxu0 }
 0x1bd   : > { %1043 = vmatmul.bf16.gmra.mxu0 %v5811_v59 }
 0x1c1   : > { %1282 = vmatmul.bf16.gmra.mxu1 %v5720_v28 }
 0x1c2   : > { %v1006_v61 = vpop.f32.mrf.mxu0 }
 0x1c3   : > { %v1611_v0 = vpack.c.bf16 %v1006_v61, %v1004_v60  ;;  %v1745_v61 = vunpack.c.h.bf16 %v5765_v19 }
 0x1c5   : > { %v1767_v4 = vunpack.c.l.bf16 %v1611_v0  ;;  %v1769_v9 = vunpack.c.h.bf16 %v1611_v0 }
 0x1ca   : > { %v1009_v35 = vpop.f32.mrf.mxu0 }
 0x1cd   : > { %1048 = vmatmul.bf16.gmra.mxu0 %v5815_v62 }
 0x1d1   : > { %1287 = vmatmul.bf16.gmra.mxu1 %v5723_v29 }
 0x1d2   : > { %v1011_v24 = vpop.f32.mrf.mxu0 }
 0x1d3   : > { %v1613_v1 = vpack.c.bf16 %v1011_v24, %v1009_v35 }
 0x1d5   : > { %v1771_v6 = vunpack.c.l.bf16 %v1613_v1  ;;  %v1773_v8 = vunpack.c.h.bf16 %v1613_v1 }
 0x1d7   : > { %4825 = vtanh.f32 %v1771_v6 }
 0x1d8   : > { %4827 = vtanh.f32 %v1773_v8 }
 0x1d9   : > { %4829 = vtanh.f32 %v1767_v4 }
 0x1da   : > { %4831 = vtanh.f32 %v1769_v9  ;;  %v1014_v26 = vpop.f32.mrf.mxu0 }
 0x1db   : > { %4833 = vtanh.f32 %v1763_v10 }
 0x1dc   : > { %4835 = vtanh.f32 %v1765_v12 }
 0x1dd   : > { %v4826_v13 = vpop.eup %4825  ;;  %1053 = vmatmul.bf16.gmra.mxu0 %v5819_v11  ;;  %4837 = vtanh.f32 %v1759_v14 }
 0x1de   : > { %v4828_v15 = vpop.eup %4827  ;;  %4839 = vtanh.f32 %v1761_v16 }
 0x1df   : > { %v4830_v18 = vpop.eup %4829  ;;  %v2253_v20 = vpack.c.bf16 %v4828_v15, %v4826_v13  ;;  %4841 = vtanh.f32 %v1755_v22  ;;  %v5845_v13 = vld [vmem:[#allocation7 + $0xd8] sm:$0xff]  ;;  %v4598_v22 = vld [vmem:[#allocation7 + $0xe8] sm:$0xff] }
 0x1e0   : > { %v4832_v21 = vpop.eup %4831  ;;  %4843 = vtanh.f32 %v1757_v23 }
 0x1e1   : > { %2880 = vmatpush.bf16.msra.mxu3 %v2253_v20  ;;  %v4834_v27 = vpop.eup %4833  ;;  %v2251_v38 = vpack.c.bf16 %v4832_v21, %v4830_v18  ;;  %4845 = vtanh.f32 %v1751_v45  ;;  %1292 = vmatmul.bf16.gmra.mxu1 %v5726_v30  ;;  %v5851_v18 = vld [vmem:[#allocation7 + $0xe0] sm:$0xff] }
 0x1e2   : > { %v1016_v34 = vpop.f32.mrf.mxu0  ;;  %v4836_v42 = vpop.eup %4835  ;;  %4847 = vtanh.f32 %v1753_v46 }
 0x1e3   : > { %v5825_v37 = vpack.c.bf16 %v1016_v34, %v1014_v26  ;;  %v4838_v47 = vpop.eup %4837  ;;  %v2249_v49 = vpack.c.bf16 %v4836_v42, %v4834_v27  ;;  %4849 = vtanh.f32 %v1747_v43  ;;  %v4599_v42 = vld [vmem:[#allocation7 + $0xf0] sm:$0xff] }
 0x1e4   : > { %v4840_v50 = vpop.eup %4839  ;;  %4851 = vtanh.f32 %v1749_v52 }
 0x1e5   : > { %2881 = vmatpush.bf16.msra.mxu3 %v2251_v38  ;;  %v4842_v39 = vpop.eup %4841  ;;  %v2247_v56 = vpack.c.bf16 %v4840_v50, %v4838_v47  ;;  %4853 = vtanh.f32 %v1743_v3  ;;  %v4600_v50 = vld [vmem:[#allocation7 + $0xf8] sm:$0xff] }
 0x1e6   : > { %v4844_v60 = vpop.eup %4843  ;;  %4855 = vtanh.f32 %v1745_v61 }
 0x1e7   : > { %v4846_v35 = vpop.eup %4845  ;;  %v2245_v0 = vpack.c.bf16 %v4844_v60, %v4842_v39 }
 0x1e8   : > { %v4848_v24 = vpop.eup %4847 }
 0x1e9   : > { %2882 = vmatpush.bf16.msra.mxu3 %v2249_v49  ;;  %v4850_v28 = vpop.eup %4849  ;;  %v2243_v2 = vpack.c.bf16 %v4848_v24, %v4846_v35 }
 0x1ea   : > { %v1019_v53 = vpop.f32.mrf.mxu0  ;;  %v4852_v4 = vpop.eup %4851 }
 0x1eb   : > { %v4854_v6 = vpop.eup %4853  ;;  %v2241_v8 = vpack.c.bf16 %v4852_v4, %v4850_v28  ;;  %v4601_v28 = vld [vmem:[#allocation7 + $0x100] sm:$0xff] }
 0x1ec   : > { %v4856_v9 = vpop.eup %4855 }
 0x1ed   : > { %2883 = vmatpush.bf16.msra.mxu3 %v2247_v56  ;;  %1058 = vmatmul.bf16.gmra.mxu0 %v5830_v17  ;;  %v2239_v10 = vpack.c.bf16 %v4856_v9, %v4854_v6  ;;  %v4653_v9 = vld [vmem:[#allocation9 + $0x1c] sm:$0xf0] }
 0x1f1   : > { %2884 = vmatpush.bf16.msra.mxu3 %v2245_v0  ;;  %1297 = vmatmul.bf16.gmra.mxu1 %v5729_v31 }
 0x1f2   : > { %v1021_v58 = vpop.f32.mrf.mxu0 }
 0x1f3   : > { %v5837_v1 = vpack.c.bf16 %v1021_v58, %v1019_v53 }
 0x1f5   : > { %2885 = vmatpush.bf16.msra.mxu3 %v2243_v2 }
 0x1f9   : > { %2886 = vmatpush.bf16.msra.mxu3 %v2241_v8  ;;  %v4304_v8 = vld [vmem:[#allocation9] sm:$0xf] }
 0x1fa   : > { %v1024_v19 = vpop.f32.mrf.mxu0 }
 0x1fd   : > { %2887 = vmatpush.bf16.msra.mxu3 %v2239_v10  ;;  %1063 = vmatmul.bf16.gmra.mxu0 %v5839_v25 }
 0x1fe   : > { %v1263_v21 = vpop.f32.mrf.mxu1 }
 0x201   : > { %1302 = vmatmul.bf16.gmra.mxu1 %v5732_v32 }
 0x202   : > { %v1026_v12 = vpop.f32.mrf.mxu0 }
 0x203   : > { %v5843_v26 = vpack.c.bf16 %v1026_v12, %v1024_v19  ;;  %v5865_v12 = vor.u32 %v4653_v9, %v4304_v8 }
 0x205   : > { %7278 = vst [vmem:[#allocation15_spill] sm:$0xff] %v5865_v12  ;;  %2839 = vmatmul.bf16.vlgmr.msra.gmra.mxu2 %v5865_v12 }
 0x206   : > { %v1265_v30 = vpop.f32.mrf.mxu1 }
 0x207   : > { %v5856_v34 = vpack.c.bf16 %v1265_v30, %v1263_v21 }
 0x20a   : > { %v1029_v14 = vpop.f32.mrf.mxu0 }
 0x20d   : > { %1068 = vmatmul.bf16.gmra.mxu0 %v5845_v13 }
 0x20e   : > { %v1268_v38 = vpop.f32.mrf.mxu1 }
 0x211   : > { %1307 = vmatmul.bf16.gmra.mxu1 %v5737_v36 }
 0x212   : > { %v1031_v15 = vpop.f32.mrf.mxu0 }
 0x213   : > { %v5849_v16 = vpack.c.bf16 %v1031_v15, %v1029_v14 }
 0x216   : > { %v1270_v31 = vpop.f32.mrf.mxu1 }
 0x217   : > { %v5859_v46 = vpack.c.bf16 %v1270_v31, %v1268_v38  ;;  %v1785_v31 = vunpack.c.h.bf16 %v5843_v26 }
 0x21a   : > { %v1034_v29 = vpop.f32.mrf.mxu0 }
 0x21d   : > { %1073 = vmatmul.bf16.gmra.mxu0 %v5851_v18 }
 0x21e   : > { %v1273_v49 = vpop.f32.mrf.mxu1 }
 0x221   : > { %1312 = vmatmul.bf16.gmra.mxu1 %v5742_v40 }
 0x222   : > { %v1036_v20 = vpop.f32.mrf.mxu0 }
 0x223   : > { %v1623_v24 = vpack.c.bf16 %v1036_v20, %v1034_v29 }
 0x225   : > { %v1791_v6 = vunpack.c.l.bf16 %v1623_v24  ;;  %v1793_v10 = vunpack.c.h.bf16 %v1623_v24 }
 0x226   : > { %v1275_v32 = vpop.f32.mrf.mxu1 }
 0x227   : > { %v5862_v52 = vpack.c.bf16 %v1275_v32, %v1273_v49  ;;  %v4602_v32 = vld [vmem:[#allocation7 + $0x108] sm:$0xff] }
 0x22a   : > { %v1039_v23 = vpop.f32.mrf.mxu0 }
 0x22d   : > { %1078 = vmatmul.bf16.gmra.mxu0 %v4598_v22  ;;  %v1789_v22 = vunpack.c.h.bf16 %v5849_v16 }
 0x22e   : > { %v1278_v0 = vpop.f32.mrf.mxu1 }
 0x231   : > { %1317 = vmatmul.bf16.gmra.mxu1 %v5747_v44  ;;  %v1787_v44 = vunpack.c.l.bf16 %v5849_v16  ;;  %v1779_v16 = vunpack.c.l.bf16 %v5837_v1 }
 0x232   : > { %v1041_v27 = vpop.f32.mrf.mxu0 }
 0x233   : > { %v1625_v60 = vpack.c.bf16 %v1041_v27, %v1039_v23 }
 0x235   : > { %v1795_v58 = vunpack.c.l.bf16 %v1625_v60  ;;  %v1797_v40 = vunpack.c.h.bf16 %v1625_v60 }
 0x236   : > { %v1280_v29 = vpop.f32.mrf.mxu1 }
 0x237   : > { %v5867_v21 = vpack.c.bf16 %v1280_v29, %v1278_v0 }
 0x23a   : > { %v1044_v45 = vpop.f32.mrf.mxu0 }
 0x23d   : > { %1083 = vmatmul.bf16.gmra.mxu0 %v4599_v42 }
 0x241   : > { %1322 = vmatmul.bf16.gmra.mxu1 %v5750_v48 }
 0x242   : > { %v1046_v47 = vpop.f32.mrf.mxu0 }
 0x243   : > { %v1627_v53 = vpack.c.bf16 %v1046_v47, %v1044_v45  ;;  %v1783_v45 = vunpack.c.l.bf16 %v5843_v26  ;;  %v1775_v26 = vunpack.c.l.bf16 %v5825_v37 }
 0x245   : > { %v1799_v3 = vunpack.c.l.bf16 %v1627_v53  ;;  %v1801_v35 = vunpack.c.h.bf16 %v1627_v53  ;;  %v1781_v53 = vunpack.c.h.bf16 %v5837_v1 }
 0x24a   : > { %v1049_v43 = vpop.f32.mrf.mxu0 }
 0x24d   : > { %1088 = vmatmul.bf16.gmra.mxu0 %v4600_v50  ;;  %v1283_v50 = vpop.f32.mrf.mxu1 }
 0x251   : > { %1327 = vmatmul.bf16.gmra.mxu1 %v5753_v51  ;;  %v4400_v51 = vld [vmem:[#allocation9 + $0xc0] sm:$0xf] }
 0x252   : > { %v1051_v39 = vpop.f32.mrf.mxu0 }
 0x253   : > { %v1629_v56 = vpack.c.bf16 %v1051_v39, %v1049_v43 }
 0x255   : > { %v1803_v36 = vunpack.c.l.bf16 %v1629_v56  ;;  %v1805_v61 = vunpack.c.h.bf16 %v1629_v56 }
 0x257   : > { %4857 = vtanh.f32 %v1803_v36  ;;  %v4336_v36 = vld [vmem:[#allocation9 + $0x40] sm:$0xf] }
 0x258   : > { %4859 = vtanh.f32 %v1805_v61  ;;  %v4661_v61 = vld [vmem:[#allocation9 + $0x5c] sm:$0xf0] }
 0x259   : > { %4861 = vtanh.f32 %v1799_v3  ;;  %v5881_v0 = vor.u32 %v4661_v61, %v4336_v36 }
 0x25a   : > { %4863 = vtanh.f32 %v1801_v35  ;;  %v1054_v2 = vpop.f32.mrf.mxu0  ;;  %v1777_v35 = vunpack.c.h.bf16 %v5825_v37 }
 0x25b   : > { %4865 = vtanh.f32 %v1795_v58  ;;  %7279 = vst [vmem:[#allocation16_spill] sm:$0xff] %v5881_v0  ;;  %v1285_v58 = vpop.f32.mrf.mxu1  ;;  %2844 = vmatmul.bf16.gmra.mxu2 %v5881_v0 }
 0x25c   : > { %4867 = vtanh.f32 %v1797_v40  ;;  %v5883_v48 = vpack.c.bf16 %v1285_v58, %v1283_v50 }
 0x25d   : > { %v4858_v4 = vpop.eup %4857  ;;  %1093 = vmatmul.bf16.gmra.mxu0 %v4601_v28  ;;  %4869 = vtanh.f32 %v1791_v6 }
 0x25e   : > { %v4860_v19 = vpop.eup %4859  ;;  %4871 = vtanh.f32 %v1793_v10 }
 0x25f   : > { %v4862_v14 = vpop.eup %4861  ;;  %v2269_v15 = vpack.c.bf16 %v4860_v19, %v4858_v4  ;;  %4873 = vtanh.f32 %v1787_v44  ;;  %v4669_v44 = vld [vmem:[#allocation9 + $0x9c] sm:$0xf0] }
 0x260   : > { %v4864_v20 = vpop.eup %4863  ;;  %4875 = vtanh.f32 %v1789_v22 }
 0x261   : > { %2929 = vmatpush.bf16.msrb.mxu2 %v2269_v15  ;;  %v4866_v30 = vpop.eup %4865  ;;  %v2267_v38 = vpack.c.bf16 %v4864_v20, %v4862_v14  ;;  %4877 = vtanh.f32 %v1783_v45  ;;  %v4603_v14 = vld [vmem:[#allocation7 + $0x110] sm:$0xff]  ;;  %v4368_v20 = vld [vmem:[#allocation9 + $0x80] sm:$0xf]  ;;  %1332 = vmatmul.bf16.gmra.mxu1 %v5756_v54 }
 0x262   : > { %v1056_v23 = vpop.f32.mrf.mxu0  ;;  %v4868_v42 = vpop.eup %4867  ;;  %4879 = vtanh.f32 %v1785_v31  ;;  %v5889_v22 = vor.u32 %v4669_v44, %v4368_v20  ;;  %v4604_v31 = vld [vmem:[#allocation7 + $0x118] sm:$0xff]  ;;  %v4432_v54 = vld [vmem:[#allocation9 + $0x100] sm:$0xf] }
 0x263   : > { %v5872_v27 = vpack.c.bf16 %v1056_v23, %v1054_v2  ;;  %v4870_v47 = vpop.eup %4869  ;;  %v2265_v49 = vpack.c.bf16 %v4868_v42, %v4866_v30  ;;  %4881 = vtanh.f32 %v1779_v16  ;;  %v1288_v19 = vpop.f32.mrf.mxu1 }
 0x264   : > { %v4872_v43 = vpop.eup %4871  ;;  %4883 = vtanh.f32 %v1781_v53  ;;  %7280 = vst [vmem:[#allocation17_spill] sm:$0xff] %v5889_v22 }
 0x265   : > { %2930 = vmatpush.bf16.msrb.mxu2 %v2267_v38  ;;  %v4874_v56 = vpop.eup %4873  ;;  %v2263_v60 = vpack.c.bf16 %v4872_v43, %v4870_v47  ;;  %4885 = vtanh.f32 %v1775_v26 }
 0x266   : > { %v4876_v3 = vpop.eup %4875  ;;  %4887 = vtanh.f32 %v1777_v35 }
 0x267   : > { %v4878_v1 = vpop.eup %4877  ;;  %v2261_v24 = vpack.c.bf16 %v4876_v3, %v4874_v56  ;;  %v4605_v56 = vld [vmem:[#allocation7 + $0x120] sm:$0xff] }
 0x268   : > { %v4880_v28 = vpop.eup %4879  ;;  %v4685_v3 = vld [vmem:[#allocation9 + $0x11c] sm:$0xf0] }
 0x269   : > { %2931 = vmatpush.bf16.msrb.mxu2 %v2265_v49  ;;  %v4882_v2 = vpop.eup %4881  ;;  %v2259_v6 = vpack.c.bf16 %v4880_v28, %v4878_v1  ;;  %v4677_v49 = vld [vmem:[#allocation9 + $0xdc] sm:$0xf0]  ;;  %v5905_v26 = vor.u32 %v4685_v3, %v4432_v54 }
 0x26a   : > { %v1059_v39 = vpop.f32.mrf.mxu0  ;;  %v4884_v37 = vpop.eup %4883  ;;  %v5897_v50 = vor.u32 %v4677_v49, %v4400_v51  ;;  %v4464_v28 = vld [vmem:[#allocation9 + $0x140] sm:$0xf] }
 0x26b   : > { %v4886_v8 = vpop.eup %4885  ;;  %v2257_v9 = vpack.c.bf16 %v4884_v37, %v4882_v2  ;;  %v1290_v23 = vpop.f32.mrf.mxu1  ;;  %2849 = vmatmul.bf16.gmra.mxu2 %v5889_v22  ;;  %7282 = vst [vmem:[#allocation19_spill] sm:$0xff] %v5905_v26 }
 0x26c   : > { %v4888_v10 = vpop.eup %4887  ;;  %v5891_v30 = vpack.c.bf16 %v1290_v23, %v1288_v19  ;;  %7281 = vst [vmem:[#allocation18_spill] sm:$0xff] %v5897_v50  ;;  %v4608_v23 = vld [vmem:[#allocation7 + $0x138] sm:$0xff] }
 0x26d   : > { %2932 = vmatpush.bf16.msrb.mxu2 %v2263_v60  ;;  %1098 = vmatmul.bf16.gmra.mxu0 %v4602_v32  ;;  %v2255_v29 = vpack.c.bf16 %v4888_v10, %v4886_v8  ;;  %v4496_v10 = vld [vmem:[#allocation9 + $0x180] sm:$0xf] }
 0x271   : > { %2933 = vmatpush.bf16.msrb.mxu2 %v2261_v24  ;;  %1337 = vmatmul.bf16.gmra.mxu1 %v5759_v57  ;;  %v4606_v24 = vld [vmem:[#allocation7 + $0x128] sm:$0xff] }
 0x272   : > { %v1061_v40 = vpop.f32.mrf.mxu0 }
 0x273   : > { %v5886_v4 = vpack.c.bf16 %v1061_v40, %v1059_v39  ;;  %v1293_v45 = vpop.f32.mrf.mxu1  ;;  %v4693_v40 = vld [vmem:[#allocation9 + $0x15c] sm:$0xf0] }
 0x274   : > { %v5911_v57 = vor.u32 %v4693_v40, %v4464_v28  ;;  %v4609_v28 = vld [vmem:[#allocation7 + $0x140] sm:$0xff] }
 0x275   : > { %2934 = vmatpush.bf16.msrb.mxu2 %v2259_v6  ;;  %v4649_v40 = vld [vmem:[#allocation9 + $0x4] sm:$0xf] }
 0x276   : > { %7283 = vst [vmem:[#allocation20_spill] sm:$0xff] %v5911_v57 }
 0x279   : > { %2935 = vmatpush.bf16.msrb.mxu2 %v2257_v9  ;;  %v4607_v9 = vld [vmem:[#allocation7 + $0x130] sm:$0xff] }
 0x27a   : > { %v1064_v15 = vpop.f32.mrf.mxu0 }
 0x27b   : > { %v1295_v43 = vpop.f32.mrf.mxu1  ;;  %2854 = vmatmul.bf16.gmra.mxu2 %v5897_v50 }
 0x27c   : > { %v5899_v16 = vpack.c.bf16 %v1295_v43, %v1293_v45  ;;  %v4528_v45 = vld [vmem:[#allocation9 + $0x1c0] sm:$0xf] }
 0x27d   : > { %2936 = vmatpush.bf16.msrb.mxu2 %v2255_v29  ;;  %1103 = vmatmul.bf16.gmra.mxu0 %v4603_v14  ;;  %v4701_v14 = vld [vmem:[#allocation9 + $0x19c] sm:$0xf0] }
 0x281   : > { %1342 = vmatmul.bf16.gmra.mxu1 %v5762_v5  ;;  %v5917_v5 = vor.u32 %v4701_v14, %v4496_v10  ;;  %v4312_v10 = vld [vmem:[#allocation9 + $0x8] sm:$0xf] }
 0x282   : > { %v1066_v38 = vpop.f32.mrf.mxu0 }
 0x283   : > { %v5894_v42 = vpack.c.bf16 %v1066_v38, %v1064_v15  ;;  %v1298_v39 = vpop.f32.mrf.mxu1  ;;  %7285 = vst [vmem:[#allocation22_spill] sm:$0xff] %v5917_v5 }
 0x28a   : > { %v1069_v47 = vpop.f32.mrf.mxu0 }
 0x28b   : > { %v1300_v36 = vpop.f32.mrf.mxu1  ;;  %2859 = vmatmul.bf16.gmra.mxu2 %v5905_v26 }
 0x28c   : > { %v5907_v61 = vpack.c.bf16 %v1300_v36, %v1298_v39 }
 0x28d   : > { %1108 = vmatmul.bf16.gmra.mxu0 %v4604_v31  ;;  %v4709_v31 = vld [vmem:[#allocation9 + $0x1dc] sm:$0xf0] }
 0x291   : > { %1347 = vmatmul.bf16.gmra.mxu1 %v5770_v41  ;;  %v5923_v41 = vor.u32 %v4709_v31, %v4528_v45 }
 0x292   : > { %v1071_v32 = vpop.f32.mrf.mxu0 }
 0x293   : > { %v5902_v53 = vpack.c.bf16 %v1071_v32, %v1069_v47  ;;  %v1303_v1 = vpop.f32.mrf.mxu1  ;;  %7287 = vst [vmem:[#allocation24_spill] sm:$0xff] %v5923_v41 }
 0x295   : > { %v1819_v45 = vunpack.c.l.bf16 %v5902_v53  ;;  %v1821_v31 = vunpack.c.h.bf16 %v5902_v53 }
 0x29a   : > { %v1074_v60 = vpop.f32.mrf.mxu0 }
 0x29b   : > { %v1305_v2 = vpop.f32.mrf.mxu1  ;;  %2864 = vmatmul.bf16.gmra.mxu2 %v5911_v57 }
 0x29c   : > { %v5913_v6 = vpack.c.bf16 %v1305_v2, %v1303_v1  ;;  %v4306_v2 = vld [vmem:[#allocation9 + $0x20] sm:$0xf0] }
 0x29d   : > { %1113 = vmatmul.bf16.gmra.mxu0 %v4605_v56 }
 0x29e   : > { %7284 = vst [vmem:[#allocation21_spill] sm:$0xff] %v5913_v6 }
 0x2a1   : > { %1352 = vmatmul.bf16.gmra.mxu1 %v5778_v63 }
 0x2a2   : > { %v1076_v35 = vpop.f32.mrf.mxu0 }
 0x2a3   : > { %v1308_v8 = vpop.f32.mrf.mxu1  ;;  %v1639_v1 = vpack.c.bf16 %v1076_v35, %v1074_v60  ;;  %v4654_v60 = vld [vmem:[#allocation9 + $0x24] sm:$0xf0] }
 0x2a5   : > { %v1825_v14 = vunpack.c.h.bf16 %v1639_v1 }
 0x2aa   : > { %v1079_v58 = vpop.f32.mrf.mxu0 }
 0x2ab   : > { %v1310_v15 = vpop.f32.mrf.mxu1  ;;  %2869 = vmatmul.bf16.gmra.mxu2 %v5917_v5  ;;  %v5319_v5 = vld [vmem:[#allocation7 + $0xf8] sm:$0xff] }
 0x2ac   : > { %v5919_v29 = vpack.c.bf16 %v1310_v15, %v1308_v8  ;;  %v5932_v15 = vor.u32 %v4654_v60, %v4312_v10 }
 0x2ad   : > { %1118 = vmatmul.bf16.gmra.mxu0 %v4606_v24 }
 0x2ae   : > { %7286 = vst [vmem:[#allocation23_spill] sm:$0xff] %v5919_v29 }
 0x2af   : > { %7290 = vst [vmem:[#allocation27_spill] sm:$0xff] %v5932_v15 }
 0x2b1   : > { %1357 = vmatmul.bf16.gmra.mxu1 %v5785_v7 }
 0x2b2   : > { %v1081_v37 = vpop.f32.mrf.mxu0 }
 0x2b3   : > { %v1313_v44 = vpop.f32.mrf.mxu1  ;;  %v1641_v39 = vpack.c.bf16 %v1081_v37, %v1079_v58  ;;  %v1823_v37 = vunpack.c.l.bf16 %v1639_v1 }
 0x2b5   : > { %v1827_v24 = vunpack.c.l.bf16 %v1641_v39  ;;  %v1829_v8 = vunpack.c.h.bf16 %v1641_v39  ;;  %v5941_v39 = vpop.f32.mrf.mxu2 }
 0x2ba   : > { %v1084_v19 = vpop.f32.mrf.mxu0 }
 0x2bb   : > { %v1315_v47 = vpop.f32.mrf.mxu1  ;;  %2874 = vmatmul.bf16.gmra.mxu2 %v5923_v41 }
 0x2bc   : > { %v5925_v51 = vpack.c.bf16 %v1315_v47, %v1313_v44 }
 0x2bd   : > { %1123 = vmatmul.bf16.gmra.mxu0 %v4607_v9  ;;  %v5950_v10 = vpop.f32.mrf.mxu2 }
 0x2be   : > { %7288 = vst [vmem:[#allocation25_spill] sm:$0xff] %v5925_v51  ;;  %v4506_v51 = vld [vmem:[#allocation9 + $0x1a8] sm:$0xf0] }
 0x2bf   : > { %7293 = vst [vmem:[#allocation30_spill] sm:$0xff] %v5950_v10 }
 0x2c1   : > { %1362 = vmatmul.bf16.gmra.mxu1 %v5798_v33 }
 0x2c2   : > { %v1086_v20 = vpop.f32.mrf.mxu0 }
 0x2c3   : > { %v1643_v49 = vpack.c.bf16 %v1086_v20, %v1084_v19  ;;  %v1318_v63 = vpop.f32.mrf.mxu1  ;;  %v5929_v19 = vor.u32 %v4649_v40, %v4306_v2  ;;  %v4657_v40 = vld [vmem:[#allocation9 + $0x44] sm:$0xf] }
 0x2c4   : > { %v4338_v2 = vld [vmem:[#allocation9 + $0x60] sm:$0xf0] }
 0x2c5   : > { %v1831_v56 = vunpack.c.l.bf16 %v1643_v49  ;;  %v1833_v36 = vunpack.c.h.bf16 %v1643_v49  ;;  %7289 = vst [vmem:[#allocation26_spill] sm:$0xff] %v5929_v19  ;;  %2888 = vmatmul.bf16.vlgmr.msra.gmra.mxu3 %v5929_v19 }
 0x2ca   : > { %v1089_v38 = vpop.f32.mrf.mxu0 }
 0x2cb   : > { %2937 = vmatmul.bf16.vlgmr.msrb.gmra.mxu2 %v5932_v15 }
 0x2cd   : > { %1128 = vmatmul.bf16.gmra.mxu0 %v4608_v23  ;;  %v1320_v23 = vpop.f32.mrf.mxu1 }
 0x2ce   : > { %v5934_v7 = vpack.c.bf16 %v1320_v23, %v1318_v63 }
 0x2d0   : > { %7291 = vst [vmem:[#allocation28_spill] sm:$0xff] %v5934_v7 }
 0x2d1   : > { %1367 = vmatmul.bf16.gmra.mxu1 %v5807_v55 }
 0x2d2   : > { %v1091_v43 = vpop.f32.mrf.mxu0 }
 0x2d3   : > { %v1645_v32 = vpack.c.bf16 %v1091_v43, %v1089_v38 }
 0x2d5   : > { %v1835_v54 = vunpack.c.l.bf16 %v1645_v32  ;;  %v1837_v3 = vunpack.c.h.bf16 %v1645_v32  ;;  %v1323_v1 = vpop.f32.mrf.mxu1 }
 0x2d7   : > { %4889 = vtanh.f32 %v1835_v54  ;;  %v1815_v54 = vunpack.c.l.bf16 %v5894_v42 }
 0x2d8   : > { %4891 = vtanh.f32 %v1837_v3  ;;  %v1817_v3 = vunpack.c.h.bf16 %v5894_v42 }
 0x2d9   : > { %4893 = vtanh.f32 %v1831_v56 }
 0x2da   : > { %4895 = vtanh.f32 %v1833_v36  ;;  %v1094_v9 = vpop.f32.mrf.mxu0 }
 0x2db   : > { %4897 = vtanh.f32 %v1827_v24  ;;  %v1811_v24 = vunpack.c.l.bf16 %v5886_v4 }
 0x2dc   : > { %4899 = vtanh.f32 %v1829_v8  ;;  %v1813_v8 = vunpack.c.h.bf16 %v5886_v4  ;;  %v4662_v4 = vld [vmem:[#allocation9 + $0x64] sm:$0xf0] }
 0x2dd   : > { %v4890_v58 = vpop.eup %4889  ;;  %1133 = vmatmul.bf16.gmra.mxu0 %v4609_v28  ;;  %4901 = vtanh.f32 %v1823_v37  ;;  %v4610_v28 = vld [vmem:[#allocation7 + $0x148] sm:$0xff] }
 0x2de   : > { %v4892_v35 = vpop.eup %4891  ;;  %4903 = vtanh.f32 %v1825_v14  ;;  %v4344_v14 = vld [vmem:[#allocation9 + $0x48] sm:$0xf] }
 0x2df   : > { %v4894_v20 = vpop.eup %4893  ;;  %v2285_v44 = vpack.c.bf16 %v4892_v35, %v4890_v58  ;;  %4905 = vtanh.f32 %v1819_v45  ;;  %v5948_v58 = vor.u32 %v4657_v40, %v4338_v2  ;;  %v1807_v35 = vunpack.c.l.bf16 %v5872_v27 }
 0x2e0   : > { %v4896_v38 = vpop.eup %4895  ;;  %4907 = vtanh.f32 %v1821_v31  ;;  %v5955_v33 = vor.u32 %v4662_v4, %v4344_v14 }
 0x2e1   : > { %2978 = vmatpush.bf16.msrb.mxu3 %v2285_v44  ;;  %v4898_v49 = vpop.eup %4897  ;;  %v2283_v32 = vpack.c.bf16 %v4896_v38, %v4894_v20  ;;  %4909 = vtanh.f32 %v1815_v54  ;;  %7292 = vst [vmem:[#allocation29_spill] sm:$0xff] %v5948_v58  ;;  %v1809_v20 = vunpack.c.h.bf16 %v5872_v27  ;;  %v1325_v38 = vpop.f32.mrf.mxu1  ;;  %1372 = vmatmul.bf16.gmra.mxu1 %v5811_v59 }
 0x2e2   : > { %v1096_v47 = vpop.f32.mrf.mxu0  ;;  %v4900_v56 = vpop.eup %4899  ;;  %4911 = vtanh.f32 %v1817_v3  ;;  %2893 = vmatmul.bf16.gmra.mxu3 %v5948_v58  ;;  %7294 = vst [vmem:[#allocation31_spill] sm:$0xff] %v5955_v33  ;;  %v5957_v31 = vpack.c.bf16 %v1325_v38, %v1323_v1  ;;  %2942 = vmatmul.bf16.gmra.mxu2 %v5955_v33  ;;  %v4611_v1 = vld [vmem:[#allocation7 + $0x150] sm:$0xff]  ;;  %v4673_v38 = vld [vmem:[#allocation9 + $0xc4] sm:$0xf] }
 0x2e3   : > { %v5939_v43 = vpack.c.bf16 %v1096_v47, %v1094_v9  ;;  %v4902_v36 = vpop.eup %4901  ;;  %v2281_v63 = vpack.c.bf16 %v4900_v56, %v4898_v49  ;;  %4913 = vtanh.f32 %v1811_v24  ;;  %v5962_v27 = vpop.f32.mrf.mxu2  ;;  %v4665_v24 = vld [vmem:[#allocation9 + $0x84] sm:$0xf] }
 0x2e4   : > { %v4904_v53 = vpop.eup %4903  ;;  %4915 = vtanh.f32 %v1813_v8  ;;  %7295 = vst [vmem:[#allocation32_spill] sm:$0xff] %v5957_v31 }
 0x2e5   : > { %2979 = vmatpush.bf16.msrb.mxu3 %v2283_v32  ;;  %v4906_v42 = vpop.eup %4905  ;;  %v2279_v37 = vpack.c.bf16 %v4904_v53, %v4902_v36  ;;  %4917 = vtanh.f32 %v1807_v35 }
 0x2e6   : > { %v4908_v60 = vpop.eup %4907  ;;  %4919 = vtanh.f32 %v1809_v20 }
 0x2e7   : > { %v4910_v44 = vpop.eup %4909  ;;  %v2277_v23 = vpack.c.bf16 %v4908_v60, %v4906_v42  ;;  %v4376_v42 = vld [vmem:[#allocation9 + $0x88] sm:$0xf] }
 0x2e8   : > { %v4912_v45 = vpop.eup %4911 }
 0x2e9   : > { %2980 = vmatpush.bf16.msrb.mxu3 %v2281_v63  ;;  %v4914_v49 = vpop.eup %4913  ;;  %v2275_v56 = vpack.c.bf16 %v4912_v45, %v4910_v44  ;;  %v1328_v63 = vpop.f32.mrf.mxu1  ;;  %v4402_v45 = vld [vmem:[#allocation9 + $0xe0] sm:$0xf0] }
 0x2ea   : > { %v1099_v9 = vpop.f32.mrf.mxu0  ;;  %v4916_v54 = vpop.eup %4915 }
 0x2eb   : > { %v4918_v3 = vpop.eup %4917  ;;  %v2273_v36 = vpack.c.bf16 %v4916_v54, %v4914_v49  ;;  %v5980_v49 = vor.u32 %v4673_v38, %v4402_v45  ;;  %v4408_v54 = vld [vmem:[#allocation9 + $0xc8] sm:$0xf] }
 0x2ec   : > { %v4920_v53 = vpop.eup %4919 }
 0x2ed   : > { %2981 = vmatpush.bf16.msrb.mxu3 %v2279_v37  ;;  %1138 = vmatmul.bf16.gmra.mxu0 %v4610_v28  ;;  %v4370_v28 = vld [vmem:[#allocation9 + $0xa0] sm:$0xf0]  ;;  %v2271_v8 = vpack.c.bf16 %v4920_v53, %v4918_v3  ;;  %v4670_v37 = vld [vmem:[#allocation9 + $0xa4] sm:$0xf0]  ;;  %7300 = vst [vmem:[#allocation37_spill] sm:$0xff] %v5980_v49 }
 0x2ee   : > { %v5965_v2 = vor.u32 %v4665_v24, %v4370_v28  ;;  %v5970_v60 = vor.u32 %v4670_v37, %v4376_v42  ;;  %v4678_v3 = vld [vmem:[#allocation9 + $0xe4] sm:$0xf0]  ;;  %v4434_v42 = vld [vmem:[#allocation9 + $0x120] sm:$0xf0] }
 0x2f0   : > { %7296 = vst [vmem:[#allocation33_spill] sm:$0xff] %v5965_v2 }
 0x2f1   : > { %2982 = vmatpush.bf16.msrb.mxu3 %v2277_v23  ;;  %7298 = vst [vmem:[#allocation35_spill] sm:$0xff] %v5970_v60  ;;  %v1330_v35 = vpop.f32.mrf.mxu1  ;;  %v4612_v23 = vld [vmem:[#allocation7 + $0x158] sm:$0xff]  ;;  %1377 = vmatmul.bf16.gmra.mxu1 %v5815_v62 }
 0x2f2   : > { %v1101_v47 = vpop.f32.mrf.mxu0  ;;  %2898 = vmatmul.bf16.gmra.mxu3 %v5965_v2  ;;  %v5972_v14 = vpack.c.bf16 %v1330_v35, %v1328_v63  ;;  %2947 = vmatmul.bf16.gmra.mxu2 %v5970_v60  ;;  %v4498_v60 = vld [vmem:[#allocation9 + $0x1a0] sm:$0xf0] }
 0x2f3   : > { %v5960_v32 = vpack.c.bf16 %v1101_v47, %v1099_v9  ;;  %v5967_v9 = vpop.f32.mrf.mxu2 }
 0x2f4   : > { %7297 = vst [vmem:[#allocation34_spill] sm:$0xff] %v5967_v9 }
 0x2f5   : > { %2983 = vmatpush.bf16.msrb.mxu3 %v2275_v56  ;;  %7299 = vst [vmem:[#allocation36_spill] sm:$0xff] %v5972_v14  ;;  %v5322_v14 = vld [vmem:[#allocation7 + $0x110] sm:$0xff] }
 0x2f9   : > { %2984 = vmatpush.bf16.msrb.mxu3 %v2273_v36  ;;  %v1333_v44 = vpop.f32.mrf.mxu1  ;;  %v5985_v36 = vor.u32 %v4678_v3, %v4408_v54 }
 0x2fa   : > { %v1104_v40 = vpop.f32.mrf.mxu0 }
 0x2fb   : > { %v5977_v20 = vpop.f32.mrf.mxu2  ;;  %7302 = vst [vmem:[#allocation39_spill] sm:$0xff] %v5985_v36 }
 0x2fd   : > { %2985 = vmatpush.bf16.msrb.mxu3 %v2271_v8  ;;  %1143 = vmatmul.bf16.gmra.mxu0 %v4611_v1  ;;  %v4681_v8 = vld [vmem:[#allocation9 + $0x104] sm:$0xf] }
 0x2fe   : > { %v5997_v35 = vor.u32 %v4681_v8, %v4434_v42  ;;  %v4466_v8 = vld [vmem:[#allocation9 + $0x160] sm:$0xf0] }
 0x300   : > { %7304 = vst [vmem:[#allocation41_spill] sm:$0xff] %v5997_v35 }
 0x301   : > { %v1335_v63 = vpop.f32.mrf.mxu1  ;;  %1382 = vmatmul.bf16.gmra.mxu1 %v5819_v11 }
 0x302   : > { %v1106_v4 = vpop.f32.mrf.mxu0  ;;  %2903 = vmatmul.bf16.gmra.mxu3 %v5980_v49  ;;  %v5987_v53 = vpack.c.bf16 %v1335_v63, %v1333_v44  ;;  %2952 = vmatmul.bf16.gmra.mxu2 %v5985_v36  ;;  %v4440_v44 = vld [vmem:[#allocation9 + $0x108] sm:$0xf] }
 0x303   : > { %v5975_v55 = vpack.c.bf16 %v1106_v4, %v1104_v40  ;;  %v5982_v56 = vpop.f32.mrf.mxu2  ;;  %v4613_v40 = vld [vmem:[#allocation7 + $0x160] sm:$0xff]  ;;  %v4614_v63 = vld [vmem:[#allocation7 + $0x168] sm:$0xff] }
 0x304   : > { %7301 = vst [vmem:[#allocation38_spill] sm:$0xff] %v5982_v56 }
 0x305   : > { %7303 = vst [vmem:[#allocation40_spill] sm:$0xff] %v5987_v53 }
 0x309   : > { %v1338_v28 = vpop.f32.mrf.mxu1 }
 0x30a   : > { %v1109_v47 = vpop.f32.mrf.mxu0 }
 0x30b   : > { %v5992_v59 = vpop.f32.mrf.mxu2 }
 0x30d   : > { %1148 = vmatmul.bf16.gmra.mxu0 %v4612_v23  ;;  %v4686_v23 = vld [vmem:[#allocation9 + $0x124] sm:$0xf0] }
 0x30e   : > { %v6002_v38 = vor.u32 %v4686_v23, %v4440_v44  ;;  %v4694_v23 = vld [vmem:[#allocation9 + $0x164] sm:$0xf0] }
 0x310   : > { %7306 = vst [vmem:[#allocation43_spill] sm:$0xff] %v6002_v38 }
 0x311   : > { %v1340_v45 = vpop.f32.mrf.mxu1  ;;  %1387 = vmatmul.bf16.gmra.mxu1 %v5830_v17  ;;  %v5538_v17 = vmov 0  }
 0x312   : > { %v1111_v1 = vpop.f32.mrf.mxu0  ;;  %2908 = vmatmul.bf16.gmra.mxu3 %v5997_v35  ;;  %2957 = vmatmul.bf16.gmra.mxu2 %v6002_v38 }
 0x313   : > { %v5990_v24 = vpack.c.bf16 %v1111_v1, %v1109_v47  ;;  %v5999_v4 = vpop.f32.mrf.mxu2  ;;  %v6004_v47 = vpack.c.bf16 %v1340_v45, %v1338_v28  ;;  %v4689_v1 = vld [vmem:[#allocation9 + $0x144] sm:$0xf]  ;;  %v4472_v28 = vld [vmem:[#allocation9 + $0x148] sm:$0xf]  ;;  %4790 = vset.pattern.permute.xlu0 %v5538_v17  ;;  %4791 = vset.pattern.permute.xlu1 %v5538_v17 }
 0x314   : > { %7305 = vst [vmem:[#allocation42_spill] sm:$0xff] %v5999_v4  ;;  %v6017_v45 = vor.u32 %v4694_v23, %v4472_v28  ;;  %4792 = vset.pattern.permute.xlu2 %v5538_v17 }
 0x315   : > { %7307 = vst [vmem:[#allocation44_spill] sm:$0xff] %v6004_v47 }
 0x316   : > { %7310 = vst [vmem:[#allocation47_spill] sm:$0xff] %v6017_v45 }
 0x319   : > { %v1343_v62 = vpop.f32.mrf.mxu1 }
 0x31a   : > { %v5994_v37 = vpop.f32.mrf.mxu0 }
 0x31b   : > { %v6009_v3 = vpop.f32.mrf.mxu2 }
 0x31d   : > { %1153 = vmatmul.bf16.gmra.mxu0 %v4613_v40  ;;  %v6012_v40 = vor.u32 %v4689_v1, %v4466_v8  ;;  %v4615_v1 = vld [vmem:[#allocation7 + $0x170] sm:$0xff]  ;;  %v4697_v8 = vld [vmem:[#allocation9 + $0x184] sm:$0xf] }
 0x31f   : > { %7308 = vst [vmem:[#allocation45_spill] sm:$0xff] %v6012_v40 }
 0x321   : > { %v1345_v38 = vpop.f32.mrf.mxu1  ;;  %1392 = vmatmul.bf16.gmra.mxu1 %v5839_v25 }
 0x322   : > { %v6007_v54 = vpop.f32.mrf.mxu0  ;;  %2913 = vmatmul.bf16.gmra.mxu3 %v6012_v40  ;;  %v6019_v35 = vpack.c.bf16 %v1345_v38, %v1343_v62  ;;  %2962 = vmatmul.bf16.gmra.mxu2 %v6017_v45  ;;  %v4504_v38 = vld [vmem:[#allocation9 + $0x188] sm:$0xf] }
 0x323   : > { %v6014_v44 = vpop.f32.mrf.mxu2  ;;  %v4702_v62 = vld [vmem:[#allocation9 + $0x1a4] sm:$0xf0] }
 0x324   : > { %7309 = vst [vmem:[#allocation46_spill] sm:$0xff] %v6014_v44  ;;  %v6030_v28 = vor.u32 %v4702_v62, %v4504_v38  ;;  %v4705_v38 = vld [vmem:[#allocation9 + $0x1c4] sm:$0xf] }
 0x325   : > { %7311 = vst [vmem:[#allocation48_spill] sm:$0xff] %v6019_v35  ;;  %v4530_v62 = vld [vmem:[#allocation9 + $0x1e0] sm:$0xf0] }
 0x326   : > { %7314 = vst [vmem:[#allocation51_spill] sm:$0xff] %v6030_v28 }
 0x329   : > { %v1348_v11 = vpop.f32.mrf.mxu1 }
 0x32a   : > { %v1119_v42 = vpop.f32.mrf.mxu0 }
 0x32b   : > { %v6022_v49 = vpop.f32.mrf.mxu2 }
 0x32d   : > { %1158 = vmatmul.bf16.gmra.mxu0 %v4614_v63  ;;  %v6025_v63 = vor.u32 %v4697_v8, %v4498_v60  ;;  %v2429_v60 = vld [vmem:[%s7178_s4 + $0x70] sm:$0xff]  ;;  %v4616_v8 = vld [vmem:[#allocation7 + $0x178] sm:$0xff] }
 0x32e   : > { %2503 = vperm.xlu0 %4790, %v2429_v60   ;;  %v4536_v60 = vld [vmem:[#allocation9 + $0x1c8] sm:$0xf] }
 0x32f   : > { %7312 = vst [vmem:[#allocation49_spill] sm:$0xff] %v6025_v63 }
 0x331   : > { %v1350_v23 = vpop.f32.mrf.mxu1  ;;  %1397 = vmatmul.bf16.gmra.mxu1 %v5845_v13 }
 0x332   : > { %v1121_v36 = vpop.f32.mrf.mxu0  ;;  %2918 = vmatmul.bf16.gmra.mxu3 %v6025_v63  ;;  %v6032_v45 = vpack.c.bf16 %v1350_v23, %v1348_v11  ;;  %2967 = vmatmul.bf16.gmra.mxu2 %v6030_v28  ;;  %v6041_v23 = vor.u32 %v4705_v38, %v4530_v62  ;;  %v2430_v63 = vld [vmem:[%s7178_s4 + $0x78] sm:$0xff] }
 0x333   : > { %v6027_v40 = vpop.f32.mrf.mxu2 }
 0x334   : > { %7313 = vst [vmem:[#allocation50_spill] sm:$0xff] %v6027_v40  ;;  %v4710_v40 = vld [vmem:[#allocation9 + $0x1e4] sm:$0xf0] }
 0x335   : > { %7315 = vst [vmem:[#allocation52_spill] sm:$0xff] %v6032_v45  ;;  %v6049_v17 = vor.u32 %v4710_v40, %v4536_v60  ;;  %v2423_v40 = vld [vmem:[%s7178_s4 + $0x40] sm:$0xff] }
 0x336   : > { %7316 = vst [vmem:[#allocation53_spill] sm:$0xff] %v6041_v23  ;;  %2508 = vperm.xlu0 %4790, %v2430_v63   ;;  %v4617_v63 = vld [vmem:[#allocation7 + $0x180] sm:$0xff] }
 0x337   : > { %7318 = vst [vmem:[#allocation55_spill] sm:$0xff] %v6049_v17 }
 0x33a   : > { %v1124_v44 = vpop.f32.mrf.mxu0 }
 0x33b   : > { %v6035_v56 = vpop.f32.mrf.mxu2 }
 0x33d   : > { %1163 = vmatmul.bf16.gmra.mxu0 %v4615_v1  ;;  %v1353_v1 = vpop.f32.mrf.mxu1 }
 0x33e   : > { %2473 = vperm.xlu0 %4790, %v2423_v40  }
 0x341   : > { %1402 = vmatmul.bf16.gmra.mxu1 %v5851_v18  ;;  %v2424_v18 = vld [vmem:[%s7178_s4 + $0x48] sm:$0xff] }
 0x342   : > { %v1126_v2 = vpop.f32.mrf.mxu0  ;;  %2923 = vmatmul.bf16.gmra.mxu3 %v6041_v23  ;;  %2972 = vmatmul.bf16.gmra.mxu2 %v6049_v17 }
 0x343   : > { %v6043_v28 = vpop.f32.mrf.mxu2  ;;  %v1659_v25 = vpack.c.bf16 %v1126_v2, %v1124_v44  ;;  %v1655_v2 = vpack.c.bf16 %v6007_v54, %v5994_v37  ;;  %v2427_v37 = vld [vmem:[%s7178_s4 + $0x60] sm:$0xff] }
 0x344   : > { %7317 = vst [vmem:[#allocation54_spill] sm:$0xff] %v6043_v28  ;;  %2493 = vperm.xlu1 %4791, %v2427_v37  }
 0x345   : > { %v1355_v33 = vpop.f32.mrf.mxu1  ;;  %v1863_v23 = vunpack.c.l.bf16 %v1659_v25  ;;  %v1865_v19 = vunpack.c.h.bf16 %v1659_v25  ;;  %v1857_v13 = vunpack.c.h.bf16 %v1655_v2 }
 0x346   : > { %v6051_v58 = vpack.c.bf16 %v1355_v33, %v1353_v1  ;;  %v4650_v1 = vld [vmem:[#allocation9 + $0xc] sm:$0xf] }
 0x348   : > { %7319 = vst [vmem:[#allocation56_spill] sm:$0xff] %v6051_v58 }
 0x34a   : > { %v1129_v11 = vpop.f32.mrf.mxu0 }
 0x34b   : > { %v6054_v28 = vpop.f32.mrf.mxu2 }
 0x34d   : > { %1168 = vmatmul.bf16.gmra.mxu0 %v4616_v8  ;;  %v1657_v8 = vpack.c.bf16 %v1121_v36, %v1119_v42  ;;  %v1358_v33 = vpop.f32.mrf.mxu1  ;;  %v4314_v36 = vld [vmem:[#allocation9 + $0x28] sm:$0xf0] }
 0x34e   : > { %v6062_v60 = vor.u32 %v4650_v1, %v4314_v36  ;;  %v1853_v1 = vunpack.c.h.bf16 %v5990_v24 }
 0x34f   : > { %v1859_v44 = vunpack.c.l.bf16 %v1657_v8  ;;  %v1861_v42 = vunpack.c.h.bf16 %v1657_v8  ;;  %v6073_v8 = vpop.f32.mrf.mxu3 }
 0x350   : > { %7320 = vst [vmem:[#allocation57_spill] sm:$0xff] %v6062_v60 }
 0x352   : > { %v1131_v38 = vpop.f32.mrf.mxu0  ;;  %2986 = vmatmul.bf16.vlgmr.msrb.gmra.mxu3 %v6062_v60 }
 0x353   : > { %v1661_v62 = vpack.c.bf16 %v1131_v38, %v1129_v11  ;;  %v6064_v25 = vpop.f32.mrf.mxu2 }
 0x354   : > { %7321 = vst [vmem:[#allocation58_spill] sm:$0xff] %v6064_v25 }
 0x355   : > { %v1867_v9 = vunpack.c.l.bf16 %v1661_v62  ;;  %v1869_v15 = vunpack.c.h.bf16 %v1661_v62  ;;  %v1360_v62 = vpop.f32.mrf.mxu1 }
 0x357   : > { %4921 = vtanh.f32 %v1867_v9  ;;  %v1855_v9 = vunpack.c.l.bf16 %v1655_v2 }
 0x358   : > { %4923 = vtanh.f32 %v1869_v15 }
 0x359   : > { %4925 = vtanh.f32 %v1863_v23 }
 0x35a   : > { %4927 = vtanh.f32 %v1865_v19  ;;  %v1134_v11 = vpop.f32.mrf.mxu0  ;;  %v2422_v19 = vld [vmem:[%s7178_s4 + $0x38] sm:$0xff] }
 0x35b   : > { %4929 = vtanh.f32 %v1859_v44  ;;  %2468 = vperm.xlu0 %4790, %v2422_v19   ;;  %v6075_v44 = vpack.c.bf16 %v1360_v62, %v1358_v33  ;;  %v1849_v33 = vunpack.c.h.bf16 %v5975_v55  ;;  %v6094_v62 = vpop.f32.mrf.mxu3 }
 0x35c   : > { %4931 = vtanh.f32 %v1861_v42  ;;  %7323 = vst [vmem:[#allocation60_spill] sm:$0xff] %v6094_v62 }
 0x35d   : > { %v4922_v15 = vpop.eup %4921  ;;  %1173 = vmatmul.bf16.gmra.mxu0 %v4617_v63  ;;  %7322 = vst [vmem:[#allocation59_spill] sm:$0xff] %v6075_v44  ;;  %v1851_v63 = vunpack.c.l.bf16 %v5990_v24  ;;  %4933 = vtanh.f32 %v1855_v9  ;;  %v2428_v24 = vld [vmem:[%s7178_s4 + $0x68] sm:$0xff]  ;;  %v2417_v9 = vld [vmem:[%s7178_s4 + $0x10] sm:$0xff] }
 0x35e   : > { %v4924_v54 = vpop.eup %4923  ;;  %4935 = vtanh.f32 %v1857_v13  ;;  %2498 = vperm.xlu1 %4791, %v2428_v24  }
 0x35f   : > { %v4926_v23 = vpop.eup %4925  ;;  %v2301_v38 = vpack.c.bf16 %v4924_v54, %v4922_v15  ;;  %v6081_v15 = vpop.f32.mrf.mxu2  ;;  %v1847_v54 = vunpack.c.l.bf16 %v5975_v55  ;;  %4937 = vtanh.f32 %v1851_v63  ;;  %v4618_v63 = vld [vmem:[#allocation7 + $0x188] sm:$0xff] }
 0x360   : > { %v4928_v40 = vpop.eup %4927  ;;  %4939 = vtanh.f32 %v1853_v1  ;;  %v4658_v1 = vld [vmem:[#allocation9 + $0x4c] sm:$0xf] }
 0x361   : > { %3027 = vmatpush.bf16.msra.mxu2 %v2301_v38  ;;  %v4930_v2 = vpop.eup %4929  ;;  %v2299_v37 = vpack.c.bf16 %v4928_v40, %v4926_v23  ;;  %v1363_v38 = vpop.f32.mrf.mxu1  ;;  %v1843_v40 = vunpack.c.l.bf16 %v5960_v32  ;;  %4941 = vtanh.f32 %v1847_v54  ;;  %v1839_v54 = vunpack.c.l.bf16 %v5939_v43 }
 0x362   : > { %v1136_v36 = vpop.f32.mrf.mxu0  ;;  %v4932_v19 = vpop.eup %4931  ;;  %4943 = vtanh.f32 %v1849_v33  ;;  %v2416_v33 = vld [vmem:[%s7178_s4 + $0x8] sm:$0xff] }
 0x363   : > { %v6079_v42 = vpack.c.bf16 %v1136_v36, %v1134_v11  ;;  %v2425_v11 = vld [vmem:[%s7178_s4 + $0x50] sm:$0xff]  ;;  %v4934_v13 = vpop.eup %4933  ;;  %v2297_v23 = vpack.c.bf16 %v4932_v19, %v4930_v2  ;;  %2443 = vperm.xlu0 %4790, %v2417_v9   ;;  %v4346_v36 = vld [vmem:[#allocation9 + $0x68] sm:$0xf0]  ;;  %4945 = vtanh.f32 %v1843_v40 }
 0x364   : > { %2483 = vperm.xlu2 %4792, %v2425_v11   ;;  %v4936_v55 = vpop.eup %4935  ;;  %v6099_v2 = vor.u32 %v4658_v1, %v4346_v36 }
 0x365   : > { %3028 = vmatpush.bf16.msra.mxu2 %v2299_v37  ;;  %v1845_v37 = vunpack.c.h.bf16 %v5960_v32  ;;  %v4938_v19 = vpop.eup %4937  ;;  %v2295_v24 = vpack.c.bf16 %v4936_v55, %v4934_v13  ;;  %v2426_v32 = vld [vmem:[%s7178_s4 + $0x58] sm:$0xff]  ;;  %v1841_v13 = vunpack.c.h.bf16 %v5939_v43 }
 0x366   : > { %7324 = vst [vmem:[#allocation61_spill] sm:$0xff] %v6099_v2  ;;  %v4940_v9 = vpop.eup %4939  ;;  %2991 = vmatmul.bf16.gmra.mxu3 %v6099_v2  ;;  %2478 = vperm.xlu1 %4791, %v2424_v18  }
 0x367   : > { %v6101_v11 = vpop.f32.mrf.mxu2  ;;  %4947 = vtanh.f32 %v1845_v37  ;;  %v2293_v55 = vpack.c.bf16 %v4940_v9, %v4938_v19  ;;  %v2421_v9 = vld [vmem:[%s7178_s4 + $0x30] sm:$0xff] }
 0x368   : > { %7325 = vst [vmem:[#allocation62_spill] sm:$0xff] %v6101_v11  ;;  %4949 = vtanh.f32 %v1839_v54 }
 0x369   : > { %3029 = vmatpush.bf16.msra.mxu2 %v2297_v23  ;;  %v4942_v23 = vpop.eup %4941  ;;  %v1365_v40 = vpop.f32.mrf.mxu1  ;;  %4951 = vtanh.f32 %v1841_v13  ;;  %v4619_v13 = vld [vmem:[#allocation7 + $0x190] sm:$0xff] }
 0x36a   : > { %v1139_v60 = vpop.f32.mrf.mxu0  ;;  %v4944_v1 = vpop.eup %4943  ;;  %v6117_v36 = vpack.c.bf16 %v1365_v40, %v1363_v38  ;;  %v2419_v38 = vld [vmem:[%s7178_s4 + $0x20] sm:$0xff]  ;;  %v4666_v40 = vld [vmem:[#allocation9 + $0x8c] sm:$0xf] }
 0x36b   : > { %2438 = vperm.xlu0 %4790, %v2416_v33   ;;  %v4946_v2 = vpop.eup %4945  ;;  %v2291_v43 = vpack.c.bf16 %v4944_v1, %v4942_v23  ;;  %v4320_v23 = vld [vmem:[#allocation9 + $0x10] sm:$0xf]  ;;  %v4378_v1 = vld [vmem:[#allocation9 + $0xa8] sm:$0xf0] }
 0x36c   : > { %2488 = vperm.xlu2 %4792, %v2426_v32   ;;  %7326 = vst [vmem:[#allocation63_spill] sm:$0xff] %v6117_v36  ;;  %v6131_v25 = vor.u32 %v4666_v40, %v4378_v1  ;;  %v4620_v1 = vld [vmem:[#allocation7 + $0x198] sm:$0xff] }
 0x36d   : > { %3030 = vmatpush.bf16.msra.mxu2 %v2295_v24  ;;  %1178 = vmatmul.bf16.gmra.mxu0 %v4618_v63  ;;  %v6115_v63 = vpop.f32.mrf.mxu3  ;;  %v4948_v19 = vpop.eup %4947 }
 0x36e   : > { %v4950_v54 = vpop.eup %4949  ;;  %v2289_v32 = vpack.c.bf16 %v4948_v19, %v4946_v2  ;;  %2453 = vperm.xlu1 %4791, %v2419_v38   ;;  %7328 = vst [vmem:[#allocation65_spill] sm:$0xff] %v6131_v25  ;;  %v2420_v19 = vld [vmem:[%s7178_s4 + $0x28] sm:$0xff] }
 0x36f   : > { %v6121_v37 = vpop.f32.mrf.mxu2  ;;  %v4952_v33 = vpop.eup %4951 }
 0x370   : > { %v2287_v11 = vpack.c.bf16 %v4952_v33, %v4950_v54 }
 0x371   : > { %3031 = vmatpush.bf16.msra.mxu2 %v2293_v55  ;;  %v1368_v18 = vpop.f32.mrf.mxu1  ;;  %v4655_v55 = vld [vmem:[#allocation9 + $0x2c] sm:$0xf0] }
 0x372   : > { %v1141_v24 = vpop.f32.mrf.mxu0  ;;  %v6135_v2 = vor.u32 %v4655_v55, %v4320_v23  ;;  %v2415_v23 = vld [vmem:[%s7178_s4] sm:$0xff] }
 0x373   : > { %v6119_v17 = vpack.c.bf16 %v1141_v24, %v1139_v60 }
 0x374   : > { %2463 = vperm.xlu2 %4792, %v2421_v9   ;;  %7330 = vst [vmem:[#allocation67_spill] sm:$0xff] %v6135_v2  ;;  %v2418_v9 = vld [vmem:[%s7178_s4 + $0x18] sm:$0xff] }
 0x375   : > { %3032 = vmatpush.bf16.msra.mxu2 %v2291_v43  ;;  %v6129_v60 = vpop.f32.mrf.mxu3  ;;  %v5317_v43 = vld [vmem:[#allocation7 + $0xe8] sm:$0xff] }
 0x376   : > { %7327 = vst [vmem:[#allocation64_spill] sm:$0xff] %v6129_v60  ;;  %1407 = vmatmul.bf16.gmra.mxu1 %v5317_v43  ;;  %2996 = vmatmul.bf16.gmra.mxu3 %v6131_v25  ;;  %v4352_v43 = vld [vmem:[#allocation9 + $0x50] sm:$0xf]  ;;  %v4410_v25 = vld [vmem:[#allocation9 + $0xe8] sm:$0xf0] }
 0x377   : > { %v6133_v62 = vpop.f32.mrf.mxu2  ;;  %2448 = vperm.xlu1 %4791, %v2418_v9   ;;  %v4674_v9 = vld [vmem:[#allocation9 + $0xcc] sm:$0xf] }
 0x378   : > { %7329 = vst [vmem:[#allocation66_spill] sm:$0xff] %v6133_v62 }
 0x379   : > { %3033 = vmatpush.bf16.msra.mxu2 %v2289_v32  ;;  %v1370_v38 = vpop.f32.mrf.mxu1 }
 0x37a   : > { %v1144_v24 = vpop.f32.mrf.mxu0  ;;  %v6147_v32 = vpack.c.bf16 %v1370_v38, %v1368_v18  ;;  %v5318_v38 = vld [vmem:[#allocation7 + $0xf0] sm:$0xff] }
 0x37c   : > { %2458 = vperm.xlu2 %4792, %v2420_v19   ;;  %v4663_v19 = vld [vmem:[#allocation9 + $0x6c] sm:$0xf0] }
 0x37d   : > { %3034 = vmatpush.bf16.msra.mxu2 %v2287_v11  ;;  %1183 = vmatmul.bf16.gmra.mxu0 %v4619_v13  ;;  %v6144_v54 = vpop.f32.mrf.mxu3 }
 0x37f   : > { %v6151_v13 = vpop.f32.mrf.mxu2 }
 0x380   : > { %3035 = vmatmul.bf16.vlgmr.msra.gmra.mxu2 %v6135_v2  ;;  %v6162_v2 = vor.u32 %v4663_v19, %v4352_v43  ;;  %v4621_v43 = vld [vmem:[#allocation7 + $0x1a0] sm:$0xff]  ;;  %v4384_v19 = vld [vmem:[#allocation9 + $0x90] sm:$0xf] }
 0x381   : > { %v1373_v55 = vpop.f32.mrf.mxu1 }
 0x382   : > { %v1146_v33 = vpop.f32.mrf.mxu0  ;;  %7334 = vst [vmem:[#allocation71_spill] sm:$0xff] %v6162_v2 }
 0x383   : > { %v6149_v11 = vpack.c.bf16 %v1146_v33, %v1144_v24  ;;  %v6158_v24 = vor.u32 %v4674_v9, %v4410_v25 }
 0x384   : > { %2433 = vperm.xlu2 %4792, %v2415_v23  }
 0x385   : > { %v6156_v40 = vpop.f32.mrf.mxu3  ;;  %7332 = vst [vmem:[#allocation69_spill] sm:$0xff] %v6158_v24 }
 0x386   : > { %7331 = vst [vmem:[#allocation68_spill] sm:$0xff] %v6156_v40  ;;  %1412 = vmatmul.bf16.gmra.mxu1 %v5318_v38  ;;  %3001 = vmatmul.bf16.gmra.mxu3 %v6158_v24  ;;  %v4682_v24 = vld [vmem:[#allocation9 + $0x10c] sm:$0xf] }
 0x387   : > { %v6160_v33 = vpop.f32.mrf.mxu2 }
 0x388   : > { %7333 = vst [vmem:[#allocation70_spill] sm:$0xff] %v6160_v33  ;;  %v4671_v33 = vld [vmem:[#allocation9 + $0xac] sm:$0xf0] }
 0x389   : > { %v1375_v23 = vpop.f32.mrf.mxu1 }
 0x38a   : > { %v1149_v18 = vpop.f32.mrf.mxu0  ;;  %v6168_v40 = vpack.c.bf16 %v1375_v23, %v1373_v55 }
 0x38d   : > { %1188 = vmatmul.bf16.gmra.mxu0 %v4620_v1  ;;  %v6165_v62 = vpop.f32.mrf.mxu3  ;;  %v4442_v1 = vld [vmem:[#allocation9 + $0x128] sm:$0xf0] }
 0x38f   : > { %v6172_v38 = vpop.f32.mrf.mxu2 }
 0x390   : > { %3040 = vmatmul.bf16.gmra.mxu2 %v6162_v2  ;;  %v6178_v2 = vor.u32 %v4682_v24, %v4442_v1  ;;  %v4622_v1 = vld [vmem:[#allocation7 + $0x1a8] sm:$0xff] }
 0x391   : > { %v1378_v25 = vpop.f32.mrf.mxu1 }
 0x392   : > { %v1151_v60 = vpop.f32.mrf.mxu0  ;;  %7336 = vst [vmem:[#allocation73_spill] sm:$0xff] %v6178_v2 }
 0x393   : > { %v6170_v10 = vpack.c.bf16 %v1151_v60, %v1149_v18  ;;  %v6182_v60 = vor.u32 %v4671_v33, %v4384_v19  ;;  %v4416_v33 = vld [vmem:[#allocation9 + $0xd0] sm:$0xf] }
 0x394   : > { %v4679_v19 = vld [vmem:[#allocation9 + $0xec] sm:$0xf0] }
 0x395   : > { %v6174_v9 = vpop.f32.mrf.mxu3  ;;  %7338 = vst [vmem:[#allocation75_spill] sm:$0xff] %v6182_v60 }
 0x396   : > { %7335 = vst [vmem:[#allocation72_spill] sm:$0xff] %v6174_v9  ;;  %1417 = vmatmul.bf16.gmra.mxu1 %v5319_v5  ;;  %3006 = vmatmul.bf16.gmra.mxu3 %v6178_v2  ;;  %v4474_v2 = vld [vmem:[#allocation9 + $0x168] sm:$0xf0]  ;;  %v5320_v9 = vld [vmem:[#allocation7 + $0x100] sm:$0xff] }
 0x397   : > { %v6180_v55 = vpop.f32.mrf.mxu2 }
 0x398   : > { %7337 = vst [vmem:[#allocation74_spill] sm:$0xff] %v6180_v55  ;;  %v4690_v55 = vld [vmem:[#allocation9 + $0x14c] sm:$0xf] }
 0x399   : > { %v1380_v18 = vpop.f32.mrf.mxu1  ;;  %v6196_v4 = vor.u32 %v4690_v55, %v4474_v2  ;;  %v4623_v55 = vld [vmem:[#allocation7 + $0x1b0] sm:$0xff] }
 0x39a   : > { %v6176_v41 = vpop.f32.mrf.mxu0  ;;  %v6188_v57 = vpack.c.bf16 %v1380_v18, %v1378_v25  ;;  %v6200_v25 = vor.u32 %v4679_v19, %v4416_v33  ;;  %v4687_v33 = vld [vmem:[#allocation9 + $0x12c] sm:$0xf0]  ;;  %v4698_v19 = vld [vmem:[#allocation9 + $0x18c] sm:$0xf] }
 0x39b   : > { %7340 = vst [vmem:[#allocation77_spill] sm:$0xff] %v6196_v4  ;;  %v6212_v6 = vor.u32 %v4698_v19, %v4506_v51  ;;  %v4624_v19 = vld [vmem:[#allocation7 + $0x1b8] sm:$0xff] }
 0x39c   : > { %7342 = vst [vmem:[#allocation79_spill] sm:$0xff] %v6200_v25 }
 0x39d   : > { %1193 = vmatmul.bf16.gmra.mxu0 %v4621_v43  ;;  %v6185_v23 = vpop.f32.mrf.mxu3  ;;  %7345 = vst [vmem:[#allocation82_spill] sm:$0xff] %v6212_v6 }
 0x39f   : > { %v6192_v50 = vpop.f32.mrf.mxu2 }
 0x3a0   : > { %3045 = vmatmul.bf16.gmra.mxu2 %v6182_v60 }
 0x3a1   : > { %v1383_v5 = vpop.f32.mrf.mxu1 }
 0x3a2   : > { %v6190_v26 = vpop.f32.mrf.mxu0 }
 0x3a5   : > { %v6194_v24 = vpop.f32.mrf.mxu3 }
 0x3a6   : > { %7339 = vst [vmem:[#allocation76_spill] sm:$0xff] %v6194_v24  ;;  %1422 = vmatmul.bf16.gmra.mxu1 %v5320_v9  ;;  %3011 = vmatmul.bf16.gmra.mxu3 %v6196_v4 }
 0x3a7   : > { %v6198_v60 = vpop.f32.mrf.mxu2 }
 0x3a8   : > { %7341 = vst [vmem:[#allocation78_spill] sm:$0xff] %v6198_v60  ;;  %v4448_v60 = vld [vmem:[#allocation9 + $0x110] sm:$0xf] }
 0x3a9   : > { %v1385_v18 = vpop.f32.mrf.mxu1 }
 0x3aa   : > { %v1159_v43 = vpop.f32.mrf.mxu0  ;;  %v6206_v24 = vpack.c.bf16 %v1385_v18, %v1383_v5  ;;  %v6216_v5 = vor.u32 %v4687_v33, %v4448_v60  ;;  %v4695_v33 = vld [vmem:[#allocation9 + $0x16c] sm:$0xf0] }
 0x3ac   : > { %7343 = vst [vmem:[#allocation80_spill] sm:$0xff] %v6206_v24 }
 0x3ad   : > { %1198 = vmatmul.bf16.gmra.mxu0 %v4622_v1  ;;  %v6203_v22 = vpop.f32.mrf.mxu3  ;;  %v5321_v1 = vld [vmem:[#allocation7 + $0x108] sm:$0xff]  ;;  %7347 = vst [vmem:[#allocation84_spill] sm:$0xff] %v6216_v5 }
 0x3af   : > { %v6208_v29 = vpop.f32.mrf.mxu2 }
 0x3b0   : > { %3050 = vmatmul.bf16.gmra.mxu2 %v6200_v25 }
 0x3b1   : > { %v1388_v9 = vpop.f32.mrf.mxu1 }
 0x3b2   : > { %v1161_v0 = vpop.f32.mrf.mxu0 }
 0x3b5   : > { %v6210_v2 = vpop.f32.mrf.mxu3 }
 0x3b6   : > { %7344 = vst [vmem:[#allocation81_spill] sm:$0xff] %v6210_v2  ;;  %1427 = vmatmul.bf16.gmra.mxu1 %v5321_v1  ;;  %3016 = vmatmul.bf16.gmra.mxu3 %v6212_v6  ;;  %v4706_v6 = vld [vmem:[#allocation9 + $0x1cc] sm:$0xf] }
 0x3b7   : > { %v6214_v12 = vpop.f32.mrf.mxu2 }
 0x3b8   : > { %7346 = vst [vmem:[#allocation83_spill] sm:$0xff] %v6214_v12  ;;  %v4480_v12 = vld [vmem:[#allocation9 + $0x150] sm:$0xf] }
 0x3b9   : > { %v1390_v18 = vpop.f32.mrf.mxu1 }
 0x3ba   : > { %v1164_v4 = vpop.f32.mrf.mxu0  ;;  %v6222_v2 = vpack.c.bf16 %v1390_v18, %v1388_v9  ;;  %v6232_v9 = vor.u32 %v4695_v33, %v4480_v12 }
 0x3bc   : > { %7348 = vst [vmem:[#allocation85_spill] sm:$0xff] %v6222_v2 }
 0x3bd   : > { %1203 = vmatmul.bf16.gmra.mxu0 %v4623_v55  ;;  %v6219_v25 = vpop.f32.mrf.mxu3  ;;  %v4538_v55 = vld [vmem:[#allocation9 + $0x1e8] sm:$0xf0]  ;;  %7352 = vst [vmem:[#allocation89_spill] sm:$0xff] %v6232_v9 }
 0x3be   : > { %v6228_v60 = vpop.permute.xlu2 %2483  ;;  %v6230_v53 = vor.u32 %v4706_v6, %v4538_v55 }
 0x3bf   : > { %v6224_v7 = vpop.f32.mrf.mxu2  ;;  %7350 = vst [vmem:[#allocation87_spill] sm:$0xff] %v6228_v60 }
 0x3c0   : > { %3055 = vmatmul.bf16.gmra.mxu2 %v6216_v5  ;;  %7351 = vst [vmem:[#allocation88_spill] sm:$0xff] %v6230_v53  ;;  %v6237_v5 = vpop.permute.xlu0 %2503 }
 0x3c1   : > { %v1393_v1 = vpop.f32.mrf.mxu1  ;;  %7354 = vst [vmem:[#allocation91_spill] sm:$0xff] %v6237_v5  ;;  %v2876_v47 = vadd.f32 %v6054_v28, %v6237_v5 }
 0x3c2   : > { %v1166_v24 = vpop.f32.mrf.mxu0 }
 0x3c3   : > { %v1675_v6 = vpack.c.bf16 %v1166_v24, %v1164_v4  ;;  %v1671_v4 = vpack.c.bf16 %v6190_v26, %v6176_v41 }
 0x3c5   : > { %v6226_v51 = vpop.f32.mrf.mxu3  ;;  %v1897_v58 = vunpack.c.h.bf16 %v1675_v6  ;;  %v1889_v26 = vunpack.c.h.bf16 %v1671_v4 }
 0x3c6   : > { %7349 = vst [vmem:[#allocation86_spill] sm:$0xff] %v6226_v51  ;;  %1432 = vmatmul.bf16.gmra.mxu1 %v5322_v14  ;;  %3021 = vmatmul.bf16.gmra.mxu3 %v6230_v53  ;;  %v6244_v12 = vpop.permute.xlu2 %2488  ;;  %v1895_v53 = vunpack.c.l.bf16 %v1675_v6 }
 0x3c7   : > { %v6234_v18 = vpop.f32.mrf.mxu2  ;;  %7355 = vst [vmem:[#allocation92_spill] sm:$0xff] %v6244_v12  ;;  %v5325_v12 = vld [vmem:[#allocation7 + $0x128] sm:$0xff] }
 0x3c8   : > { %7353 = vst [vmem:[#allocation90_spill] sm:$0xff] %v6234_v18  ;;  %v1673_v18 = vpack.c.bf16 %v1161_v0, %v1159_v43  ;;  %v4703_v0 = vld [vmem:[#allocation9 + $0x1ac] sm:$0xf0] }
 0x3c9   : > { %v1395_v51 = vpop.f32.mrf.mxu1 }
 0x3ca   : > { %v1169_v31 = vpop.f32.mrf.mxu0  ;;  %v6242_v35 = vpack.c.bf16 %v1395_v51, %v1393_v1  ;;  %v1891_v24 = vunpack.c.l.bf16 %v1673_v18  ;;  %v1893_v43 = vunpack.c.h.bf16 %v1673_v18  ;;  %v5323_v1 = vld [vmem:[#allocation7 + $0x118] sm:$0xff] }
 0x3cd   : > { %1208 = vmatmul.bf16.gmra.mxu0 %v4624_v19  ;;  %v2924_v2 = vpop.f32.mrf.mxu3 }
 0x3ce   : > { %v2925_v55 = vadd.f32 %v2924_v2, %v2876_v47  ;;  %v4512_v47 = vld [vmem:[#allocation9 + $0x190] sm:$0xf]  ;;  %v6254_v6 = vpop.permute.xlu2 %2463 }
 0x3cf   : > { %v2973_v44 = vpop.f32.mrf.mxu2  ;;  %v6252_v51 = vor.u32 %v4703_v0, %v4512_v47  ;;  %7358 = vst [vmem:[#allocation95_spill] sm:$0xff] %v6254_v6 }
 0x3d0   : > { %3060 = vmatmul.bf16.gmra.mxu2 %v6232_v9  ;;  %v6248_v28 = vadd.f32 %v2973_v44, %v2925_v55  ;;  %v1887_v44 = vunpack.c.l.bf16 %v1671_v4 }
 0x3d1   : > { %v1398_v36 = vpop.f32.mrf.mxu1  ;;  %7357 = vst [vmem:[#allocation94_spill] sm:$0xff] %v6252_v51 }
 0x3d2   : > { %v1171_v14 = vpop.f32.mrf.mxu0 }
 0x3d3   : > { %v1677_v33 = vpack.c.bf16 %v1171_v14, %v1169_v31  ;;  %v4625_v31 = vld [vmem:[#allocation7 + $0x1c0] sm:$0xff] }
 0x3d5   : > { %v1899_v19 = vunpack.c.l.bf16 %v1677_v33  ;;  %v1901_v45 = vunpack.c.h.bf16 %v1677_v33  ;;  %v6246_v9 = vpop.f32.mrf.mxu3 }
 0x3d6   : > { %7356 = vst [vmem:[#allocation93_spill] sm:$0xff] %v6246_v9  ;;  %1437 = vmatmul.bf16.gmra.mxu1 %v5323_v1  ;;  %v6265_v1 = vpop.permute.xlu0 %2508 }
 0x3d7   : > { %4953 = vtanh.f32 %v1899_v19  ;;  %v1883_v19 = vunpack.c.l.bf16 %v6170_v10  ;;  %7359 = vst [vmem:[#allocation96_spill] sm:$0xff] %v6265_v1 }
 0x3d8   : > { %4955 = vtanh.f32 %v1901_v45 }
 0x3d9   : > { %4957 = vtanh.f32 %v1895_v53  ;;  %v1400_v33 = vpop.f32.mrf.mxu1 }
 0x3da   : > { %4959 = vtanh.f32 %v1897_v58  ;;  %v1174_v2 = vpop.f32.mrf.mxu0  ;;  %v6259_v18 = vpack.c.bf16 %v1400_v33, %v1398_v36  ;;  %v1881_v36 = vunpack.c.h.bf16 %v6149_v11  ;;  %v4626_v33 = vld [vmem:[#allocation7 + $0x1c8] sm:$0xff] }
 0x3db   : > { %4961 = vtanh.f32 %v1891_v24  ;;  %v1885_v24 = vunpack.c.h.bf16 %v6170_v10 }
 0x3dc   : > { %4963 = vtanh.f32 %v1893_v43 }
 0x3dd   : > { %v4954_v45 = vpop.eup %4953  ;;  %1213 = vmatmul.bf16.gmra.mxu0 %v4625_v31  ;;  %v6256_v55 = vpop.f32.mrf.mxu3  ;;  %4965 = vtanh.f32 %v1887_v44 }
 0x3de   : > { %v4956_v14 = vpop.eup %4955  ;;  %4967 = vtanh.f32 %v1889_v26  ;;  %v6269_v44 = vpop.permute.xlu2 %2458 }
 0x3df   : > { %v4958_v41 = vpop.eup %4957  ;;  %v2317_v53 = vpack.c.bf16 %v4956_v14, %v4954_v45  ;;  %v1879_v45 = vunpack.c.l.bf16 %v6149_v11  ;;  %4969 = vtanh.f32 %v1883_v19  ;;  %7360 = vst [vmem:[#allocation97_spill] sm:$0xff] %v6269_v44  ;;  %v1877_v19 = vunpack.c.h.bf16 %v6119_v17 }
 0x3e0   : > { %v4960_v58 = vpop.eup %4959  ;;  %3065 = vmatmul.bf16.gmra.mxu2 %v6252_v51  ;;  %4971 = vtanh.f32 %v1885_v24  ;;  %v5324_v24 = vld [vmem:[#allocation7 + $0x120] sm:$0xff]  ;;  %v1871_v51 = vunpack.c.l.bf16 %v6079_v42 }
 0x3e1   : > { %3076 = vmatpush.bf16.msra.mxu3 %v2317_v53  ;;  %v4962_v4 = vpop.eup %4961  ;;  %v2315_v0 = vpack.c.bf16 %v4960_v58, %v4958_v41  ;;  %v1403_v26 = vpop.f32.mrf.mxu1  ;;  %v1875_v41 = vunpack.c.l.bf16 %v6119_v17  ;;  %4973 = vtanh.f32 %v1879_v45  ;;  %v4544_v58 = vld [vmem:[#allocation9 + $0x1d0] sm:$0xf]  ;;  %v1873_v45 = vunpack.c.h.bf16 %v6079_v42 }
 0x3e2   : > { %v1176_v31 = vpop.f32.mrf.mxu0  ;;  %v4964_v43 = vpop.eup %4963  ;;  %4975 = vtanh.f32 %v1881_v36 }
 0x3e3   : > { %v6263_v47 = vpack.c.bf16 %v1176_v31, %v1174_v2  ;;  %v4966_v14 = vpop.eup %4965  ;;  %v2313_v10 = vpack.c.bf16 %v4964_v43, %v4962_v4  ;;  %v4711_v31 = vld [vmem:[#allocation9 + $0x1ec] sm:$0xf0]  ;;  %4977 = vtanh.f32 %v1875_v41 }
 0x3e4   : > { %v4968_v2 = vpop.eup %4967  ;;  %v6275_v43 = vor.u32 %v4711_v31, %v4544_v58  ;;  %4979 = vtanh.f32 %v1877_v19  ;;  %v6290_v31 = vpop.permute.xlu1 %2493 }
 0x3e5   : > { %3077 = vmatpush.bf16.msra.mxu3 %v2315_v0  ;;  %v6271_v53 = vpop.f32.mrf.mxu3  ;;  %v4970_v0 = vpop.eup %4969  ;;  %v2311_v5 = vpack.c.bf16 %v4968_v2, %v4966_v14  ;;  %4981 = vtanh.f32 %v1871_v51  ;;  %7364 = vst [vmem:[#allocation101_spill] sm:$0xff] %v6290_v31 }
 0x3e6   : > { %1442 = vmatmul.bf16.gmra.mxu1 %v5324_v24  ;;  %v4972_v4 = vpop.eup %4971  ;;  %7361 = vst [vmem:[#allocation98_spill] sm:$0xff] %v6275_v43  ;;  %v6286_v2 = vpop.permute.xlu2 %2433  ;;  %4983 = vtanh.f32 %v1873_v45 }
 0x3e7   : > { %v4974_v17 = vpop.eup %4973  ;;  %v2309_v36 = vpack.c.bf16 %v4972_v4, %v4970_v0  ;;  %7363 = vst [vmem:[#allocation100_spill] sm:$0xff] %v6286_v2  ;;  %v2841_v19 = vadd.f32 %v5941_v39, %v6286_v2 }
 0x3e8   : > { %v4976_v24 = vpop.eup %4975 }
 0x3e9   : > { %3078 = vmatpush.bf16.msra.mxu3 %v2313_v10  ;;  %v6279_v10 = vpop.permute.xlu0 %2473  ;;  %v1405_v9 = vpop.f32.mrf.mxu1  ;;  %v2890_v45 = vadd.f32 %v6073_v8, %v2841_v19 }
 0x3ea   : > { %v1179_v11 = vpop.f32.mrf.mxu0  ;;  %7362 = vst [vmem:[#allocation99_spill] sm:$0xff] %v6279_v10  ;;  %v6284_v14 = vpack.c.bf16 %v1405_v9, %v1403_v26  ;;  %v4978_v42 = vpop.eup %4977 }
 0x3eb   : > { %v4980_v58 = vpop.eup %4979 }
 0x3ec   : > { %v4982_v0 = vpop.eup %4981  ;;  %v2305_v9 = vpack.c.bf16 %v4980_v58, %v4978_v42  ;;  %v2939_v42 = vadd.f32 %v6081_v15, %v2890_v45  ;;  %v6304_v58 = vpop.permute.xlu1 %2498  ;;  %v2856_v45 = vadd.f32 %v5992_v59, %v6254_v6 }
 0x3ed   : > { %3079 = vmatpush.bf16.msra.mxu3 %v2311_v5  ;;  %1218 = vmatmul.bf16.gmra.mxu0 %v4626_v33  ;;  %v6281_v1 = vpop.f32.mrf.mxu3  ;;  %v2307_v33 = vpack.c.bf16 %v4976_v24, %v4974_v17  ;;  %v4984_v4 = vpop.eup %4983  ;;  %v4627_v17 = vld [vmem:[#allocation7 + $0x1d0] sm:$0xff]  ;;  %7367 = vst [vmem:[#allocation104_spill] sm:$0xff] %v6304_v58 }
 0x3ee   : > { %v4651_v24 = vld [vmem:[#allocation9 + $0x14] sm:$0xf]  ;;  %v2303_v39 = vpack.c.bf16 %v4984_v4, %v4982_v0 }
 0x3ef   : > { %v4482_v58 = vld [vmem:[#allocation9 + $0x170] sm:$0xf0] }
 0x3f0   : > { %3070 = vmatmul.bf16.gmra.mxu2 %v6275_v43 }
 0x3f1   : > { %3080 = vmatpush.bf16.msra.mxu3 %v2309_v36  ;;  %v6297_v36 = vpop.permute.xlu0 %2468 }
 0x3f2   : > { %v1181_v5 = vpop.f32.mrf.mxu0 }
 0x3f3   : > { %v6288_v41 = vpack.c.bf16 %v1181_v5, %v1179_v11  ;;  %v1408_v26 = vpop.f32.mrf.mxu1  ;;  %v6299_v11 = vpop.f32.mrf.mxu2  ;;  %v4322_v5 = vld [vmem:[#allocation9 + $0x30] sm:$0xf0] }
 0x3f4   : > { %7365 = vst [vmem:[#allocation102_spill] sm:$0xff] %v6299_v11 }
 0x3f5   : > { %3081 = vmatpush.bf16.msra.mxu3 %v2307_v33  ;;  %v6294_v51 = vpop.f32.mrf.mxu3  ;;  %v6301_v33 = vor.u32 %v4651_v24, %v4322_v5  ;;  %v6324_v5 = vpop.permute.xlu1 %2478 }
 0x3f6   : > { %1447 = vmatmul.bf16.gmra.mxu1 %v5325_v12  ;;  %7369 = vst [vmem:[#allocation106_spill] sm:$0xff] %v6324_v5 }
 0x3f7   : > { %7366 = vst [vmem:[#allocation103_spill] sm:$0xff] %v6301_v33 }
 0x3f9   : > { %3082 = vmatpush.bf16.msra.mxu3 %v2305_v9  ;;  %v2988_v9 = vadd.f32 %v6256_v55, %v2939_v42  ;;  %v6310_v44 = vpop.permute.xlu0 %2443 }
 0x3fa   : > { %v1184_v43 = vpop.f32.mrf.mxu0  ;;  %7368 = vst [vmem:[#allocation105_spill] sm:$0xff] %v6310_v44  ;;  %v2846_v15 = vadd.f32 %v5962_v27, %v6310_v44 }
 0x3fb   : > { %v1410_v8 = vpop.f32.mrf.mxu1 }
 0x3fc   : > { %v6308_v2 = vpack.c.bf16 %v1410_v8, %v1408_v26  ;;  %v2895_v55 = vadd.f32 %v6115_v63, %v2846_v15  ;;  %v2905_v26 = vadd.f32 %v6165_v62, %v2856_v45  ;;  %v5326_v8 = vld [vmem:[#allocation7 + $0x130] sm:$0xff] }
 0x3fd   : > { %3083 = vmatpush.bf16.msra.mxu3 %v2303_v39  ;;  %1223 = vmatmul.bf16.gmra.mxu0 %v4627_v17  ;;  %v2997_v19 = vpop.f32.mrf.mxu3  ;;  %v4354_v39 = vld [vmem:[#allocation9 + $0x70] sm:$0xf0] }
 0x400   : > { %3084 = vmatmul.bf16.vlgmr.msra.gmra.mxu3 %v6301_v33 }
 0x402   : > { %v1186_v11 = vpop.f32.mrf.mxu0 }
 0x403   : > { %v6312_v12 = vpack.c.bf16 %v1186_v11, %v1184_v43  ;;  %v3036_v0 = vpop.f32.mrf.mxu2  ;;  %v1413_v17 = vpop.f32.mrf.mxu1  ;;  %v4628_v43 = vld [vmem:[#allocation7 + $0x1d8] sm:$0xff]  ;;  %v4659_v11 = vld [vmem:[#allocation9 + $0x54] sm:$0xf] }
 0x404   : > { %v6316_v4 = vadd.f32 %v3036_v0, %v2988_v9  ;;  %v2944_v9 = vadd.f32 %v6121_v37, %v2895_v55  ;;  %v6329_v59 = vor.u32 %v4659_v11, %v4354_v39  ;;  %v2954_v0 = vadd.f32 %v6172_v38, %v2905_v26  ;;  %v4629_v39 = vld [vmem:[#allocation7 + $0x1e0] sm:$0xff] }
 0x405   : > { %v6320_v24 = vpop.f32.mrf.mxu3  ;;  %v2861_v38 = vadd.f32 %v6009_v3, %v6279_v10 }
 0x406   : > { %1452 = vmatmul.bf16.gmra.mxu1 %v5326_v8  ;;  %7370 = vst [vmem:[#allocation107_spill] sm:$0xff] %v6329_v59  ;;  %v2993_v62 = vadd.f32 %v6281_v1, %v2944_v9  ;;  %v6336_v8 = vpop.permute.xlu1 %2453  ;;  %v4667_v9 = vld [vmem:[#allocation9 + $0x94] sm:$0xf] }
 0x407   : > { %7371 = vst [vmem:[#allocation108_spill] sm:$0xff] %v6336_v8  ;;  %v2851_v55 = vadd.f32 %v5977_v20, %v6336_v8  ;;  %v2910_v11 = vadd.f32 %v6185_v23, %v2861_v38 }
 0x409   : > { %v2959_v3 = vadd.f32 %v6192_v50, %v2910_v11  ;;  %v4630_v11 = vld [vmem:[#allocation7 + $0x1e8] sm:$0xff] }
 0x40a   : > { %v1189_v42 = vpop.f32.mrf.mxu0 }
 0x40b   : > { %v6326_v27 = vpop.f32.mrf.mxu2  ;;  %v1415_v63 = vpop.f32.mrf.mxu1 }
 0x40c   : > { %v6334_v45 = vpack.c.bf16 %v1415_v63, %v1413_v17  ;;  %v2900_v17 = vadd.f32 %v6144_v54, %v2851_v55 }
 0x40d   : > { %1228 = vmatmul.bf16.gmra.mxu0 %v4628_v43  ;;  %v3002_v15 = vpop.f32.mrf.mxu3 }
 0x40e   : > { %v3003_v33 = vadd.f32 %v3002_v15, %v2954_v0  ;;  %v5327_v0 = vld [vmem:[#allocation7 + $0x138] sm:$0xff]  ;;  %v2949_v63 = vadd.f32 %v6151_v13, %v2900_v17  ;;  %v2866_v13 = vadd.f32 %v6022_v49, %v6228_v60 }
 0x410   : > { %3089 = vmatmul.bf16.gmra.mxu3 %v6329_v59  ;;  %v2915_v50 = vadd.f32 %v6203_v22, %v2866_v13 }
 0x412   : > { %v1191_v6 = vpop.f32.mrf.mxu0 }
 0x413   : > { %v6338_v44 = vpack.c.bf16 %v1191_v6, %v1189_v42  ;;  %v3041_v37 = vpop.f32.mrf.mxu2  ;;  %v1418_v1 = vpop.f32.mrf.mxu1  ;;  %v4386_v6 = vld [vmem:[#allocation9 + $0xb0] sm:$0xf0] }
 0x414   : > { %v6342_v43 = vadd.f32 %v3041_v37, %v2993_v62  ;;  %v6355_v15 = vor.u32 %v4667_v9, %v4386_v6  ;;  %v2998_v37 = vadd.f32 %v2997_v19, %v2949_v63  ;;  %v4675_v19 = vld [vmem:[#allocation9 + $0xd4] sm:$0xf] }
 0x415   : > { %v6346_v26 = vpop.f32.mrf.mxu3  ;;  %v4418_v9 = vld [vmem:[#allocation9 + $0xf0] sm:$0xf0] }
 0x416   : > { %1457 = vmatmul.bf16.gmra.mxu1 %v5327_v0  ;;  %7372 = vst [vmem:[#allocation109_spill] sm:$0xff] %v6355_v15 }
 0x41a   : > { %v6350_v42 = vpop.f32.mrf.mxu0 }
 0x41b   : > { %v6352_v20 = vpop.f32.mrf.mxu2  ;;  %v1420_v62 = vpop.f32.mrf.mxu1 }
 0x41c   : > { %v6359_v23 = vpack.c.bf16 %v1420_v62, %v1418_v1  ;;  %v5328_v1 = vld [vmem:[#allocation7 + $0x140] sm:$0xff]  ;;  %v2964_v62 = vadd.f32 %v6208_v29, %v2915_v50  ;;  %v4631_v29 = vld [vmem:[#allocation7 + $0x1f0] sm:$0xff] }
 0x41d   : > { %1233 = vmatmul.bf16.gmra.mxu0 %v4629_v39  ;;  %v3007_v54 = vpop.f32.mrf.mxu3  ;;  %v4683_v50 = vld [vmem:[#allocation9 + $0x114] sm:$0xf] }
 0x41e   : > { %v3008_v55 = vadd.f32 %v3007_v54, %v2959_v3  ;;  %v6372_v3 = vor.u32 %v4675_v19, %v4418_v9  ;;  %v4450_v9 = vld [vmem:[#allocation9 + $0x130] sm:$0xf0] }
 0x420   : > { %3094 = vmatmul.bf16.gmra.mxu3 %v6355_v15  ;;  %7374 = vst [vmem:[#allocation111_spill] sm:$0xff] %v6372_v3  ;;  %v2871_v15 = vadd.f32 %v6035_v56, %v6290_v31 }
 0x422   : > { %v6361_v38 = vpop.f32.mrf.mxu0 }
 0x423   : > { %v3046_v0 = vpop.f32.mrf.mxu2  ;;  %v1423_v17 = vpop.f32.mrf.mxu1 }
 0x424   : > { %v6363_v59 = vadd.f32 %v3046_v0, %v2998_v37 }
 0x425   : > { %v6367_v39 = vpop.f32.mrf.mxu3 }
 0x426   : > { %7373 = vst [vmem:[#allocation110_spill] sm:$0xff] %v6367_v39  ;;  %1462 = vmatmul.bf16.gmra.mxu1 %v5328_v1 }
 0x42a   : > { %v1199_v6 = vpop.f32.mrf.mxu0 }
 0x42b   : > { %v6370_v63 = vpop.f32.mrf.mxu2  ;;  %v1425_v54 = vpop.f32.mrf.mxu1 }
 0x42c   : > { %v6376_v37 = vpack.c.bf16 %v1425_v54, %v1423_v17 }
 0x42d   : > { %1238 = vmatmul.bf16.gmra.mxu0 %v4630_v11  ;;  %v3012_v49 = vpop.f32.mrf.mxu3  ;;  %v2920_v11 = vadd.f32 %v6219_v25, %v2871_v15 }
 0x42e   : > { %v3013_v22 = vadd.f32 %v3012_v49, %v2964_v62  ;;  %v6387_v62 = vor.u32 %v4683_v50, %v4450_v9  ;;  %v4632_v50 = vld [vmem:[#allocation7 + $0x1f8] sm:$0xff]  ;;  %v4691_v9 = vld [vmem:[#allocation9 + $0x154] sm:$0xf] }
 0x42f   : > { %v2969_v54 = vadd.f32 %v6224_v7, %v2920_v11  ;;  %v5330_v11 = vld [vmem:[#allocation7 + $0x150] sm:$0xff] }
 0x430   : > { %3099 = vmatmul.bf16.gmra.mxu3 %v6372_v3  ;;  %v5329_v3 = vld [vmem:[#allocation7 + $0x148] sm:$0xff]  ;;  %7376 = vst [vmem:[#allocation113_spill] sm:$0xff] %v6387_v62 }
 0x432   : > { %v1201_v0 = vpop.f32.mrf.mxu0 }
 0x433   : > { %v3051_v13 = vpop.f32.mrf.mxu2  ;;  %v1428_v60 = vpop.f32.mrf.mxu1 }
 0x434   : > { %v6380_v1 = vadd.f32 %v3051_v13, %v3003_v33 }
 0x435   : > { %v6382_v19 = vpop.f32.mrf.mxu3 }
 0x436   : > { %7375 = vst [vmem:[#allocation112_spill] sm:$0xff] %v6382_v19  ;;  %1467 = vmatmul.bf16.gmra.mxu1 %v5329_v3 }
 0x43a   : > { %v1204_v10 = vpop.f32.mrf.mxu0 }
 0x43b   : > { %v6385_v17 = vpop.f32.mrf.mxu2  ;;  %v1430_v56 = vpop.f32.mrf.mxu1 }
 0x43c   : > { %v6391_v49 = vpack.c.bf16 %v1430_v56, %v1428_v60 }
 0x43d   : > { %1243 = vmatmul.bf16.gmra.mxu0 %v4631_v29  ;;  %v3017_v33 = vpop.f32.mrf.mxu3 }
 0x43e   : > { %v6393_v25 = vadd.f32 %v3017_v33, %v2969_v54 }
 0x440   : > { %3104 = vmatmul.bf16.gmra.mxu3 %v6387_v62  ;;  %v6401_v62 = vor.u32 %v4691_v9, %v4482_v58 }
 0x442   : > { %v1206_v15 = vpop.f32.mrf.mxu0  ;;  %7379 = vst [vmem:[#allocation116_spill] sm:$0xff] %v6401_v62 }
 0x443   : > { %v3056_v13 = vpop.f32.mrf.mxu2  ;;  %v1433_v3 = vpop.f32.mrf.mxu1  ;;  %v1691_v33 = vpack.c.bf16 %v1206_v15, %v1204_v10  ;;  %v4514_v10 = vld [vmem:[#allocation9 + $0x1b0] sm:$0xf0] }
 0x444   : > { %v6395_v31 = vadd.f32 %v3056_v13, %v3008_v55 }
 0x445   : > { %v6397_v8 = vpop.f32.mrf.mxu3 }
 0x446   : > { %7377 = vst [vmem:[#allocation114_spill] sm:$0xff] %v6397_v8  ;;  %1472 = vmatmul.bf16.gmra.mxu1 %v5330_v11  ;;  %v1689_v11 = vpack.c.bf16 %v1201_v0, %v1199_v6 }
 0x448   : > { %v1925_v15 = vunpack.c.h.bf16 %v1689_v11 }
 0x44a   : > { %v1209_v7 = vpop.f32.mrf.mxu0 }
 0x44b   : > { %v6399_v29 = vpop.f32.mrf.mxu2  ;;  %v1435_v60 = vpop.f32.mrf.mxu1 }
 0x44c   : > { %7378 = vst [vmem:[#allocation115_spill] sm:$0xff] %v6399_v29  ;;  %v6404_v55 = vpack.c.bf16 %v1435_v60, %v1433_v3  ;;  %v1927_v29 = vunpack.c.l.bf16 %v1691_v33  ;;  %v1687_v3 = vpack.c.bf16 %v6361_v38, %v6350_v42  ;;  %v1923_v60 = vunpack.c.l.bf16 %v1689_v11 }
 0x44d   : > { %1248 = vmatmul.bf16.gmra.mxu0 %v4632_v50  ;;  %v3022_v54 = vpop.f32.mrf.mxu3  ;;  %v1929_v50 = vunpack.c.h.bf16 %v1691_v33 }
 0x44e   : > { %v6407_v56 = vadd.f32 %v3022_v54, %v6248_v28  ;;  %v4699_v28 = vld [vmem:[#allocation9 + $0x194] sm:$0xf]  ;;  %v1921_v33 = vunpack.c.h.bf16 %v1687_v3 }
 0x44f   : > { %v6415_v0 = vor.u32 %v4699_v28, %v4514_v10 }
 0x450   : > { %3109 = vmatmul.bf16.gmra.mxu3 %v6401_v62  ;;  %v4680_v62 = vld [vmem:[#allocation9 + $0xf4] sm:$0xf0] }
 0x451   : > { %7381 = vst [vmem:[#allocation118_spill] sm:$0xff] %v6415_v0 }
 0x452   : > { %v1211_v13 = vpop.f32.mrf.mxu0 }
 0x453   : > { %v1693_v8 = vpack.c.bf16 %v1211_v13, %v1209_v7  ;;  %v3061_v19 = vpop.f32.mrf.mxu2  ;;  %v1438_v5 = vpop.f32.mrf.mxu1 }
 0x454   : > { %v6409_v39 = vadd.f32 %v3061_v19, %v3013_v22  ;;  %v5331_v22 = vld [vmem:[#allocation7 + $0x158] sm:$0xff]  ;;  %v1919_v19 = vunpack.c.l.bf16 %v1687_v3 }
 0x455   : > { %v1931_v58 = vunpack.c.l.bf16 %v1693_v8  ;;  %v1933_v9 = vunpack.c.h.bf16 %v1693_v8 }
 0x456   : > { %1477 = vmatmul.bf16.gmra.mxu1 %v5331_v22 }
 0x457   : > { %4985 = vtanh.f32 %v1931_v58  ;;  %v1915_v58 = vunpack.c.l.bf16 %v6338_v44 }
 0x458   : > { %4987 = vtanh.f32 %v1933_v9  ;;  %v1917_v9 = vunpack.c.h.bf16 %v6338_v44 }
 0x459   : > { %4989 = vtanh.f32 %v1927_v29 }
 0x45a   : > { %4991 = vtanh.f32 %v1929_v50  ;;  %v1214_v7 = vpop.f32.mrf.mxu0 }
 0x45b   : > { %v6413_v6 = vpop.f32.mrf.mxu2  ;;  %4993 = vtanh.f32 %v1923_v60  ;;  %v1440_v29 = vpop.f32.mrf.mxu1 }
 0x45c   : > { %7380 = vst [vmem:[#allocation117_spill] sm:$0xff] %v6413_v6  ;;  %4995 = vtanh.f32 %v1925_v15  ;;  %v6418_v11 = vpack.c.bf16 %v1440_v29, %v1438_v5  ;;  %v1911_v5 = vunpack.c.l.bf16 %v6312_v12 }
 0x45d   : > { %v4986_v8 = vpop.eup %4985  ;;  %4997 = vtanh.f32 %v1919_v19 }
 0x45e   : > { %v4988_v54 = vpop.eup %4987  ;;  %4999 = vtanh.f32 %v1921_v33 }
 0x45f   : > { %v4990_v42 = vpop.eup %4989  ;;  %v2333_v38 = vpack.c.bf16 %v4988_v54, %v4986_v8  ;;  %5001 = vtanh.f32 %v1915_v58  ;;  %v1913_v8 = vunpack.c.h.bf16 %v6312_v12 }
 0x460   : > { %v4992_v13 = vpop.eup %4991  ;;  %3114 = vmatmul.bf16.gmra.mxu3 %v6415_v0  ;;  %5003 = vtanh.f32 %v1917_v9 }
 0x461   : > { %3125 = vmatpush.bf16.msrb.mxu2 %v2333_v38  ;;  %v4994_v60 = vpop.eup %4993  ;;  %v2331_v10 = vpack.c.bf16 %v4992_v13, %v4990_v42  ;;  %5005 = vtanh.f32 %v1911_v5  ;;  %v4707_v42 = vld [vmem:[#allocation9 + $0x1d4] sm:$0xf]  ;;  %v5332_v13 = vld [vmem:[#allocation7 + $0x160] sm:$0xff]  ;;  %v1742_v5 = vunpack.c.h.bf16 %v5907_v61 }
 0x462   : > { %v1216_v50 = vpop.f32.mrf.mxu0  ;;  %v4996_v15 = vpop.eup %4995  ;;  %v4546_v38 = vld [vmem:[#allocation9 + $0x1f0] sm:$0xf0]  ;;  %5007 = vtanh.f32 %v1913_v8 }
 0x463   : > { %v6422_v28 = vpack.c.bf16 %v1216_v50, %v1214_v7  ;;  %v3066_v3 = vpop.f32.mrf.mxu2  ;;  %v4998_v19 = vpop.eup %4997  ;;  %v2329_v44 = vpack.c.bf16 %v4996_v15, %v4994_v60  ;;  %v1907_v7 = vunpack.c.l.bf16 %v6288_v41  ;;  %v1740_v60 = vunpack.c.l.bf16 %v5907_v61 }
 0x464   : > { %v6425_v22 = vadd.f32 %v3066_v3, %v6393_v25  ;;  %v1443_v54 = vpop.f32.mrf.mxu1  ;;  %v5000_v33 = vpop.eup %4999  ;;  %v1909_v25 = vunpack.c.h.bf16 %v6288_v41  ;;  %v6434_v3 = vor.u32 %v4707_v42, %v4546_v38  ;;  %v1905_v15 = vunpack.c.h.bf16 %v6263_v47 }
 0x465   : > { %3126 = vmatpush.bf16.msrb.mxu2 %v2331_v10  ;;  %v5002_v58 = vpop.eup %5001  ;;  %v2327_v12 = vpack.c.bf16 %v5000_v33, %v4998_v19  ;;  %v1903_v10 = vunpack.c.l.bf16 %v6263_v47  ;;  %5009 = vtanh.f32 %v1907_v7  ;;  %v1736_v33 = vunpack.c.l.bf16 %v5899_v16 }
 0x466   : > { %1482 = vmatmul.bf16.gmra.mxu1 %v5332_v13  ;;  %v5004_v9 = vpop.eup %5003  ;;  %7383 = vst [vmem:[#allocation120_spill] sm:$0xff] %v6434_v3  ;;  %5011 = vtanh.f32 %v1909_v25  ;;  %v1738_v47 = vunpack.c.h.bf16 %v5899_v16 }
 0x467   : > { %v5006_v41 = vpop.eup %5005  ;;  %v2325_v8 = vpack.c.bf16 %v5004_v9, %v5002_v58  ;;  %5013 = vtanh.f32 %v1740_v60  ;;  %v1732_v9 = vunpack.c.l.bf16 %v5891_v30 }
 0x468   : > { %v5008_v13 = vpop.eup %5007  ;;  %5015 = vtanh.f32 %v1903_v10  ;;  %v1734_v10 = vunpack.c.h.bf16 %v5891_v30 }
 0x469   : > { %3127 = vmatpush.bf16.msrb.mxu2 %v2329_v44  ;;  %5017 = vtanh.f32 %v1905_v15  ;;  %v2323_v25 = vpack.c.bf16 %v5008_v13, %v5006_v41  ;;  %v4656_v41 = vld [vmem:[#allocation9 + $0x34] sm:$0xf0]  ;;  %v5333_v13 = vld [vmem:[#allocation7 + $0x168] sm:$0xff] }
 0x46a   : > { %v1219_v29 = vpop.f32.mrf.mxu0  ;;  %5019 = vtanh.f32 %v1742_v5 }
 0x46b   : > { %v6431_v50 = vpop.f32.mrf.mxu2  ;;  %v5010_v42 = vpop.eup %5009  ;;  %5021 = vtanh.f32 %v1736_v33 }
 0x46c   : > { %7382 = vst [vmem:[#allocation119_spill] sm:$0xff] %v6431_v50  ;;  %v1445_v44 = vpop.f32.mrf.mxu1  ;;  %v5012_v58 = vpop.eup %5011  ;;  %5023 = vtanh.f32 %v1738_v47 }
 0x46d   : > { %3128 = vmatpush.bf16.msrb.mxu2 %v2327_v12  ;;  %v6440_v19 = vpack.c.bf16 %v1445_v44, %v1443_v54  ;;  %v5014_v54 = vpop.eup %5013  ;;  %v2321_v15 = vpack.c.bf16 %v5012_v58, %v5010_v42  ;;  %v1728_v44 = vunpack.c.l.bf16 %v5883_v48  ;;  %5025 = vtanh.f32 %v1732_v9  ;;  %v6453_v33 = vpop.f32.mrf.mxu3 }
 0x46e   : > { %v5016_v60 = vpop.eup %5015  ;;  %5027 = vtanh.f32 %v1734_v10  ;;  %7384 = vst [vmem:[#allocation121_spill] sm:$0xff] %v6453_v33  ;;  %v1724_v58 = vunpack.c.l.bf16 %v5867_v21  ;;  %v1726_v9 = vunpack.c.h.bf16 %v5867_v21 }
 0x46f   : > { %v5018_v5 = vpop.eup %5017  ;;  %5029 = vtanh.f32 %v1728_v44 }
 0x470   : > { %3119 = vmatmul.bf16.gmra.mxu3 %v6434_v3  ;;  %v2319_v30 = vpack.c.bf16 %v5018_v5, %v5016_v60 }
 0x471   : > { %3129 = vmatpush.bf16.msrb.mxu2 %v2325_v8  ;;  %v4328_v8 = vld [vmem:[#allocation9 + $0x18] sm:$0xf] }
 0x472   : > { %v1221_v7 = vpop.f32.mrf.mxu0 }
 0x473   : > { %v6444_v38 = vpack.c.bf16 %v1221_v7, %v1219_v29  ;;  %v3071_v61 = vpop.f32.mrf.mxu2  ;;  %v5020_v29 = vpop.eup %5019  ;;  %v1730_v7 = vunpack.c.h.bf16 %v5883_v48 }
 0x474   : > { %v6447_v12 = vadd.f32 %v3071_v61, %v6407_v56  ;;  %v1448_v16 = vpop.f32.mrf.mxu1  ;;  %v5022_v47 = vpop.eup %5021  ;;  %v2238_v42 = vpack.c.bf16 %v5020_v29, %v5014_v54  ;;  %v6455_v61 = vor.u32 %v4656_v41, %v4328_v8  ;;  %v1720_v54 = vunpack.c.l.bf16 %v5862_v52 }
 0x475   : > { %3130 = vmatpush.bf16.msrb.mxu2 %v2323_v25  ;;  %v5024_v25 = vpop.eup %5023  ;;  %5031 = vtanh.f32 %v1730_v7  ;;  %v1722_v29 = vunpack.c.h.bf16 %v5862_v52 }
 0x476   : > { %1487 = vmatmul.bf16.gmra.mxu1 %v5333_v13  ;;  %7385 = vst [vmem:[#allocation122_spill] sm:$0xff] %v6455_v61  ;;  %v5026_v13 = vpop.eup %5025  ;;  %v2236_v48 = vpack.c.bf16 %v5024_v25, %v5022_v47  ;;  %5033 = vtanh.f32 %v1724_v58  ;;  %v1718_v47 = vunpack.c.h.bf16 %v5859_v46 }
 0x477   : > { %v5028_v60 = vpop.eup %5027  ;;  %5035 = vtanh.f32 %v1726_v9  ;;  %v4360_v9 = vld [vmem:[#allocation9 + $0x58] sm:$0xf] }
 0x478   : > { %v5030_v41 = vpop.eup %5029  ;;  %v2234_v7 = vpack.c.bf16 %v5028_v60, %v5026_v13  ;;  %5037 = vtanh.f32 %v1720_v54  ;;  %v1804_v60 = vunpack.c.l.bf16 %v6188_v57 }
 0x479   : > { %3131 = vmatpush.bf16.msrb.mxu2 %v2321_v15  ;;  %5039 = vtanh.f32 %v1722_v29 }
 0x47a   : > { %v1224_v56 = vpop.f32.mrf.mxu0 }
 0x47c   : > { %v1450_v15 = vpop.f32.mrf.mxu1 }
 0x47d   : > { %3132 = vmatpush.bf16.msrb.mxu2 %v2319_v30  ;;  %v6460_v10 = vpack.c.bf16 %v1450_v15, %v1448_v16  ;;  %v5032_v30 = vpop.eup %5031  ;;  %v1716_v16 = vunpack.c.l.bf16 %v5859_v46  ;;  %v4664_v15 = vld [vmem:[#allocation9 + $0x74] sm:$0xf0] }
 0x47e   : > { %v5034_v25 = vpop.eup %5033  ;;  %v2232_v52 = vpack.c.bf16 %v5032_v30, %v5030_v41 }
 0x47f   : > { %v5036_v58 = vpop.eup %5035  ;;  %5041 = vtanh.f32 %v1716_v16  ;;  %v1802_v16 = vunpack.c.h.bf16 %v6168_v40 }
 0x480   : > { %3133 = vmatmul.bf16.vlgmr.msrb.gmra.mxu2 %v6455_v61  ;;  %5043 = vtanh.f32 %v1718_v47  ;;  %v5038_v54 = vpop.eup %5037  ;;  %v2230_v29 = vpack.c.bf16 %v5036_v58, %v5034_v25 }
 0x481   : > { %3223 = vmatpush.bf16.msra.mxu2 %v2238_v42  ;;  %v5040_v41 = vpop.eup %5039 }
 0x482   : > { %v1226_v5 = vpop.f32.mrf.mxu0  ;;  %v2228_v47 = vpack.c.bf16 %v5040_v41, %v5038_v54 }
 0x483   : > { %v6464_v8 = vpack.c.bf16 %v1226_v5, %v1224_v56  ;;  %v3085_v21 = vpop.f32.mrf.mxu3  ;;  %v1712_v56 = vunpack.c.l.bf16 %v5856_v34  ;;  %v1806_v5 = vunpack.c.h.bf16 %v6188_v57 }
 0x484   : > { %v6467_v44 = vadd.f32 %v3085_v21, %v6316_v4  ;;  %v1453_v42 = vpop.f32.mrf.mxu1  ;;  %v1714_v4 = vunpack.c.h.bf16 %v5856_v34  ;;  %v6477_v21 = vor.u32 %v4664_v15, %v4360_v9  ;;  %v1800_v34 = vunpack.c.l.bf16 %v6168_v40 }
 0x485   : > { %3224 = vmatpush.bf16.msra.mxu2 %v2236_v48  ;;  %v5334_v48 = vld [vmem:[#allocation7 + $0x170] sm:$0xff]  ;;  %5045 = vtanh.f32 %v1712_v56  ;;  %v5042_v30 = vpop.eup %5041  ;;  %v1796_v56 = vunpack.c.l.bf16 %v6147_v32 }
 0x486   : > { %1492 = vmatmul.bf16.gmra.mxu1 %v5334_v48  ;;  %7386 = vst [vmem:[#allocation123_spill] sm:$0xff] %v6477_v21  ;;  %5047 = vtanh.f32 %v1714_v4  ;;  %v5044_v57 = vpop.eup %5043  ;;  %v1798_v48 = vunpack.c.h.bf16 %v6147_v32  ;;  %v4672_v32 = vld [vmem:[#allocation9 + $0xb4] sm:$0xf0] }
 0x487   : > { %5049 = vtanh.f32 %v1804_v60  ;;  %v2226_v60 = vpack.c.bf16 %v5044_v57, %v5042_v30  ;;  %v5335_v30 = vld [vmem:[#allocation7 + $0x178] sm:$0xff]  ;;  %v7388_v57 = vld [vmem:[#allocation59_spill] sm:$0xff] }
 0x488   : > { %5051 = vtanh.f32 %v1806_v5  ;;  %v7387_v5 = vld [vmem:[#allocation63_spill] sm:$0xff] }
 0x489   : > { %3225 = vmatpush.bf16.msra.mxu2 %v2234_v7  ;;  %5053 = vtanh.f32 %v1800_v34  ;;  %v1794_v34 = vunpack.c.h.bf16 %v7387_v5 }
 0x48a   : > { %v1229_v13 = vpop.f32.mrf.mxu0  ;;  %5055 = vtanh.f32 %v1802_v16 }
 0x48b   : > { %v6474_v46 = vpop.f32.mrf.mxu3  ;;  %v5046_v58 = vpop.eup %5045  ;;  %5057 = vtanh.f32 %v1796_v56  ;;  %v1790_v56 = vunpack.c.h.bf16 %v7388_v57 }
 0x48c   : > { %v1455_v7 = vpop.f32.mrf.mxu1  ;;  %v5048_v4 = vpop.eup %5047  ;;  %5059 = vtanh.f32 %v1798_v48 }
 0x48d   : > { %3226 = vmatpush.bf16.msra.mxu2 %v2232_v52  ;;  %v6482_v52 = vpack.c.bf16 %v1455_v7, %v1453_v42  ;;  %v5050_v42 = vpop.eup %5049 }
 0x48e   : > { %v5052_v54 = vpop.eup %5051 }
 0x48f   : > { %v5054_v7 = vpop.eup %5053 }
 0x490   : > { %3138 = vmatmul.bf16.gmra.mxu2 %v6477_v21  ;;  %v5056_v16 = vpop.eup %5055  ;;  %v5338_v21 = vld [vmem:[#allocation7 + $0x190] sm:$0xff] }
 0x491   : > { %3227 = vmatpush.bf16.msra.mxu2 %v2230_v29  ;;  %v1792_v29 = vunpack.c.l.bf16 %v7387_v5  ;;  %v2268_v48 = vpack.c.bf16 %v5056_v16, %v5054_v7 }
 0x492   : > { %v1231_v25 = vpop.f32.mrf.mxu0 }
 0x493   : > { %v6485_v9 = vpack.c.bf16 %v1231_v25, %v1229_v13  ;;  %v3090_v15 = vpop.f32.mrf.mxu3  ;;  %v2224_v13 = vpack.c.bf16 %v5048_v4, %v5046_v58  ;;  %v4392_v25 = vld [vmem:[#allocation9 + $0x98] sm:$0xf]  ;;  %5061 = vtanh.f32 %v1792_v29  ;;  %v5058_v4 = vpop.eup %5057 }
 0x494   : > { %v6489_v40 = vadd.f32 %v3090_v15, %v6342_v43  ;;  %v1458_v41 = vpop.f32.mrf.mxu1  ;;  %v1788_v15 = vunpack.c.l.bf16 %v7388_v57  ;;  %5063 = vtanh.f32 %v1794_v34  ;;  %v6499_v58 = vor.u32 %v4672_v32, %v4392_v25  ;;  %v7391_v32 = vld [vmem:[#allocation52_spill] sm:$0xff] }
 0x495   : > { %3228 = vmatpush.bf16.msra.mxu2 %v2228_v47  ;;  %v2270_v47 = vpack.c.bf16 %v5052_v54, %v5050_v42  ;;  %v5060_v42 = vpop.eup %5059  ;;  %v7390_v54 = vld [vmem:[#allocation56_spill] sm:$0xff]  ;;  %v1780_v7 = vunpack.c.l.bf16 %v7391_v32 }
 0x496   : > { %1497 = vmatmul.bf16.gmra.mxu1 %v5335_v30  ;;  %7389 = vst [vmem:[#allocation63_spill] sm:$0xff] %v6499_v58  ;;  %v1784_v5 = vunpack.c.l.bf16 %v7390_v54  ;;  %5065 = vtanh.f32 %v1788_v15  ;;  %v1786_v30 = vunpack.c.h.bf16 %v7390_v54  ;;  %v2266_v57 = vpack.c.bf16 %v5060_v42, %v5058_v4 }
 0x497   : > { %5067 = vtanh.f32 %v1790_v56  ;;  %v1782_v15 = vunpack.c.h.bf16 %v7391_v32 }
 0x498   : > { %5069 = vtanh.f32 %v1784_v5 }
 0x499   : > { %3229 = vmatpush.bf16.msra.mxu2 %v2226_v60  ;;  %5071 = vtanh.f32 %v1786_v30 }
 0x49a   : > { %v6493_v43 = vpop.f32.mrf.mxu0  ;;  %5073 = vtanh.f32 %v1780_v7 }
 0x49b   : > { %v6496_v60 = vpop.f32.mrf.mxu3  ;;  %5075 = vtanh.f32 %v1782_v15 }
 0x49d   : > { %3230 = vmatpush.bf16.msra.mxu2 %v2224_v13  ;;  %v1460_v13 = vpop.f32.mrf.mxu1 }
 0x49e   : > { %v6504_v29 = vpack.c.bf16 %v1460_v13, %v1458_v41  ;;  %v7392_v13 = vld [vmem:[#allocation48_spill] sm:$0xff] }
 0x49f   : > { %v1776_v3 = vunpack.c.l.bf16 %v7392_v13  ;;  %v1778_v42 = vunpack.c.h.bf16 %v7392_v13 }
 0x4a0   : > { %3143 = vmatmul.bf16.gmra.mxu2 %v6499_v58  ;;  %v5336_v58 = vld [vmem:[#allocation7 + $0x180] sm:$0xff] }
 0x4a1   : > { %3321 = vmatpush.bf16.msrb.mxu2 %v2270_v47  ;;  %v5062_v47 = vpop.eup %5061  ;;  %5077 = vtanh.f32 %v1776_v3 }
 0x4a2   : > { %v5064_v34 = vpop.eup %5063  ;;  %v6506_v25 = vpop.f32.mrf.mxu0  ;;  %5079 = vtanh.f32 %v1778_v42 }
 0x4a3   : > { %v3095_v16 = vpop.f32.mrf.mxu3  ;;  %v5066_v56 = vpop.eup %5065  ;;  %v2264_v54 = vpack.c.bf16 %v5064_v34, %v5062_v47 }
 0x4a4   : > { %v5068_v41 = vpop.eup %5067 }
 0x4a5   : > { %3322 = vmatpush.bf16.msrb.mxu2 %v2268_v48  ;;  %v6511_v48 = vadd.f32 %v3095_v16, %v6363_v59  ;;  %v1463_v4 = vpop.f32.mrf.mxu1  ;;  %v5070_v5 = vpop.eup %5069  ;;  %v2262_v0 = vpack.c.bf16 %v5068_v41, %v5066_v56 }
 0x4a6   : > { %v5072_v32 = vpop.eup %5071  ;;  %1502 = vmatmul.bf16.gmra.mxu1 %v5336_v58 }
 0x4a7   : > { %v5074_v34 = vpop.eup %5073  ;;  %v2260_v7 = vpack.c.bf16 %v5072_v32, %v5070_v5  ;;  %v4456_v5 = vld [vmem:[#allocation9 + $0x118] sm:$0xf] }
 0x4a8   : > { %v5076_v16 = vpop.eup %5075 }
 0x4a9   : > { %3323 = vmatpush.bf16.msrb.mxu2 %v2266_v57  ;;  %v4424_v57 = vld [vmem:[#allocation9 + $0xd8] sm:$0xf]  ;;  %v2258_v41 = vpack.c.bf16 %v5076_v16, %v5074_v34 }
 0x4aa   : > { %v1239_v30 = vpop.f32.mrf.mxu0  ;;  %v6517_v47 = vor.u32 %v4680_v62, %v4424_v57  ;;  %v4688_v57 = vld [vmem:[#allocation9 + $0x134] sm:$0xf0] }
 0x4ab   : > { %v6515_v59 = vpop.f32.mrf.mxu3 }
 0x4ac   : > { %7393 = vst [vmem:[#allocation59_spill] sm:$0xff] %v6515_v59 }
 0x4ad   : > { %3324 = vmatpush.bf16.msrb.mxu2 %v2264_v54  ;;  %7394 = vst [vmem:[#allocation56_spill] sm:$0xff] %v6517_v47  ;;  %v1465_v15 = vpop.f32.mrf.mxu1  ;;  %v5078_v54 = vpop.eup %5077 }
 0x4ae   : > { %v6520_v56 = vpack.c.bf16 %v1465_v15, %v1463_v4  ;;  %v5080_v13 = vpop.eup %5079  ;;  %v6527_v4 = vor.u32 %v4688_v57, %v4456_v5 }
 0x4af   : > { %v2256_v62 = vpack.c.bf16 %v5080_v13, %v5078_v54  ;;  %v4488_v13 = vld [vmem:[#allocation9 + $0x158] sm:$0xf] }
 0x4b0   : > { %3148 = vmatmul.bf16.gmra.mxu2 %v6517_v47  ;;  %7395 = vst [vmem:[#allocation52_spill] sm:$0xff] %v6527_v4 }
 0x4b1   : > { %3325 = vmatpush.bf16.msrb.mxu2 %v2262_v0 }
 0x4b2   : > { %v1241_v58 = vpop.f32.mrf.mxu0 }
 0x4b3   : > { %v3100_v3 = vpop.f32.mrf.mxu3  ;;  %v1705_v33 = vpack.c.bf16 %v1241_v58, %v1239_v30 }
 0x4b4   : > { %v6523_v0 = vadd.f32 %v3100_v3, %v6380_v1  ;;  %v4696_v3 = vld [vmem:[#allocation9 + $0x174] sm:$0xf0] }
 0x4b5   : > { %3326 = vmatpush.bf16.msrb.mxu2 %v2260_v7  ;;  %v1468_v42 = vpop.f32.mrf.mxu1  ;;  %v5337_v7 = vld [vmem:[#allocation7 + $0x188] sm:$0xff]  ;;  %v6537_v5 = vor.u32 %v4696_v3, %v4488_v13  ;;  %v1703_v3 = vpack.c.bf16 %v6506_v25, %v6493_v43 }
 0x4b6   : > { %1507 = vmatmul.bf16.gmra.mxu1 %v5337_v7 }
 0x4b7   : > { %7396 = vst [vmem:[#allocation48_spill] sm:$0xff] %v6537_v5  ;;  %v1951_v58 = vunpack.c.l.bf16 %v1703_v3 }
 0x4b9   : > { %3327 = vmatpush.bf16.msrb.mxu2 %v2258_v41 }
 0x4ba   : > { %v1244_v32 = vpop.f32.mrf.mxu0 }
 0x4bb   : > { %v6525_v47 = vpop.f32.mrf.mxu3 }
 0x4bd   : > { %3328 = vmatpush.bf16.msrb.mxu2 %v2256_v62  ;;  %v1470_v34 = vpop.f32.mrf.mxu1 }
 0x4be   : > { %v6530_v16 = vpack.c.bf16 %v1470_v34, %v1468_v42 }
 0x4c0   : > { %3153 = vmatmul.bf16.gmra.mxu2 %v6527_v4 }
 0x4c2   : > { %v1246_v15 = vpop.f32.mrf.mxu0 }
 0x4c3   : > { %v3105_v1 = vpop.f32.mrf.mxu3  ;;  %v1707_v34 = vpack.c.bf16 %v1246_v15, %v1244_v32  ;;  %v4520_v32 = vld [vmem:[#allocation9 + $0x198] sm:$0xf] }
 0x4c4   : > { %v6533_v54 = vadd.f32 %v3105_v1, %v6395_v31  ;;  %v4704_v15 = vld [vmem:[#allocation9 + $0x1b4] sm:$0xf0] }
 0x4c5   : > { %v1473_v41 = vpop.f32.mrf.mxu1  ;;  %v1959_v50 = vunpack.c.l.bf16 %v1707_v34  ;;  %v1961_v59 = vunpack.c.h.bf16 %v1707_v34  ;;  %v6549_v30 = vor.u32 %v4704_v15, %v4520_v32 }
 0x4c6   : > { %1512 = vmatmul.bf16.gmra.mxu1 %v5338_v21 }
 0x4c7   : > { %7397 = vst [vmem:[#allocation124_spill] sm:$0xff] %v6549_v30 }
 0x4ca   : > { %v1249_v62 = vpop.f32.mrf.mxu0 }
 0x4cb   : > { %v6535_v7 = vpop.f32.mrf.mxu3 }
 0x4cd   : > { %v1475_v57 = vpop.f32.mrf.mxu1 }
 0x4ce   : > { %v6540_v42 = vpack.c.bf16 %v1475_v57, %v1473_v41  ;;  %v1955_v41 = vunpack.c.l.bf16 %v1705_v33  ;;  %v1953_v57 = vunpack.c.h.bf16 %v1703_v3 }
 0x4d0   : > { %3158 = vmatmul.bf16.gmra.mxu2 %v6537_v5 }
 0x4d2   : > { %v1251_v4 = vpop.f32.mrf.mxu0 }
 0x4d3   : > { %v1709_v61 = vpack.c.bf16 %v1251_v4, %v1249_v62  ;;  %v3110_v31 = vpop.f32.mrf.mxu3  ;;  %v1957_v4 = vunpack.c.h.bf16 %v1705_v33  ;;  %v5339_v62 = vld [vmem:[#allocation7 + $0x198] sm:$0xff] }
 0x4d4   : > { %v6543_v1 = vadd.f32 %v3110_v31, %v6409_v39  ;;  %v1949_v31 = vunpack.c.h.bf16 %v6485_v9 }
 0x4d5   : > { %v1963_v6 = vunpack.c.l.bf16 %v1709_v61  ;;  %v1965_v21 = vunpack.c.h.bf16 %v1709_v61  ;;  %v1478_v13 = vpop.f32.mrf.mxu1 }
 0x4d6   : > { %1517 = vmatmul.bf16.gmra.mxu1 %v5339_v62 }
 0x4d7   : > { %5081 = vtanh.f32 %v1963_v6 }
 0x4d8   : > { %5083 = vtanh.f32 %v1965_v21 }
 0x4d9   : > { %5085 = vtanh.f32 %v1959_v50 }
 0x4da   : > { %5087 = vtanh.f32 %v1961_v59  ;;  %v1947_v59 = vunpack.c.l.bf16 %v6485_v9  ;;  %v1939_v9 = vunpack.c.l.bf16 %v6444_v38 }
 0x4db   : > { %v6547_v39 = vpop.f32.mrf.mxu3  ;;  %5089 = vtanh.f32 %v1955_v41 }
 0x4dc   : > { %5091 = vtanh.f32 %v1957_v4  ;;  %v1943_v4 = vunpack.c.l.bf16 %v6464_v8 }
 0x4dd   : > { %v5082_v61 = vpop.eup %5081  ;;  %v1480_v25 = vpop.f32.mrf.mxu1  ;;  %5093 = vtanh.f32 %v1951_v58 }
 0x4de   : > { %v5084_v6 = vpop.eup %5083  ;;  %v6552_v33 = vpack.c.bf16 %v1480_v25, %v1478_v13  ;;  %5095 = vtanh.f32 %v1953_v57  ;;  %v1945_v13 = vunpack.c.h.bf16 %v6464_v8  ;;  %v4552_v57 = vld [vmem:[#allocation9 + $0x1d8] sm:$0xf] }
 0x4df   : > { %v5086_v34 = vpop.eup %5085  ;;  %v2349_v43 = vpack.c.bf16 %v5084_v6, %v5082_v61  ;;  %5097 = vtanh.f32 %v1947_v59 }
 0x4e0   : > { %v5088_v50 = vpop.eup %5087  ;;  %3163 = vmatmul.bf16.gmra.mxu2 %v6549_v30  ;;  %5099 = vtanh.f32 %v1949_v31 }
 0x4e1   : > { %3174 = vmatpush.bf16.msrb.mxu3 %v2349_v43  ;;  %v5090_v21 = vpop.eup %5089  ;;  %v2347_v32 = vpack.c.bf16 %v5088_v50, %v5086_v34  ;;  %5101 = vtanh.f32 %v1943_v4  ;;  %v4712_v34 = vld [vmem:[#allocation9 + $0x1f4] sm:$0xf0]  ;;  %v5340_v43 = vld [vmem:[#allocation7 + $0x1a0] sm:$0xff]  ;;  %v7398_v50 = vld [vmem:[#allocation44_spill] sm:$0xff] }
 0x4e2   : > { %v5092_v3 = vpop.eup %5091  ;;  %5103 = vtanh.f32 %v1945_v13  ;;  %v1772_v59 = vunpack.c.l.bf16 %v7398_v50  ;;  %v1868_v13 = vunpack.c.l.bf16 %v6504_v29 }
 0x4e3   : > { %v3115_v41 = vpop.f32.mrf.mxu3  ;;  %v5094_v62 = vpop.eup %5093  ;;  %v2345_v61 = vpack.c.bf16 %v5092_v3, %v5090_v21  ;;  %v1935_v3 = vunpack.c.l.bf16 %v6422_v28  ;;  %5105 = vtanh.f32 %v1939_v9 }
 0x4e4   : > { %v6557_v15 = vadd.f32 %v3115_v41, %v6425_v22  ;;  %v5096_v6 = vpop.eup %5095  ;;  %v1941_v22 = vunpack.c.h.bf16 %v6444_v38  ;;  %v1774_v41 = vunpack.c.h.bf16 %v7398_v50  ;;  %v1937_v38 = vunpack.c.h.bf16 %v6422_v28 }
 0x4e5   : > { %3175 = vmatpush.bf16.msrb.mxu3 %v2347_v32  ;;  %v1483_v58 = vpop.f32.mrf.mxu1  ;;  %v5098_v25 = vpop.eup %5097  ;;  %v2343_v31 = vpack.c.bf16 %v5096_v6, %v5094_v62  ;;  %v6567_v32 = vor.u32 %v4712_v34, %v4552_v57  ;;  %v1870_v62 = vunpack.c.h.bf16 %v6504_v29  ;;  %v7401_v57 = vld [vmem:[#allocation40_spill] sm:$0xff]  ;;  %v1866_v29 = vunpack.c.h.bf16 %v6482_v52 }
 0x4e6   : > { %1522 = vmatmul.bf16.gmra.mxu1 %v5340_v43  ;;  %v5100_v21 = vpop.eup %5099  ;;  %5107 = vtanh.f32 %v1941_v22  ;;  %v1768_v9 = vunpack.c.l.bf16 %v7401_v57  ;;  %v1770_v28 = vunpack.c.h.bf16 %v7401_v57  ;;  %v1864_v22 = vunpack.c.l.bf16 %v6482_v52 }
 0x4e7   : > { %7400 = vst [vmem:[#allocation125_spill] sm:$0xff] %v6567_v32  ;;  %v5102_v4 = vpop.eup %5101  ;;  %5109 = vtanh.f32 %v1772_v59 }
 0x4e8   : > { %v5104_v30 = vpop.eup %5103  ;;  %5111 = vtanh.f32 %v1774_v41 }
 0x4e9   : > { %3176 = vmatpush.bf16.msrb.mxu3 %v2345_v61  ;;  %v2341_v61 = vpack.c.bf16 %v5100_v21, %v5098_v25  ;;  %5113 = vtanh.f32 %v1935_v3  ;;  %v5106_v34 = vpop.eup %5105  ;;  %v2339_v50 = vpack.c.bf16 %v5104_v30, %v5102_v4  ;;  %v7402_v21 = vld [vmem:[#allocation36_spill] sm:$0xff] }
 0x4ea   : > { %5115 = vtanh.f32 %v1937_v38  ;;  %v1764_v41 = vunpack.c.l.bf16 %v7402_v21  ;;  %v1766_v38 = vunpack.c.h.bf16 %v7402_v21  ;;  %v5341_v21 = vld [vmem:[#allocation7 + $0x1a8] sm:$0xff] }
 0x4eb   : > { %v6564_v8 = vpop.f32.mrf.mxu3  ;;  %5117 = vtanh.f32 %v1868_v13  ;;  %v1860_v13 = vunpack.c.l.bf16 %v6460_v10 }
 0x4ec   : > { %7399 = vst [vmem:[#allocation44_spill] sm:$0xff] %v6564_v8  ;;  %v5108_v59 = vpop.eup %5107  ;;  %5119 = vtanh.f32 %v1870_v62  ;;  %v7403_v62 = vld [vmem:[#allocation32_spill] sm:$0xff] }
 0x4ed   : > { %3177 = vmatpush.bf16.msrb.mxu3 %v2343_v31  ;;  %v1485_v43 = vpop.f32.mrf.mxu1  ;;  %v5110_v31 = vpop.eup %5109  ;;  %5121 = vtanh.f32 %v1768_v9  ;;  %v2337_v30 = vpack.c.bf16 %v5108_v59, %v5106_v34  ;;  %v1760_v57 = vunpack.c.l.bf16 %v7403_v62  ;;  %v4652_v9 = vld [vmem:[#allocation9 + $0x1c] sm:$0xf]  ;;  %v1856_v59 = vunpack.c.l.bf16 %v6440_v19  ;;  %v7405_v8 = vld [vmem:[#allocation28_spill] sm:$0xff] }
 0x4ee   : > { %v6574_v6 = vpack.c.bf16 %v1485_v43, %v1483_v58  ;;  %v5112_v3 = vpop.eup %5111  ;;  %5123 = vtanh.f32 %v1770_v28  ;;  %v1862_v43 = vunpack.c.h.bf16 %v6460_v10  ;;  %v1762_v28 = vunpack.c.h.bf16 %v7403_v62  ;;  %v6589_v34 = vpop.f32.mrf.mxu2 }
 0x4ef   : > { %5125 = vtanh.f32 %v1864_v22  ;;  %7404 = vst [vmem:[#allocation40_spill] sm:$0xff] %v6589_v34  ;;  %v1756_v62 = vunpack.c.l.bf16 %v7405_v8  ;;  %v1758_v34 = vunpack.c.h.bf16 %v7405_v8  ;;  %v7407_v8 = vld [vmem:[#allocation21_spill] sm:$0xff] }
 0x4f0   : > { %3168 = vmatmul.bf16.gmra.mxu2 %v6567_v32  ;;  %5127 = vtanh.f32 %v1866_v29  ;;  %v1858_v32 = vunpack.c.h.bf16 %v6440_v19 }
 0x4f1   : > { %3178 = vmatpush.bf16.msrb.mxu3 %v2341_v61  ;;  %v5114_v61 = vpop.eup %5113  ;;  %5129 = vtanh.f32 %v1764_v41  ;;  %v2254_v41 = vpack.c.bf16 %v5112_v3, %v5110_v31  ;;  %v1854_v31 = vunpack.c.h.bf16 %v6418_v11  ;;  %v7406_v3 = vld [vmem:[#allocation15_spill] sm:$0xff] }
 0x4f2   : > { %v5116_v52 = vpop.eup %5115  ;;  %5131 = vtanh.f32 %v1766_v38 }
 0x4f3   : > { %v3120_v25 = vpop.f32.mrf.mxu3  ;;  %5133 = vtanh.f32 %v1860_v13  ;;  %v2335_v10 = vpack.c.bf16 %v5116_v52, %v5114_v61  ;;  %v1852_v61 = vunpack.c.l.bf16 %v6418_v11 }
 0x4f4   : > { %v6581_v58 = vadd.f32 %v3120_v25, %v6447_v12  ;;  %v5118_v12 = vpop.eup %5117  ;;  %v4330_v25 = vld [vmem:[#allocation9 + $0x38] sm:$0xf0]  ;;  %5135 = vtanh.f32 %v1862_v43 }
 0x4f5   : > { %3179 = vmatpush.bf16.msrb.mxu3 %v2339_v50  ;;  %v1488_v4 = vpop.f32.mrf.mxu1  ;;  %v5120_v50 = vpop.eup %5119  ;;  %5137 = vtanh.f32 %v1760_v57 }
 0x4f6   : > { %1527 = vmatmul.bf16.gmra.mxu1 %v5341_v21  ;;  %v5122_v22 = vpop.eup %5121  ;;  %v2302_v38 = vpack.c.bf16 %v5120_v50, %v5118_v12  ;;  %5139 = vtanh.f32 %v1762_v28  ;;  %v7408_v28 = vld [vmem:[#allocation25_spill] sm:$0xff] }
 0x4f7   : > { %v5124_v29 = vpop.eup %5123  ;;  %5141 = vtanh.f32 %v1856_v59  ;;  %v1752_v59 = vunpack.c.l.bf16 %v7408_v28 }
 0x4f8   : > { %v5126_v5 = vpop.eup %5125  ;;  %5143 = vtanh.f32 %v1858_v32  ;;  %v2252_v43 = vpack.c.bf16 %v5124_v29, %v5122_v22  ;;  %v1754_v32 = vunpack.c.h.bf16 %v7408_v28  ;;  %v7409_v22 = vld [vmem:[#allocation23_spill] sm:$0xff]  ;;  %v1846_v28 = vunpack.c.h.bf16 %v6391_v49 }
 0x4f9   : > { %3180 = vmatpush.bf16.msrb.mxu3 %v2337_v30  ;;  %v6593_v30 = vor.u32 %v4652_v9, %v4330_v25  ;;  %v5128_v21 = vpop.eup %5127  ;;  %v1744_v9 = vunpack.c.l.bf16 %v7407_v8  ;;  %5145 = vtanh.f32 %v1756_v62 }
 0x4fa   : > { %v5130_v13 = vpop.eup %5129  ;;  %v2300_v25 = vpack.c.bf16 %v5128_v21, %v5126_v5  ;;  %5147 = vtanh.f32 %v1758_v34  ;;  %v1848_v5 = vunpack.c.l.bf16 %v6404_v55 }
 0x4fb   : > { %v5132_v52 = vpop.eup %5131  ;;  %5149 = vtanh.f32 %v1852_v61 }
 0x4fc   : > { %v5134_v57 = vpop.eup %5133  ;;  %5151 = vtanh.f32 %v1854_v31  ;;  %v2250_v62 = vpack.c.bf16 %v5132_v52, %v5130_v13 }
 0x4fd   : > { %3181 = vmatpush.bf16.msrb.mxu3 %v2335_v10  ;;  %v1490_v19 = vpop.f32.mrf.mxu1  ;;  %v5136_v50 = vpop.eup %5135  ;;  %5153 = vtanh.f32 %v1744_v9  ;;  %v1844_v9 = vunpack.c.l.bf16 %v6391_v49  ;;  %v1840_v49 = vunpack.c.l.bf16 %v6376_v37 }
 0x4fe   : > { %v6601_v12 = vpack.c.bf16 %v1490_v19, %v1488_v4  ;;  %v5138_v11 = vpop.eup %5137  ;;  %v1748_v4 = vunpack.c.l.bf16 %v7409_v22  ;;  %v2298_v34 = vpack.c.bf16 %v5136_v50, %v5134_v57  ;;  %5155 = vtanh.f32 %v1752_v59  ;;  %v4362_v50 = vld [vmem:[#allocation9 + $0x78] sm:$0xf0]  ;;  %v5342_v59 = vld [vmem:[#allocation7 + $0x1b0] sm:$0xff] }
 0x4ff   : > { %v1850_v19 = vunpack.c.h.bf16 %v6404_v55  ;;  %5157 = vtanh.f32 %v1754_v32 }
 0x500   : > { %3182 = vmatmul.bf16.vlgmr.msrb.gmra.mxu3 %v6593_v30  ;;  %3231 = vmatmul.bf16.vlgmr.msra.gmra.mxu2 %v7406_v3  ;;  %v1750_v3 = vunpack.c.h.bf16 %v7409_v22  ;;  %5159 = vtanh.f32 %v1748_v4 }
 0x501   : > { %3272 = vmatpush.bf16.msra.mxu3 %v2254_v41  ;;  %3419 = vmatpush.bf16.msra.mxu2 %v2302_v38  ;;  %v5140_v41 = vpop.eup %5139  ;;  %5161 = vtanh.f32 %v1848_v5 }
 0x502   : > { %v5142_v38 = vpop.eup %5141  ;;  %v2248_v13 = vpack.c.bf16 %v5140_v41, %v5138_v11  ;;  %5163 = vtanh.f32 %v1850_v19  ;;  %v1838_v41 = vunpack.c.h.bf16 %v6359_v23  ;;  %v1832_v19 = vunpack.c.l.bf16 %v6334_v45 }
 0x503   : > { %v3134_v10 = vpop.f32.mrf.mxu2  ;;  %v5144_v21 = vpop.eup %5143  ;;  %5165 = vtanh.f32 %v1750_v3 }
 0x504   : > { %v6608_v29 = vadd.f32 %v3134_v10, %v6467_v44  ;;  %v5146_v61 = vpop.eup %5145  ;;  %v1746_v44 = vunpack.c.h.bf16 %v7407_v8  ;;  %v2296_v57 = vpack.c.bf16 %v5144_v21, %v5142_v38  ;;  %v1836_v8 = vunpack.c.l.bf16 %v6359_v23 }
 0x505   : > { %3273 = vmatpush.bf16.msra.mxu3 %v2252_v43  ;;  %3420 = vmatpush.bf16.msra.mxu2 %v2300_v25  ;;  %v1493_v31 = vpop.f32.mrf.mxu1  ;;  %v5148_v43 = vpop.eup %5147  ;;  %v4660_v25 = vld [vmem:[#allocation9 + $0x5c] sm:$0xf] }
 0x506   : > { %v5150_v52 = vpop.eup %5149  ;;  %1532 = vmatmul.bf16.gmra.mxu1 %v5342_v59  ;;  %5167 = vtanh.f32 %v1746_v44  ;;  %v2246_v22 = vpack.c.bf16 %v5148_v43, %v5146_v61  ;;  %v6622_v4 = vor.u32 %v4660_v25, %v4362_v50  ;;  %v1834_v61 = vunpack.c.h.bf16 %v6334_v45  ;;  %v7410_v43 = vld [vmem:[#allocation16_spill] sm:$0xff] }
 0x507   : > { %v5152_v55 = vpop.eup %5151  ;;  %5169 = vtanh.f32 %v1844_v9 }
 0x508   : > { %v6616_v32 = vpop.eup %5153  ;;  %v2294_v38 = vpack.c.bf16 %v5152_v55, %v5150_v52  ;;  %5171 = vtanh.f32 %v1846_v28  ;;  %v1830_v55 = vunpack.c.h.bf16 %v6308_v2 }
 0x509   : > { %3274 = vmatpush.bf16.msra.mxu3 %v2250_v62  ;;  %3421 = vmatpush.bf16.msra.mxu2 %v2298_v34  ;;  %v5156_v10 = vpop.eup %5155  ;;  %v1842_v34 = vunpack.c.h.bf16 %v6376_v37  ;;  %5173 = vtanh.f32 %v1836_v8 }
 0x50a   : > { %v5158_v62 = vpop.eup %5157  ;;  %5175 = vtanh.f32 %v1838_v41  ;;  %v1824_v41 = vunpack.c.l.bf16 %v6284_v14 }
 0x50b   : > { %v6619_v11 = vpop.f32.mrf.mxu2  ;;  %v5160_v5 = vpop.eup %5159  ;;  %v2244_v44 = vpack.c.bf16 %v5158_v62, %v5156_v10  ;;  %5177 = vtanh.f32 %v1840_v49 }
 0x50c   : > { %v5162_v21 = vpop.eup %5161  ;;  %5179 = vtanh.f32 %v1842_v34 }
 0x50d   : > { %3275 = vmatpush.bf16.msra.mxu3 %v2248_v13  ;;  %3422 = vmatpush.bf16.msra.mxu2 %v2296_v57  ;;  %v1495_v3 = vpop.f32.mrf.mxu1  ;;  %v5164_v23 = vpop.eup %5163  ;;  %v1828_v57 = vunpack.c.l.bf16 %v6308_v2  ;;  %5181 = vtanh.f32 %v1832_v19 }
 0x50e   : > { %v6630_v13 = vpack.c.bf16 %v1495_v3, %v1493_v31  ;;  %v5166_v52 = vpop.eup %5165  ;;  %v2292_v45 = vpack.c.bf16 %v5164_v23, %v5162_v21  ;;  %5183 = vtanh.f32 %v1834_v61  ;;  %v4394_v21 = vld [vmem:[#allocation9 + $0xb8] sm:$0xf0]  ;;  %v1820_v23 = vunpack.c.l.bf16 %v6259_v18 }
 0x50f   : > { %v5168_v37 = vpop.eup %5167  ;;  %v2242_v31 = vpack.c.bf16 %v5166_v52, %v5160_v5  ;;  %5185 = vtanh.f32 %v1828_v57  ;;  %v4668_v5 = vld [vmem:[#allocation9 + $0x9c] sm:$0xf] }
 0x510   : > { %3187 = vmatmul.bf16.gmra.mxu3 %v6622_v4  ;;  %3236 = vmatmul.bf16.gmra.mxu2 %v7410_v43  ;;  %v5170_v9 = vpop.eup %5169  ;;  %5187 = vtanh.f32 %v1830_v55  ;;  %v2240_v2 = vpack.c.bf16 %v5168_v37, %v6616_v32  ;;  %v5343_v3 = vld [vmem:[#allocation7 + $0x1b8] sm:$0xff]  ;;  %v6644_v32 = vor.u32 %v4668_v5, %v4394_v21 }
 0x511   : > { %3276 = vmatpush.bf16.msra.mxu3 %v2246_v22  ;;  %3423 = vmatpush.bf16.msra.mxu2 %v2294_v38  ;;  %v5172_v50 = vpop.eup %5171  ;;  %v1826_v38 = vunpack.c.h.bf16 %v6284_v14  ;;  %5189 = vtanh.f32 %v1824_v41  ;;  %v1822_v14 = vunpack.c.h.bf16 %v6259_v18 }
 0x512   : > { %v5174_v59 = vpop.eup %5173  ;;  %v2290_v22 = vpack.c.bf16 %v5172_v50, %v5170_v9  ;;  %v1816_v9 = vunpack.c.l.bf16 %v6242_v35 }
 0x513   : > { %v3139_v25 = vpop.f32.mrf.mxu2  ;;  %v5176_v8 = vpop.eup %5175  ;;  %5191 = vtanh.f32 %v1826_v38 }
 0x514   : > { %v6635_v28 = vadd.f32 %v3139_v25, %v6489_v40  ;;  %v5178_v10 = vpop.eup %5177  ;;  %v2286_v40 = vpack.c.bf16 %v5176_v8, %v5174_v59  ;;  %5193 = vtanh.f32 %v1820_v23  ;;  %v1818_v25 = vunpack.c.h.bf16 %v6242_v35  ;;  %v7412_v59 = vld [vmem:[#allocation85_spill] sm:$0xff] }
 0x515   : > { %3277 = vmatpush.bf16.msra.mxu3 %v2244_v44  ;;  %3424 = vmatpush.bf16.msra.mxu2 %v2292_v45  ;;  %v1498_v62 = vpop.f32.mrf.mxu1  ;;  %v5180_v49 = vpop.eup %5179  ;;  %5195 = vtanh.f32 %v1822_v14  ;;  %v7411_v45 = vld [vmem:[#allocation17_spill] sm:$0xff]  ;;  %v1812_v8 = vunpack.c.l.bf16 %v7412_v59  ;;  %v1814_v41 = vunpack.c.h.bf16 %v7412_v59  ;;  %v5344_v14 = vld [vmem:[#allocation7 + $0x1c0] sm:$0xff] }
 0x516   : > { %v5182_v34 = vpop.eup %5181  ;;  %1537 = vmatmul.bf16.gmra.mxu1 %v5343_v3  ;;  %v2288_v43 = vpack.c.bf16 %v5180_v49, %v5178_v10  ;;  %5197 = vtanh.f32 %v1816_v9  ;;  %v4426_v3 = vld [vmem:[#allocation9 + $0xf8] sm:$0xf0] }
 0x517   : > { %v5184_v19 = vpop.eup %5183  ;;  %5199 = vtanh.f32 %v1818_v25  ;;  %v7416_v25 = vld [vmem:[#allocation72_spill] sm:$0xff] }
 0x518   : > { %v5186_v44 = vpop.eup %5185  ;;  %v2284_v52 = vpack.c.bf16 %v5184_v19, %v5182_v34  ;;  %5201 = vtanh.f32 %v1812_v8  ;;  %v4676_v19 = vld [vmem:[#allocation9 + $0xdc] sm:$0xf] }
 0x519   : > { %3278 = vmatpush.bf16.msra.mxu3 %v2242_v31  ;;  %3425 = vmatpush.bf16.msra.mxu2 %v2290_v22  ;;  %v5188_v37 = vpop.eup %5187  ;;  %5203 = vtanh.f32 %v1814_v41  ;;  %v7418_v41 = vld [vmem:[#allocation74_spill] sm:$0xff] }
 0x51a   : > { %v5190_v50 = vpop.eup %5189  ;;  %v2282_v55 = vpack.c.bf16 %v5188_v37, %v5186_v44 }
 0x51b   : > { %v6641_v61 = vpop.f32.mrf.mxu2  ;;  %v5192_v31 = vpop.eup %5191 }
 0x51c   : > { %v5194_v22 = vpop.eup %5193  ;;  %v2280_v49 = vpack.c.bf16 %v5192_v31, %v5190_v50 }
 0x51d   : > { %3279 = vmatpush.bf16.msra.mxu3 %v2240_v2  ;;  %3426 = vmatpush.bf16.msra.mxu2 %v2288_v43  ;;  %v1500_v57 = vpop.f32.mrf.mxu1  ;;  %v5196_v38 = vpop.eup %5195  ;;  %v7413_v2 = vld [vmem:[#allocation80_spill] sm:$0xff]  ;;  %v7414_v43 = vld [vmem:[#allocation42_spill] sm:$0xff] }
 0x51e   : > { %v6650_v18 = vpack.c.bf16 %v1500_v57, %v1498_v62  ;;  %v1808_v62 = vunpack.c.l.bf16 %v7413_v2  ;;  %v5198_v5 = vpop.eup %5197  ;;  %v2278_v21 = vpack.c.bf16 %v5196_v38, %v5194_v22 }
 0x51f   : > { %v5200_v23 = vpop.eup %5199 }
 0x520   : > { %3192 = vmatmul.bf16.gmra.mxu3 %v6644_v32  ;;  %3241 = vmatmul.bf16.gmra.mxu2 %v7411_v45  ;;  %5205 = vtanh.f32 %v1808_v62  ;;  %v5202_v37 = vpop.eup %5201  ;;  %v2276_v9 = vpack.c.bf16 %v5200_v23, %v5198_v5 }
 0x521   : > { %3370 = vmatpush.bf16.msrb.mxu3 %v2286_v40  ;;  %v1810_v40 = vunpack.c.h.bf16 %v7413_v2  ;;  %v5204_v57 = vpop.eup %5203 }
 0x522   : > { %v2274_v8 = vpack.c.bf16 %v5204_v57, %v5202_v37  ;;  %v4490_v57 = vld [vmem:[#allocation9 + $0x178] sm:$0xf0] }
 0x523   : > { %v3144_v10 = vpop.f32.mrf.mxu2  ;;  %5207 = vtanh.f32 %v1810_v40 }
 0x524   : > { %v6655_v35 = vadd.f32 %v3144_v10, %v6511_v48  ;;  %v2858_v48 = vadd.f32 %v7414_v43, %v6297_v36 }
 0x525   : > { %3371 = vmatpush.bf16.msrb.mxu3 %v2284_v52  ;;  %v1503_v34 = vpop.f32.mrf.mxu1  ;;  %v6663_v52 = vor.u32 %v4676_v19, %v4426_v3  ;;  %v5345_v3 = vld [vmem:[#allocation7 + $0x1c8] sm:$0xff] }
 0x526   : > { %1542 = vmatmul.bf16.gmra.mxu1 %v5344_v14  ;;  %v2907_v45 = vadd.f32 %v7416_v25, %v2858_v48  ;;  %v5206_v59 = vpop.eup %5205  ;;  %v7420_v14 = vld [vmem:[#allocation19_spill] sm:$0xff]  ;;  %v5346_v25 = vld [vmem:[#allocation7 + $0x1d0] sm:$0xff] }
 0x527   : > { %7415 = vst [vmem:[#allocation36_spill] sm:$0xff] %v6663_v52 }
 0x528   : > { %v2956_v22 = vadd.f32 %v7418_v41, %v2907_v45 }
 0x529   : > { %3372 = vmatpush.bf16.msrb.mxu3 %v2282_v55  ;;  %v7417_v55 = vld [vmem:[#allocation18_spill] sm:$0xff]  ;;  %v5208_v10 = vpop.eup %5207 }
 0x52a   : > { %v2272_v2 = vpack.c.bf16 %v5208_v10, %v5206_v59  ;;  %v3005_v62 = vadd.f32 %v6346_v26, %v2956_v22  ;;  %v7422_v59 = vld [vmem:[#allocation20_spill] sm:$0xff]  ;;  %v4700_v22 = vld [vmem:[#allocation9 + $0x19c] sm:$0xf] }
 0x52b   : > { %v6661_v44 = vpop.f32.mrf.mxu2 }
 0x52c   : > { %v3054_v5 = vadd.f32 %v6385_v17, %v3005_v62 }
 0x52d   : > { %3373 = vmatpush.bf16.msrb.mxu3 %v2280_v49  ;;  %v1505_v50 = vpop.f32.mrf.mxu1 }
 0x52e   : > { %v6668_v31 = vpack.c.bf16 %v1505_v50, %v1503_v34  ;;  %v4458_v34 = vld [vmem:[#allocation9 + $0x138] sm:$0xf0]  ;;  %v3103_v19 = vadd.f32 %v6525_v47, %v3054_v5 }
 0x52f   : > { %v4692_v47 = vld [vmem:[#allocation9 + $0x15c] sm:$0xf] }
 0x530   : > { %3197 = vmatmul.bf16.gmra.mxu3 %v6663_v52  ;;  %3246 = vmatmul.bf16.gmra.mxu2 %v7417_v55  ;;  %v6690_v50 = vor.u32 %v4692_v47, %v4490_v57  ;;  %v1900_v47 = vunpack.c.l.bf16 %v6650_v18  ;;  %v7436_v52 = vld [vmem:[#allocation31_spill] sm:$0xff] }
 0x531   : > { %3374 = vmatpush.bf16.msrb.mxu3 %v2278_v21  ;;  %v4684_v21 = vld [vmem:[#allocation9 + $0x11c] sm:$0xf] }
 0x532   : > { %v6679_v48 = vor.u32 %v4684_v21, %v4458_v34  ;;  %7421 = vst [vmem:[#allocation28_spill] sm:$0xff] %v6690_v50  ;;  %v7424_v21 = vld [vmem:[#allocation22_spill] sm:$0xff]  ;;  %5209 = vtanh.f32 %v1900_v47  ;;  %v7428_v47 = vld [vmem:[#allocation60_spill] sm:$0xff] }
 0x533   : > { %v3149_v49 = vpop.f32.mrf.mxu2 }
 0x534   : > { %v6672_v38 = vadd.f32 %v3149_v49, %v6523_v0  ;;  %7419 = vst [vmem:[#allocation32_spill] sm:$0xff] %v6679_v48  ;;  %v4522_v49 = vld [vmem:[#allocation9 + $0x1b8] sm:$0xf0] }
 0x535   : > { %3375 = vmatpush.bf16.msrb.mxu3 %v2276_v9  ;;  %v1508_v40 = vpop.f32.mrf.mxu1 }
 0x536   : > { %1547 = vmatmul.bf16.gmra.mxu1 %v5345_v3 }
 0x539   : > { %3376 = vmatpush.bf16.msrb.mxu3 %v2274_v8 }
 0x53b   : > { %v3151_v23 = vpop.f32.mrf.mxu2 }
 0x53c   : > { %v6677_v43 = vadd.f32 %v3151_v23, %v3103_v19  ;;  %v4708_v23 = vld [vmem:[#allocation9 + $0x1dc] sm:$0xf] }
 0x53d   : > { %3377 = vmatpush.bf16.msrb.mxu3 %v2272_v2  ;;  %v1510_v0 = vpop.f32.mrf.mxu1  ;;  %v5347_v2 = vld [vmem:[#allocation7 + $0x1d8] sm:$0xff] }
 0x53e   : > { %v6683_v26 = vpack.c.bf16 %v1510_v0, %v1508_v40  ;;  %v6701_v40 = vor.u32 %v4700_v22, %v4522_v49  ;;  %v4554_v0 = vld [vmem:[#allocation9 + $0x1f8] sm:$0xf0]  ;;  %v6727_v22 = vpop.permute.xlu0 %2438  ;;  %v1892_v49 = vunpack.c.l.bf16 %v6601_v12 }
 0x540   : > { %3202 = vmatmul.bf16.gmra.mxu3 %v6679_v48  ;;  %3251 = vmatmul.bf16.gmra.mxu2 %v7420_v14  ;;  %7423 = vst [vmem:[#allocation15_spill] sm:$0xff] %v6701_v40  ;;  %v5348_v14 = vld [vmem:[#allocation7 + $0x1e0] sm:$0xff]  ;;  %v7435_v48 = vld [vmem:[#allocation29_spill] sm:$0xff] }
 0x543   : > { %v3154_v37 = vpop.f32.mrf.mxu2 }
 0x544   : > { %v6686_v17 = vadd.f32 %v3154_v37, %v6533_v54 }
 0x545   : > { %v1513_v9 = vpop.f32.mrf.mxu1 }
 0x546   : > { %1552 = vmatmul.bf16.gmra.mxu1 %v5346_v25  ;;  %v1902_v25 = vunpack.c.h.bf16 %v6650_v18 }
 0x548   : > { %5211 = vtanh.f32 %v1902_v25 }
 0x54b   : > { %v6688_v45 = vpop.f32.mrf.mxu2 }
 0x54d   : > { %v1515_v55 = vpop.f32.mrf.mxu1 }
 0x54e   : > { %v6694_v8 = vpack.c.bf16 %v1515_v55, %v1513_v9  ;;  %v6714_v9 = vor.u32 %v4708_v23, %v4554_v0  ;;  %v1896_v55 = vunpack.c.l.bf16 %v6630_v13  ;;  %v6735_v0 = vpop.f32.mrf.mxu3 }
 0x550   : > { %3207 = vmatmul.bf16.gmra.mxu3 %v6690_v50  ;;  %3256 = vmatmul.bf16.gmra.mxu2 %v7422_v59  ;;  %7425 = vst [vmem:[#allocation21_spill] sm:$0xff] %v6714_v9  ;;  %5213 = vtanh.f32 %v1896_v55  ;;  %v7431_v50 = vld [vmem:[#allocation27_spill] sm:$0xff] }
 0x553   : > { %v3159_v10 = vpop.f32.mrf.mxu2 }
 0x554   : > { %v6697_v54 = vadd.f32 %v3159_v10, %v6543_v1  ;;  %v1898_v10 = vunpack.c.h.bf16 %v6630_v13  ;;  %v5349_v13 = vld [vmem:[#allocation7 + $0x1e8] sm:$0xff] }
 0x555   : > { %v1518_v41 = vpop.f32.mrf.mxu1 }
 0x556   : > { %1557 = vmatmul.bf16.gmra.mxu1 %v5347_v2  ;;  %v7427_v2 = vld [vmem:[#allocation30_spill] sm:$0xff]  ;;  %5215 = vtanh.f32 %v1898_v10  ;;  %v1884_v10 = vunpack.c.l.bf16 %v6552_v33 }
 0x557   : > { %5217 = vtanh.f32 %v1892_v49  ;;  %v7430_v49 = vld [vmem:[#allocation26_spill] sm:$0xff] }
 0x55b   : > { %v6699_v62 = vpop.f32.mrf.mxu2 }
 0x55d   : > { %v1520_v5 = vpop.f32.mrf.mxu1 }
 0x55e   : > { %v6705_v34 = vpack.c.bf16 %v1520_v5, %v1518_v41  ;;  %v2843_v5 = vadd.f32 %v7427_v2, %v6727_v22 }
 0x560   : > { %3212 = vmatmul.bf16.gmra.mxu3 %v6701_v40  ;;  %3261 = vmatmul.bf16.gmra.mxu2 %v7424_v21  ;;  %v1894_v21 = vunpack.c.h.bf16 %v6601_v12  ;;  %v2892_v25 = vadd.f32 %v7428_v47, %v2843_v5  ;;  %v1886_v40 = vunpack.c.h.bf16 %v6552_v33  ;;  %v6753_v33 = vpop.permute.xlu1 %2448 }
 0x562   : > { %5219 = vtanh.f32 %v1894_v21 }
 0x563   : > { %v3164_v19 = vpop.f32.mrf.mxu2 }
 0x564   : > { %v6708_v1 = vadd.f32 %v3164_v19, %v6557_v15  ;;  %v7426_v15 = vld [vmem:[#allocation24_spill] sm:$0xff]  ;;  %v5210_v19 = vpop.eup %5209 }
 0x565   : > { %v6710_v3 = vpop.f32.mrf.mxu1  ;;  %v5212_v23 = vpop.eup %5211 }
 0x566   : > { %1562 = vmatmul.bf16.gmra.mxu1 %v5348_v14  ;;  %v5214_v55 = vpop.eup %5213 }
 0x567   : > { %v5216_v12 = vpop.eup %5215 }
 0x568   : > { %v5218_v5 = vpop.eup %5217 }
 0x569   : > { %v5220_v21 = vpop.eup %5219 }
 0x56b   : > { %v6712_v37 = vpop.f32.mrf.mxu2 }
 0x56d   : > { %v6717_v57 = vpop.f32.mrf.mxu1 }
 0x570   : > { %3217 = vmatmul.bf16.gmra.mxu3 %v6714_v9  ;;  %3266 = vmatmul.bf16.gmra.mxu2 %v7426_v15  ;;  %v1890_v15 = vunpack.c.h.bf16 %v6574_v6 }
 0x573   : > { %v3169_v59 = vpop.f32.mrf.mxu2 }
 0x574   : > { %v6725_v41 = vadd.f32 %v3169_v59, %v6581_v58  ;;  %v1888_v58 = vunpack.c.l.bf16 %v6574_v6  ;;  %v2318_v59 = vpack.c.bf16 %v5212_v23, %v5210_v19  ;;  %v2316_v6 = vpack.c.bf16 %v5216_v12, %v5214_v55 }
 0x575   : > { %v6730_v18 = vpop.f32.mrf.mxu1 }
 0x576   : > { %1567 = vmatmul.bf16.gmra.mxu1 %v5349_v13  ;;  %5221 = vtanh.f32 %v1888_v58  ;;  %v7429_v13 = vld [vmem:[#allocation62_spill] sm:$0xff] }
 0x577   : > { %v2941_v9 = vadd.f32 %v7429_v13, %v2892_v25  ;;  %5223 = vtanh.f32 %v1890_v15  ;;  %v1880_v15 = vunpack.c.l.bf16 %v6540_v42 }
 0x578   : > { %5225 = vtanh.f32 %v1884_v10  ;;  %v7432_v10 = vld [vmem:[#allocation34_spill] sm:$0xff] }
 0x579   : > { %v2990_v58 = vadd.f32 %v6271_v53, %v2941_v9  ;;  %5227 = vtanh.f32 %v1886_v40  ;;  %v2848_v53 = vadd.f32 %v7432_v10, %v6753_v33  ;;  %v1876_v9 = vunpack.c.l.bf16 %v6530_v16 }
 0x57a   : > { %5229 = vtanh.f32 %v1880_v15 }
 0x57b   : > { %v6738_v14 = vpop.f32.mrf.mxu2  ;;  %v3039_v55 = vadd.f32 %v6326_v27, %v2990_v58  ;;  %v7433_v58 = vld [vmem:[#allocation64_spill] sm:$0xff] }
 0x57c   : > { %v5222_v25 = vpop.eup %5221  ;;  %v2897_v10 = vadd.f32 %v7433_v58, %v2848_v53 }
 0x57d   : > { %v6743_v2 = vpop.f32.mrf.mxu1  ;;  %v5224_v13 = vpop.eup %5223  ;;  %v3088_v40 = vadd.f32 %v6474_v46, %v3039_v55  ;;  %v1872_v55 = vunpack.c.l.bf16 %v6520_v56 }
 0x57f   : > { %v3137_v27 = vadd.f32 %v6619_v11, %v3088_v40  ;;  %v7434_v40 = vld [vmem:[#allocation66_spill] sm:$0xff] }
 0x580   : > { %3280 = vmatmul.bf16.vlgmr.msra.gmra.mxu3 %v7430_v49  ;;  %3329 = vmatmul.bf16.vlgmr.msrb.gmra.mxu2 %v7431_v50  ;;  %v2314_v50 = vpack.c.bf16 %v5220_v21, %v5218_v5  ;;  %v2312_v49 = vpack.c.bf16 %v5224_v13, %v5222_v25  ;;  %v1878_v5 = vunpack.c.h.bf16 %v6530_v16  ;;  %v1874_v25 = vunpack.c.h.bf16 %v6520_v56 }
 0x581   : > { %3468 = vmatpush.bf16.msra.mxu3 %v2318_v59  ;;  %v1882_v59 = vunpack.c.h.bf16 %v6540_v42  ;;  %v5350_v42 = vld [vmem:[#allocation7 + $0x1f0] sm:$0xff] }
 0x583   : > { %v3183_v19 = vpop.f32.mrf.mxu3  ;;  %v6749_v23 = vpop.f32.mrf.mxu2  ;;  %5231 = vtanh.f32 %v1882_v59 }
 0x584   : > { %v3184_v47 = vadd.f32 %v3183_v19, %v6608_v29  ;;  %v5226_v29 = vpop.eup %5225  ;;  %5233 = vtanh.f32 %v1876_v9 }
 0x585   : > { %3469 = vmatpush.bf16.msra.mxu3 %v2316_v6  ;;  %v6758_v12 = vpop.f32.mrf.mxu1  ;;  %v5228_v6 = vpop.eup %5227  ;;  %5235 = vtanh.f32 %v1878_v5 }
 0x586   : > { %1572 = vmatmul.bf16.gmra.mxu1 %v5350_v42  ;;  %v2310_v15 = vpack.c.bf16 %v5228_v6, %v5226_v29  ;;  %v3615_v16 = vmax.f32 %v3184_v47, 0.0  ;;  %v5230_v13 = vpop.eup %5229  ;;  %v2946_v42 = vadd.f32 %v7434_v40, %v2897_v10  ;;  %5237 = vtanh.f32 %v1872_v55  ;;  %v7437_v10 = vld [vmem:[#allocation97_spill] sm:$0xff] }
 0x587   : > { %5239 = vtanh.f32 %v1874_v25 }
 0x588   : > { %v2995_v6 = vadd.f32 %v6294_v51, %v2946_v42 }
 0x589   : > { %3470 = vmatpush.bf16.msra.mxu3 %v2314_v50  ;;  %v5232_v59 = vpop.eup %5231 }
 0x58a   : > { %v5234_v29 = vpop.eup %5233  ;;  %v2308_v56 = vpack.c.bf16 %v5232_v59, %v5230_v13  ;;  %v7439_v13 = vld [vmem:[#allocation68_spill] sm:$0xff] }
 0x58b   : > { %v3185_v21 = vpop.f32.mrf.mxu3  ;;  %v6766_v19 = vpop.f32.mrf.mxu2 }
 0x58c   : > { %v3186_v46 = vadd.f32 %v3185_v21, %v3137_v27  ;;  %v5236_v47 = vpop.eup %5235 }
 0x58d   : > { %3471 = vmatpush.bf16.msra.mxu3 %v2312_v49  ;;  %v1535_v11 = vpop.f32.mrf.mxu1  ;;  %v5238_v27 = vpop.eup %5237 }
 0x58e   : > { %v3617_v50 = vmax.f32 %v3186_v46, 0.0  ;;  %v5240_v58 = vpop.eup %5239  ;;  %v7438_v46 = vld [vmem:[#allocation38_spill] sm:$0xff] }
 0x58f   : > { %v2853_v55 = vadd.f32 %v7438_v46, %v7437_v10 }
 0x590   : > { %3285 = vmatmul.bf16.gmra.mxu3 %v7435_v48  ;;  %3334 = vmatmul.bf16.gmra.mxu2 %v7436_v52  ;;  %v6774_v53 = vpack.c.bf16 %v3617_v50, %v3615_v16  ;;  %v3044_v48 = vadd.f32 %v6352_v20, %v2995_v6  ;;  %v2306_v52 = vpack.c.bf16 %v5236_v47, %v5234_v29  ;;  %v5351_v16 = vld [vmem:[#allocation7 + $0x1f8] sm:$0xff] }
 0x591   : > { %3472 = vmatpush.bf16.msra.mxu3 %v2310_v15  ;;  %v2304_v50 = vpack.c.bf16 %v5240_v58, %v5238_v27  ;;  %v2902_v20 = vadd.f32 %v7439_v13, %v2853_v55  ;;  %v1692_v29 = vpack.c.bf16 %v1535_v11, %v6758_v12  ;;  %v7441_v47 = vld [vmem:[#allocation33_spill] sm:$0xff]  ;;  %v1690_v27 = vpack.c.bf16 %v6743_v2, %v6730_v18 }
 0x592   : > { %v3093_v15 = vadd.f32 %v6496_v60, %v3044_v48 }
 0x593   : > { %v3188_v9 = vpop.f32.mrf.mxu3  ;;  %v6776_v49 = vpop.f32.mrf.mxu2  ;;  %v1930_v12 = vunpack.c.h.bf16 %v1692_v29  ;;  %v1926_v18 = vunpack.c.h.bf16 %v1690_v27 }
 0x594   : > { %v3189_v5 = vadd.f32 %v3188_v9, %v6635_v28  ;;  %v3142_v25 = vadd.f32 %v6641_v61, %v3093_v15  ;;  %v7442_v61 = vld [vmem:[#allocation35_spill] sm:$0xff]  ;;  %v1688_v15 = vpack.c.bf16 %v6717_v57, %v6710_v3 }
 0x595   : > { %3473 = vmatpush.bf16.msra.mxu3 %v2308_v56  ;;  %v1538_v21 = vpop.f32.mrf.mxu1  ;;  %v7440_v56 = vld [vmem:[#allocation70_spill] sm:$0xff] }
 0x596   : > { %1577 = vmatmul.bf16.gmra.mxu1 %v5351_v16  ;;  %v3619_v40 = vmax.f32 %v3189_v5, 0.0  ;;  %v2951_v60 = vadd.f32 %v7440_v56, %v2902_v20  ;;  %v1924_v16 = vunpack.c.l.bf16 %v1690_v27  ;;  %v1920_v13 = vunpack.c.l.bf16 %v1688_v15  ;;  %v7445_v27 = vld [vmem:[#allocation39_spill] sm:$0xff] }
 0x597   : > { %v1922_v20 = vunpack.c.h.bf16 %v1688_v15 }
 0x598   : > { %v3000_v11 = vadd.f32 %v6320_v24, %v2951_v60 }
 0x599   : > { %3474 = vmatpush.bf16.msra.mxu3 %v2306_v52  ;;  %v1928_v52 = vunpack.c.l.bf16 %v1692_v29 }
 0x59b   : > { %v3190_v51 = vpop.f32.mrf.mxu3  ;;  %v6785_v28 = vpop.f32.mrf.mxu2 }
 0x59c   : > { %v3191_v59 = vadd.f32 %v3190_v51, %v3142_v25  ;;  %v7443_v51 = vld [vmem:[#allocation59_spill] sm:$0xff] }
 0x59d   : > { %3475 = vmatpush.bf16.msra.mxu3 %v2304_v50  ;;  %v1540_v9 = vpop.f32.mrf.mxu1 }
 0x59e   : > { %v3621_v42 = vmax.f32 %v3191_v59, 0.0  ;;  %v1694_v6 = vpack.c.bf16 %v1540_v9, %v1538_v21  ;;  %v3049_v21 = vadd.f32 %v6370_v63, %v3000_v11  ;;  %v1916_v9 = vunpack.c.l.bf16 %v6705_v34 }
 0x59f   : > { %v1912_v11 = vunpack.c.l.bf16 %v6694_v8 }
 0x5a0   : > { %3290 = vmatmul.bf16.gmra.mxu3 %v7441_v47  ;;  %3339 = vmatmul.bf16.gmra.mxu2 %v7442_v61  ;;  %v6792_v48 = vpack.c.bf16 %v3621_v42, %v3619_v40  ;;  %v1932_v58 = vunpack.c.l.bf16 %v1694_v6  ;;  %v1934_v46 = vunpack.c.h.bf16 %v1694_v6  ;;  %v3098_v50 = vadd.f32 %v7443_v51, %v3049_v21  ;;  %v7444_v6 = vld [vmem:[#allocation37_spill] sm:$0xff] }
 0x5a1   : > { %v1918_v47 = vunpack.c.h.bf16 %v6705_v34  ;;  %v1914_v34 = vunpack.c.h.bf16 %v6694_v8 }
 0x5a2   : > { %5241 = vtanh.f32 %v1932_v58  ;;  %v3147_v24 = vadd.f32 %v6661_v44, %v3098_v50  ;;  %v7446_v50 = vld [vmem:[#allocation106_spill] sm:$0xff] }
 0x5a3   : > { %v3193_v5 = vpop.f32.mrf.mxu3  ;;  %v6796_v55 = vpop.f32.mrf.mxu2  ;;  %5243 = vtanh.f32 %v1934_v46 }
 0x5a4   : > { %v3194_v25 = vadd.f32 %v3193_v5, %v6655_v35  ;;  %5245 = vtanh.f32 %v1928_v52 }
 0x5a5   : > { %5247 = vtanh.f32 %v1930_v12  ;;  %v1543_v2 = vpop.f32.mrf.mxu1 }
 0x5a6   : > { %5249 = vtanh.f32 %v1924_v16  ;;  %v3623_v56 = vmax.f32 %v3194_v25, 0.0 }
 0x5a7   : > { %5251 = vtanh.f32 %v1926_v18 }
 0x5a8   : > { %v5242_v59 = vpop.eup %5241  ;;  %5253 = vtanh.f32 %v1920_v13  ;;  %v7447_v13 = vld [vmem:[#allocation46_spill] sm:$0xff] }
 0x5a9   : > { %v5244_v3 = vpop.eup %5243  ;;  %5255 = vtanh.f32 %v1922_v20  ;;  %v2863_v20 = vadd.f32 %v7447_v13, %v7446_v50 }
 0x5aa   : > { %v5246_v40 = vpop.eup %5245  ;;  %v2334_v42 = vpack.c.bf16 %v5244_v3, %v5242_v59  ;;  %5257 = vtanh.f32 %v1916_v9  ;;  %v1910_v59 = vunpack.c.h.bf16 %v6683_v26  ;;  %v1904_v3 = vunpack.c.l.bf16 %v6668_v31 }
 0x5ab   : > { %v3195_v35 = vpop.f32.mrf.mxu3  ;;  %v6805_v57 = vpop.f32.mrf.mxu2  ;;  %5259 = vtanh.f32 %v1918_v47 }
 0x5ac   : > { %v3196_v63 = vadd.f32 %v3195_v35, %v3147_v24  ;;  %v5248_v29 = vpop.eup %5247  ;;  %3517 = vmatpush.bf16.msrb.mxu2 %v2334_v42  ;;  %5261 = vtanh.f32 %v1912_v11 }
 0x5ad   : > { %v1545_v44 = vpop.f32.mrf.mxu1  ;;  %v5250_v61 = vpop.eup %5249  ;;  %v2332_v58 = vpack.c.bf16 %v5248_v29, %v5246_v40  ;;  %5263 = vtanh.f32 %v1914_v34  ;;  %v1906_v40 = vunpack.c.h.bf16 %v6668_v31 }
 0x5ae   : > { %v3625_v60 = vmax.f32 %v3196_v63, 0.0  ;;  %v6811_v52 = vpack.c.bf16 %v1545_v44, %v1543_v2  ;;  %v5252_v5 = vpop.eup %5251  ;;  %v1908_v2 = vunpack.c.l.bf16 %v6683_v26 }
 0x5af   : > { %v5254_v12 = vpop.eup %5253  ;;  %v2330_v18 = vpack.c.bf16 %v5252_v5, %v5250_v61  ;;  %v7449_v61 = vld [vmem:[#allocation78_spill] sm:$0xff]  ;;  %v7451_v5 = vld [vmem:[#allocation43_spill] sm:$0xff] }
 0x5b0   : > { %3295 = vmatmul.bf16.gmra.mxu3 %v7444_v6  ;;  %3344 = vmatmul.bf16.gmra.mxu2 %v7445_v27  ;;  %v6813_v46 = vpack.c.bf16 %v3625_v60, %v3623_v56  ;;  %v5256_v15 = vpop.eup %5255  ;;  %5265 = vtanh.f32 %v1908_v2  ;;  %v7452_v2 = vld [vmem:[#allocation110_spill] sm:$0xff] }
 0x5b1   : > { %3518 = vmatpush.bf16.msrb.mxu2 %v2332_v58  ;;  %v2328_v51 = vpack.c.bf16 %v5256_v15, %v5254_v12  ;;  %v5258_v8 = vpop.eup %5257  ;;  %5267 = vtanh.f32 %v1910_v59  ;;  %v7450_v58 = vld [vmem:[#allocation41_spill] sm:$0xff]  ;;  %v7453_v59 = vld [vmem:[#allocation115_spill] sm:$0xff] }
 0x5b2   : > { %v5260_v35 = vpop.eup %5259  ;;  %5269 = vtanh.f32 %v1904_v3 }
 0x5b3   : > { %v3198_v25 = vpop.f32.mrf.mxu3  ;;  %v6817_v21 = vpop.f32.mrf.mxu2  ;;  %v2326_v56 = vpack.c.bf16 %v5260_v35, %v5258_v8  ;;  %5271 = vtanh.f32 %v1906_v40  ;;  %v7454_v35 = vld [vmem:[#allocation92_spill] sm:$0xff]  ;;  %v7455_v40 = vld [vmem:[#allocation50_spill] sm:$0xff] }
 0x5b4   : > { %v3199_v16 = vadd.f32 %v3198_v25, %v6672_v38  ;;  %v7448_v38 = vld [vmem:[#allocation76_spill] sm:$0xff]  ;;  %v5262_v9 = vpop.eup %5261 }
 0x5b5   : > { %3519 = vmatpush.bf16.msrb.mxu2 %v2330_v18  ;;  %v1548_v24 = vpop.f32.mrf.mxu1  ;;  %v2912_v63 = vadd.f32 %v7448_v38, %v2863_v20  ;;  %v5264_v60 = vpop.eup %5263  ;;  %v2868_v38 = vadd.f32 %v7455_v40, %v7454_v35 }
 0x5b6   : > { %v3627_v47 = vmax.f32 %v3199_v16, 0.0  ;;  %v5266_v27 = vpop.eup %5265  ;;  %v2324_v11 = vpack.c.bf16 %v5264_v60, %v5262_v9 }
 0x5b7   : > { %v2961_v31 = vadd.f32 %v7449_v61, %v2912_v63 }
 0x5b9   : > { %3520 = vmatpush.bf16.msrb.mxu2 %v2328_v51  ;;  %v3010_v51 = vadd.f32 %v7452_v2, %v2961_v31  ;;  %v7457_v31 = vld [vmem:[#allocation83_spill] sm:$0xff] }
 0x5bb   : > { %v3200_v42 = vpop.f32.mrf.mxu3  ;;  %v6827_v29 = vpop.f32.mrf.mxu2  ;;  %v3059_v8 = vadd.f32 %v7453_v59, %v3010_v51  ;;  %v7462_v51 = vld [vmem:[#allocation104_spill] sm:$0xff] }
 0x5bc   : > { %v3201_v26 = vadd.f32 %v3200_v42, %v6677_v43  ;;  %v5268_v43 = vpop.eup %5267 }
 0x5bd   : > { %3521 = vmatpush.bf16.msrb.mxu2 %v2326_v56  ;;  %v1550_v6 = vpop.f32.mrf.mxu1  ;;  %v5270_v34 = vpop.eup %5269  ;;  %v2322_v20 = vpack.c.bf16 %v5268_v43, %v5266_v27  ;;  %v3108_v63 = vadd.f32 %v6535_v7, %v3059_v8  ;;  %v7456_v56 = vld [vmem:[#allocation81_spill] sm:$0xff]  ;;  %v7460_v43 = vld [vmem:[#allocation112_spill] sm:$0xff] }
 0x5be   : > { %v3629_v44 = vmax.f32 %v3201_v26, 0.0  ;;  %v6833_v12 = vpack.c.bf16 %v1550_v6, %v1548_v24  ;;  %v5272_v25 = vpop.eup %5271  ;;  %v2917_v60 = vadd.f32 %v7456_v56, %v2868_v38  ;;  %v7458_v27 = vld [vmem:[#allocation45_spill] sm:$0xff]  ;;  %v7464_v38 = vld [vmem:[#allocation86_spill] sm:$0xff] }
 0x5bf   : > { %v2320_v24 = vpack.c.bf16 %v5272_v25, %v5270_v34  ;;  %v3157_v42 = vadd.f32 %v6688_v45, %v3108_v63  ;;  %v7461_v25 = vld [vmem:[#allocation117_spill] sm:$0xff] }
 0x5c0   : > { %3300 = vmatmul.bf16.gmra.mxu3 %v7450_v58  ;;  %3349 = vmatmul.bf16.gmra.mxu2 %v7451_v5  ;;  %v6835_v15 = vpack.c.bf16 %v3629_v44, %v3627_v47  ;;  %v2966_v6 = vadd.f32 %v7457_v31, %v2917_v60  ;;  %v7459_v58 = vld [vmem:[#allocation47_spill] sm:$0xff] }
 0x5c1   : > { %3522 = vmatpush.bf16.msrb.mxu2 %v2324_v11 }
 0x5c2   : > { %v3015_v34 = vadd.f32 %v7460_v43, %v2966_v6  ;;  %v7468_v6 = vld [vmem:[#allocation114_spill] sm:$0xff] }
 0x5c3   : > { %v3203_v16 = vpop.f32.mrf.mxu3  ;;  %v6837_v18 = vpop.f32.mrf.mxu2 }
 0x5c4   : > { %v3204_v13 = vadd.f32 %v3203_v16, %v6686_v17  ;;  %v3064_v16 = vadd.f32 %v7461_v25, %v3015_v34  ;;  %v7470_v34 = vld [vmem:[#allocation96_spill] sm:$0xff]  ;;  %v7471_v25 = vld [vmem:[#allocation58_spill] sm:$0xff] }
 0x5c5   : > { %3523 = vmatpush.bf16.msrb.mxu2 %v2322_v20  ;;  %v1553_v3 = vpop.f32.mrf.mxu1 }
 0x5c6   : > { %v3631_v47 = vmax.f32 %v3204_v13, 0.0  ;;  %v7463_v13 = vld [vmem:[#allocation54_spill] sm:$0xff]  ;;  %v3113_v59 = vadd.f32 %v6547_v39, %v3064_v16  ;;  %v2878_v16 = vadd.f32 %v7471_v25, %v7470_v34 }
 0x5c7   : > { %v2873_v20 = vadd.f32 %v7463_v13, %v7462_v51  ;;  %v7472_v13 = vld [vmem:[#allocation44_spill] sm:$0xff] }
 0x5c8   : > { %v3162_v8 = vadd.f32 %v6699_v62, %v3113_v59 }
 0x5c9   : > { %3524 = vmatpush.bf16.msrb.mxu2 %v2320_v24  ;;  %v2922_v63 = vadd.f32 %v7464_v38, %v2873_v20 }
 0x5cb   : > { %v3205_v9 = vpop.f32.mrf.mxu3  ;;  %v6846_v26 = vpop.f32.mrf.mxu2 }
 0x5cc   : > { %v3206_v17 = vadd.f32 %v3205_v9, %v3157_v42 }
 0x5cd   : > { %v1555_v61 = vpop.f32.mrf.mxu1 }
 0x5ce   : > { %v3633_v44 = vmax.f32 %v3206_v17, 0.0  ;;  %v6852_v5 = vpack.c.bf16 %v1555_v61, %v1553_v3  ;;  %v7465_v17 = vld [vmem:[#allocation90_spill] sm:$0xff]  ;;  %v7467_v61 = vld [vmem:[#allocation51_spill] sm:$0xff] }
 0x5d0   : > { %3305 = vmatmul.bf16.gmra.mxu3 %v7458_v27  ;;  %3354 = vmatmul.bf16.gmra.mxu2 %v7459_v58  ;;  %v6854_v7 = vpack.c.bf16 %v3633_v44, %v3631_v47  ;;  %v2971_v47 = vadd.f32 %v7465_v17, %v2922_v63  ;;  %v7466_v44 = vld [vmem:[#allocation49_spill] sm:$0xff]  ;;  %v7469_v58 = vld [vmem:[#allocation119_spill] sm:$0xff] }
 0x5d2   : > { %v3020_v27 = vadd.f32 %v7468_v6, %v2971_v47  ;;  %v7475_v47 = vld [vmem:[#allocation53_spill] sm:$0xff] }
 0x5d3   : > { %v3208_v45 = vpop.f32.mrf.mxu3  ;;  %v6856_v11 = vpop.f32.mrf.mxu2 }
 0x5d4   : > { %v3209_v24 = vadd.f32 %v3208_v45, %v6697_v54  ;;  %v3069_v45 = vadd.f32 %v7469_v58, %v3020_v27  ;;  %v7478_v27 = vld [vmem:[#allocation40_spill] sm:$0xff] }
 0x5d5   : > { %v1558_v2 = vpop.f32.mrf.mxu1 }
 0x5d6   : > { %v3635_v9 = vmax.f32 %v3209_v24, 0.0  ;;  %v3118_v20 = vadd.f32 %v7472_v13, %v3069_v45 }
 0x5d8   : > { %v3167_v59 = vadd.f32 %v6712_v37, %v3118_v20 }
 0x5db   : > { %v3210_v3 = vpop.f32.mrf.mxu3  ;;  %v6865_v40 = vpop.f32.mrf.mxu2 }
 0x5dc   : > { %v3211_v42 = vadd.f32 %v3210_v3, %v3162_v8  ;;  %v7473_v3 = vld [vmem:[#allocation93_spill] sm:$0xff] }
 0x5dd   : > { %v1560_v60 = vpop.f32.mrf.mxu1  ;;  %v2927_v38 = vadd.f32 %v7473_v3, %v2878_v16 }
 0x5de   : > { %v3637_v56 = vmax.f32 %v3211_v42, 0.0  ;;  %v6871_v39 = vpack.c.bf16 %v1560_v60, %v1558_v2  ;;  %v7474_v60 = vld [vmem:[#allocation102_spill] sm:$0xff] }
 0x5df   : > { %v2976_v17 = vadd.f32 %v7474_v60, %v2927_v38  ;;  %v7481_v60 = vld [vmem:[#allocation67_spill] sm:$0xff] }
 0x5e0   : > { %3310 = vmatmul.bf16.gmra.mxu3 %v7466_v44  ;;  %3359 = vmatmul.bf16.gmra.mxu2 %v7467_v61  ;;  %v3659_v62 = vpack.c.bf16 %v3637_v56, %v3635_v9  ;;  %v7476_v44 = vld [vmem:[#allocation55_spill] sm:$0xff] }
 0x5e3   : > { %v3213_v31 = vpop.f32.mrf.mxu3  ;;  %v6873_v54 = vpop.f32.mrf.mxu2 }
 0x5e4   : > { %v3214_v2 = vadd.f32 %v3213_v31, %v6708_v1  ;;  %v7477_v1 = vld [vmem:[#allocation121_spill] sm:$0xff] }
 0x5e5   : > { %v6877_v43 = vpop.f32.mrf.mxu1  ;;  %v3025_v31 = vadd.f32 %v7477_v1, %v2976_v17 }
 0x5e6   : > { %v3639_v42 = vmax.f32 %v3214_v2, 0.0 }
 0x5e7   : > { %v3074_v58 = vadd.f32 %v7478_v27, %v3025_v31 }
 0x5e9   : > { %v3123_v25 = vadd.f32 %v6735_v0, %v3074_v58 }
 0x5eb   : > { %v3215_v8 = vpop.f32.mrf.mxu3  ;;  %v6884_v24 = vpop.f32.mrf.mxu2  ;;  %v3172_v16 = vadd.f32 %v6738_v14, %v3123_v25  ;;  %v7482_v25 = vld [vmem:[#allocation105_spill] sm:$0xff] }
 0x5ec   : > { %v3216_v63 = vadd.f32 %v3215_v8, %v3167_v59 }
 0x5ed   : > { %v6887_v56 = vpop.f32.mrf.mxu1 }
 0x5ee   : > { %v3641_v9 = vmax.f32 %v3216_v63, 0.0  ;;  %v7479_v63 = vld [vmem:[#allocation100_spill] sm:$0xff] }
 0x5f0   : > { %3315 = vmatmul.bf16.gmra.mxu3 %v7475_v47  ;;  %3364 = vmatmul.bf16.gmra.mxu2 %v7476_v44  ;;  %v3661_v61 = vpack.c.bf16 %v3641_v9, %v3639_v42  ;;  %v3233_v42 = vadd.f32 %v6749_v23, %v7479_v63  ;;  %v7480_v9 = vld [vmem:[#allocation57_spill] sm:$0xff] }
 0x5f3   : > { %v3218_v37 = vpop.f32.mrf.mxu3  ;;  %v6892_v6 = vpop.f32.mrf.mxu2 }
 0x5f4   : > { %v3219_v13 = vadd.f32 %v3218_v37, %v6725_v41  ;;  %v3235_v37 = vadd.f32 %v6766_v19, %v6727_v22 }
 0x5f5   : > { %v1568_v45 = vpop.f32.mrf.mxu1 }
 0x5f6   : > { %v3643_v8 = vmax.f32 %v3219_v13, 0.0  ;;  %v7483_v13 = vld [vmem:[#allocation61_spill] sm:$0xff] }
 0x5fb   : > { %v3220_v20 = vpop.f32.mrf.mxu3  ;;  %v6899_v59 = vpop.f32.mrf.mxu2 }
 0x5fc   : > { %v3221_v2 = vadd.f32 %v3220_v20, %v3172_v16  ;;  %v3238_v16 = vadd.f32 %v6776_v49, %v7482_v25  ;;  %v7484_v20 = vld [vmem:[#allocation71_spill] sm:$0xff]  ;;  %v3245_v25 = vadd.f32 %v6805_v57, %v7437_v10 }
 0x5fd   : > { %v1570_v38 = vpop.f32.mrf.mxu1  ;;  %v7488_v10 = vld [vmem:[#allocation95_spill] sm:$0xff] }
 0x5fe   : > { %v3645_v3 = vmax.f32 %v3221_v2, 0.0  ;;  %v3248_v57 = vadd.f32 %v6817_v21, %v7488_v10  ;;  %v1940_v21 = vunpack.c.l.bf16 %v6833_v12 }
 0x600   : > { %3378 = vmatmul.bf16.vlgmr.msrb.gmra.mxu3 %v7480_v9  ;;  %3427 = vmatmul.bf16.vlgmr.msra.gmra.mxu2 %v7481_v60  ;;  %v3663_v17 = vpack.c.bf16 %v3645_v3, %v3643_v8  ;;  %v7485_v9 = vld [vmem:[#allocation108_spill] sm:$0xff] }
 0x601   : > { %v3243_v60 = vadd.f32 %v6796_v55, %v7485_v9 }
 0x602   : > { %3683 = vmatpush.bf16.msrb.mxu0 %v3663_v17  ;;  %v7486_v17 = vld [vmem:[#allocation65_spill] sm:$0xff] }
 0x603   : > { %v3281_v0 = vpop.f32.mrf.mxu3  ;;  %v3330_v14 = vpop.f32.mrf.mxu2 }
 0x604   : > { %v3282_v47 = vadd.f32 %v3281_v0, %v3233_v42 }
 0x605   : > { %v1573_v44 = vpop.f32.mrf.mxu1 }
 0x606   : > { %v6905_v41 = vadd.f32 %v3330_v14, %v3282_v47  ;;  %3684 = vmatpush.bf16.msrb.mxu0 %v3661_v61 }
 0x60a   : > { %3685 = vmatpush.bf16.msrb.mxu0 %v3659_v62 }
 0x60b   : > { %v3283_v1 = vpop.f32.mrf.mxu3  ;;  %v3332_v31 = vpop.f32.mrf.mxu2 }
 0x60c   : > { %v3284_v23 = vadd.f32 %v3283_v1, %v3235_v37 }
 0x60d   : > { %v1575_v58 = vpop.f32.mrf.mxu1 }
 0x60e   : > { %v6909_v27 = vadd.f32 %v3332_v31, %v3284_v23  ;;  %3686 = vmatpush.bf16.msrb.mxu0 %v6854_v7  ;;  %v3240_v7 = vadd.f32 %v6785_v28, %v6753_v33  ;;  %v1706_v33 = vpack.c.bf16 %v1570_v38, %v1568_v45 }
 0x610   : > { %3383 = vmatmul.bf16.gmra.mxu3 %v7483_v13  ;;  %3432 = vmatmul.bf16.gmra.mxu2 %v7484_v20  ;;  %v1956_v31 = vunpack.c.l.bf16 %v1706_v33  ;;  %v1958_v23 = vunpack.c.h.bf16 %v1706_v33 }
 0x612   : > { %3687 = vmatpush.bf16.msrb.mxu0 %v6835_v15  ;;  %v1708_v15 = vpack.c.bf16 %v1575_v58, %v1573_v44 }
 0x613   : > { %v3286_v61 = vpop.f32.mrf.mxu3  ;;  %v3335_v22 = vpop.f32.mrf.mxu2 }
 0x614   : > { %v3287_v19 = vadd.f32 %v3286_v61, %v3238_v16  ;;  %v1960_v28 = vunpack.c.l.bf16 %v1708_v15  ;;  %v1962_v1 = vunpack.c.h.bf16 %v1708_v15 }
 0x615   : > { %v1578_v2 = vpop.f32.mrf.mxu1 }
 0x616   : > { %v6917_v62 = vadd.f32 %v3335_v22, %v3287_v19  ;;  %3688 = vmatpush.bf16.msrb.mxu0 %v6813_v46  ;;  %v7487_v46 = vld [vmem:[#allocation75_spill] sm:$0xff]  ;;  %v1948_v19 = vunpack.c.l.bf16 %v6871_v39 }
 0x61a   : > { %3689 = vmatpush.bf16.msrb.mxu0 %v6792_v48 }
 0x61b   : > { %v3288_v49 = vpop.f32.mrf.mxu3  ;;  %v3337_v8 = vpop.f32.mrf.mxu2 }
 0x61c   : > { %v3289_v3 = vadd.f32 %v3288_v49, %v3240_v7  ;;  %v1950_v7 = vunpack.c.h.bf16 %v6871_v39 }
 0x61d   : > { %v1580_v42 = vpop.f32.mrf.mxu1 }
 0x61e   : > { %v6923_v63 = vadd.f32 %v3337_v8, %v3289_v3  ;;  %3690 = vmatpush.bf16.msrb.mxu0 %v6774_v53  ;;  %v1710_v0 = vpack.c.bf16 %v1580_v42, %v1578_v2  ;;  %v1704_v53 = vpack.c.bf16 %v6887_v56, %v6877_v43  ;;  %v7489_v8 = vld [vmem:[#allocation69_spill] sm:$0xff]  ;;  %v7490_v3 = vld [vmem:[#allocation79_spill] sm:$0xff] }
 0x620   : > { %3388 = vmatmul.bf16.gmra.mxu3 %v7486_v17  ;;  %3437 = vmatmul.bf16.gmra.mxu2 %v7487_v46  ;;  %v1964_v48 = vunpack.c.l.bf16 %v1710_v0  ;;  %v1966_v14 = vunpack.c.h.bf16 %v1710_v0  ;;  %v1952_v58 = vunpack.c.l.bf16 %v1704_v53  ;;  %v1954_v45 = vunpack.c.h.bf16 %v1704_v53 }
 0x621   : > { %v1946_v46 = vunpack.c.h.bf16 %v6852_v5 }
 0x622   : > { %5273 = vtanh.f32 %v1964_v48 }
 0x623   : > { %v3291_v47 = vpop.f32.mrf.mxu3  ;;  %v3340_v37 = vpop.f32.mrf.mxu2  ;;  %5275 = vtanh.f32 %v1966_v14 }
 0x624   : > { %v3292_v44 = vadd.f32 %v3291_v47, %v3243_v60  ;;  %5277 = vtanh.f32 %v1960_v28  ;;  %v1944_v60 = vunpack.c.l.bf16 %v6852_v5  ;;  %v1942_v47 = vunpack.c.h.bf16 %v6833_v12 }
 0x625   : > { %5279 = vtanh.f32 %v1962_v1  ;;  %v1936_v1 = vunpack.c.l.bf16 %v6811_v52  ;;  %v1938_v5 = vunpack.c.h.bf16 %v6811_v52 }
 0x626   : > { %v6932_v55 = vadd.f32 %v3340_v37, %v3292_v44  ;;  %5281 = vtanh.f32 %v1956_v31  ;;  %v3250_v44 = vadd.f32 %v6827_v29, %v6297_v36  ;;  %v7493_v36 = vld [vmem:[#allocation84_spill] sm:$0xff] }
 0x627   : > { %5283 = vtanh.f32 %v1958_v23 }
 0x628   : > { %v5274_v38 = vpop.eup %5273  ;;  %5285 = vtanh.f32 %v1952_v58 }
 0x629   : > { %v5276_v16 = vpop.eup %5275  ;;  %5287 = vtanh.f32 %v1954_v45 }
 0x62a   : > { %v5278_v56 = vpop.eup %5277  ;;  %v2350_v61 = vpack.c.bf16 %v5276_v16, %v5274_v38  ;;  %5289 = vtanh.f32 %v1948_v19 }
 0x62b   : > { %v3293_v13 = vpop.f32.mrf.mxu3  ;;  %v3342_v43 = vpop.f32.mrf.mxu2  ;;  %5291 = vtanh.f32 %v1950_v7 }
 0x62c   : > { %v3294_v20 = vadd.f32 %v3293_v13, %v3245_v25  ;;  %v5280_v22 = vpop.eup %5279  ;;  %3566 = vmatpush.bf16.msrb.mxu3 %v2350_v61  ;;  %5293 = vtanh.f32 %v1944_v60  ;;  %v7491_v13 = vld [vmem:[#allocation99_spill] sm:$0xff] }
 0x62d   : > { %v5282_v49 = vpop.eup %5281  ;;  %v2348_v15 = vpack.c.bf16 %v5280_v22, %v5278_v56  ;;  %5295 = vtanh.f32 %v1946_v46  ;;  %v3253_v52 = vadd.f32 %v6837_v18, %v7491_v13  ;;  %v3255_v18 = vadd.f32 %v6846_v26, %v7446_v50  ;;  %v7496_v46 = vld [vmem:[#allocation89_spill] sm:$0xff]  ;;  %v7502_v13 = vld [vmem:[#allocation98_spill] sm:$0xff] }
 0x62e   : > { %v6937_v2 = vadd.f32 %v3342_v43, %v3294_v20  ;;  %v5284_v42 = vpop.eup %5283  ;;  %5297 = vtanh.f32 %v1940_v21  ;;  %v7492_v43 = vld [vmem:[#allocation73_spill] sm:$0xff]  ;;  %v3260_v50 = vadd.f32 %v6865_v40, %v7454_v35  ;;  %v3265_v35 = vadd.f32 %v6884_v24, %v7462_v51 }
 0x62f   : > { %v5286_v9 = vpop.eup %5285  ;;  %v2346_v28 = vpack.c.bf16 %v5284_v42, %v5282_v49  ;;  %5299 = vtanh.f32 %v1942_v47  ;;  %v3270_v51 = vadd.f32 %v6899_v59, %v7470_v34  ;;  %v7505_v59 = vld [vmem:[#allocation107_spill] sm:$0xff] }
 0x630   : > { %3393 = vmatmul.bf16.gmra.mxu3 %v7489_v8  ;;  %3442 = vmatmul.bf16.gmra.mxu2 %v7490_v3  ;;  %v5288_v17 = vpop.eup %5287  ;;  %5301 = vtanh.f32 %v1936_v1  ;;  %v7498_v1 = vld [vmem:[#allocation82_spill] sm:$0xff] }
 0x631   : > { %3567 = vmatpush.bf16.msrb.mxu3 %v2348_v15  ;;  %v2344_v14 = vpack.c.bf16 %v5288_v17, %v5286_v9  ;;  %v5290_v37 = vpop.eup %5289  ;;  %5303 = vtanh.f32 %v1938_v5  ;;  %v7494_v9 = vld [vmem:[#allocation87_spill] sm:$0xff]  ;;  %v7495_v17 = vld [vmem:[#allocation77_spill] sm:$0xff] }
 0x632   : > { %v5292_v53 = vpop.eup %5291  ;;  %v3258_v60 = vadd.f32 %v6856_v11, %v7494_v9 }
 0x633   : > { %v3296_v39 = vpop.f32.mrf.mxu3  ;;  %v3345_v0 = vpop.f32.mrf.mxu2  ;;  %v2342_v38 = vpack.c.bf16 %v5292_v53, %v5290_v37  ;;  %v7497_v37 = vld [vmem:[#allocation101_spill] sm:$0xff]  ;;  %v7499_v53 = vld [vmem:[#allocation94_spill] sm:$0xff] }
 0x634   : > { %v3297_v33 = vadd.f32 %v3296_v39, %v3248_v57  ;;  %v5294_v58 = vpop.eup %5293  ;;  %v3263_v11 = vadd.f32 %v6873_v54, %v7497_v37 }
 0x635   : > { %3568 = vmatpush.bf16.msrb.mxu3 %v2346_v28  ;;  %v5296_v12 = vpop.eup %5295 }
 0x636   : > { %v6947_v48 = vadd.f32 %v3345_v0, %v3297_v33  ;;  %v5298_v16 = vpop.eup %5297  ;;  %v2340_v29 = vpack.c.bf16 %v5296_v12, %v5294_v58  ;;  %v7500_v12 = vld [vmem:[#allocation91_spill] sm:$0xff] }
 0x637   : > { %v5300_v56 = vpop.eup %5299  ;;  %v3268_v54 = vadd.f32 %v6892_v6, %v7500_v12  ;;  %v7504_v6 = vld [vmem:[#allocation122_spill] sm:$0xff] }
 0x638   : > { %v5302_v20 = vpop.eup %5301  ;;  %v2338_v49 = vpack.c.bf16 %v5300_v56, %v5298_v16  ;;  %v7501_v16 = vld [vmem:[#allocation88_spill] sm:$0xff] }
 0x639   : > { %3569 = vmatpush.bf16.msrb.mxu3 %v2344_v14  ;;  %v5304_v61 = vpop.eup %5303 }
 0x63a   : > { %v2336_v57 = vpack.c.bf16 %v5304_v61, %v5302_v20 }
 0x63b   : > { %v3298_v31 = vpop.f32.mrf.mxu3  ;;  %v3347_v23 = vpop.f32.mrf.mxu2 }
 0x63c   : > { %v3299_v45 = vadd.f32 %v3298_v31, %v3250_v44 }
 0x63d   : > { %3570 = vmatpush.bf16.msrb.mxu3 %v2342_v38 }
 0x63e   : > { %v6954_v25 = vadd.f32 %v3347_v23, %v3299_v45 }
 0x640   : > { %3398 = vmatmul.bf16.gmra.mxu3 %v7492_v43  ;;  %3447 = vmatmul.bf16.gmra.mxu2 %v7493_v36 }
 0x641   : > { %3571 = vmatpush.bf16.msrb.mxu3 %v2340_v29 }
 0x643   : > { %v3301_v22 = vpop.f32.mrf.mxu3  ;;  %v3350_v19 = vpop.f32.mrf.mxu2 }
 0x644   : > { %v3302_v7 = vadd.f32 %v3301_v22, %v3253_v52  ;;  %v7503_v22 = vld [vmem:[#allocation103_spill] sm:$0xff] }
 0x645   : > { %3572 = vmatpush.bf16.msrb.mxu3 %v2338_v49 }
 0x646   : > { %v6960_v10 = vadd.f32 %v3350_v19, %v3302_v7 }
 0x649   : > { %3573 = vmatpush.bf16.msrb.mxu3 %v2336_v57 }
 0x64b   : > { %v3303_v8 = vpop.f32.mrf.mxu3  ;;  %v3352_v3 = vpop.f32.mrf.mxu2 }
 0x64c   : > { %v3304_v15 = vadd.f32 %v3303_v8, %v3255_v18 }
 0x64e   : > { %v6964_v42 = vadd.f32 %v3352_v3, %v3304_v15  ;;  %v7506_v15 = vld [vmem:[#allocation123_spill] sm:$0xff] }
 0x650   : > { %3403 = vmatmul.bf16.gmra.mxu3 %v7495_v17  ;;  %3452 = vmatmul.bf16.gmra.mxu2 %v7496_v46 }
 0x653   : > { %v3306_v39 = vpop.f32.mrf.mxu3  ;;  %v3355_v0 = vpop.f32.mrf.mxu2 }
 0x654   : > { %v3307_v33 = vadd.f32 %v3306_v39, %v3258_v60 }
 0x656   : > { %v6970_v28 = vadd.f32 %v3355_v0, %v3307_v33 }
 0x65b   : > { %v3308_v26 = vpop.f32.mrf.mxu3  ;;  %v3357_v21 = vpop.f32.mrf.mxu2 }
 0x65c   : > { %v3309_v14 = vadd.f32 %v3308_v26, %v3260_v50  ;;  %v7507_v50 = vld [vmem:[#allocation109_spill] sm:$0xff] }
 0x65e   : > { %v6974_v47 = vadd.f32 %v3357_v21, %v3309_v14 }
 0x660   : > { %3408 = vmatmul.bf16.gmra.mxu3 %v7498_v1  ;;  %3457 = vmatmul.bf16.gmra.mxu2 %v7499_v53 }
 0x663   : > { %v3311_v5 = vpop.f32.mrf.mxu3  ;;  %v3360_v44 = vpop.f32.mrf.mxu2 }
 0x664   : > { %v3312_v31 = vadd.f32 %v3311_v5, %v3263_v11  ;;  %v7509_v5 = vld [vmem:[#allocation111_spill] sm:$0xff] }
 0x666   : > { %v6980_v23 = vadd.f32 %v3360_v44, %v3312_v31 }
 0x66b   : > { %v3313_v40 = vpop.f32.mrf.mxu3  ;;  %v3362_v58 = vpop.f32.mrf.mxu2 }
 0x66c   : > { %v3314_v45 = vadd.f32 %v3313_v40, %v3265_v35 }
 0x66e   : > { %v6984_v38 = vadd.f32 %v3362_v58, %v3314_v45 }
 0x670   : > { %3413 = vmatmul.bf16.gmra.mxu3 %v7501_v16  ;;  %3462 = vmatmul.bf16.gmra.mxu2 %v7502_v13 }
 0x673   : > { %v3316_v52 = vpop.f32.mrf.mxu3  ;;  %v3365_v43 = vpop.f32.mrf.mxu2 }
 0x674   : > { %v3317_v36 = vadd.f32 %v3316_v52, %v3268_v54  ;;  %v7511_v54 = vld [vmem:[#allocation113_spill] sm:$0xff] }
 0x676   : > { %v6990_v29 = vadd.f32 %v3365_v43, %v3317_v36 }
 0x67b   : > { %v3318_v24 = vpop.f32.mrf.mxu3  ;;  %v3367_v56 = vpop.f32.mrf.mxu2 }
 0x67c   : > { %v3319_v20 = vadd.f32 %v3318_v24, %v3270_v51 }
 0x67e   : > { %v6994_v61 = vadd.f32 %v3367_v56, %v3319_v20  ;;  %v7513_v56 = vld [vmem:[#allocation116_spill] sm:$0xff] }
 0x680   : > { %3476 = vmatmul.bf16.vlgmr.msra.gmra.mxu3 %v7503_v22  ;;  %3525 = vmatmul.bf16.vlgmr.msrb.gmra.mxu2 %v7504_v6 }
 0x683   : > { %v3379_v19 = vpop.f32.mrf.mxu3  ;;  %v3428_v7 = vpop.f32.mrf.mxu2 }
 0x684   : > { %v3380_v49 = vadd.f32 %v3379_v19, %v6905_v41 }
 0x686   : > { %v6999_v57 = vadd.f32 %v3428_v7, %v3380_v49 }
 0x68b   : > { %v3381_v18 = vpop.f32.mrf.mxu3  ;;  %v3430_v8 = vpop.f32.mrf.mxu2 }
 0x68c   : > { %v3382_v3 = vadd.f32 %v3381_v18, %v6909_v27  ;;  %v7508_v27 = vld [vmem:[#allocation63_spill] sm:$0xff] }
 0x68e   : > { %v7002_v34 = vadd.f32 %v3430_v8, %v3382_v3  ;;  %v7515_v8 = vld [vmem:[#allocation118_spill] sm:$0xff] }
 0x690   : > { %3481 = vmatmul.bf16.gmra.mxu3 %v7505_v59  ;;  %3530 = vmatmul.bf16.gmra.mxu2 %v7506_v15 }
 0x693   : > { %v3384_v9 = vpop.f32.mrf.mxu3  ;;  %v3433_v60 = vpop.f32.mrf.mxu2 }
 0x694   : > { %v3385_v17 = vadd.f32 %v3384_v9, %v6917_v62 }
 0x696   : > { %v7007_v46 = vadd.f32 %v3433_v60, %v3385_v17 }
 0x69b   : > { %v3386_v39 = vpop.f32.mrf.mxu3  ;;  %v3435_v41 = vpop.f32.mrf.mxu2 }
 0x69c   : > { %v3387_v0 = vadd.f32 %v3386_v39, %v6923_v63  ;;  %v7510_v63 = vld [vmem:[#allocation56_spill] sm:$0xff] }
 0x69e   : > { %v7010_v33 = vadd.f32 %v3435_v41, %v3387_v0  ;;  %v7517_v41 = vld [vmem:[#allocation120_spill] sm:$0xff] }
 0x6a0   : > { %3486 = vmatmul.bf16.gmra.mxu3 %v7507_v50  ;;  %3535 = vmatmul.bf16.gmra.mxu2 %v7508_v27 }
 0x6a3   : > { %v3389_v26 = vpop.f32.mrf.mxu3  ;;  %v3438_v21 = vpop.f32.mrf.mxu2 }
 0x6a4   : > { %v3390_v14 = vadd.f32 %v3389_v26, %v6932_v55 }
 0x6a6   : > { %v7015_v37 = vadd.f32 %v3438_v21, %v3390_v14 }
 0x6ab   : > { %v3391_v11 = vpop.f32.mrf.mxu3  ;;  %v3440_v62 = vpop.f32.mrf.mxu2 }
 0x6ac   : > { %v3392_v1 = vadd.f32 %v3391_v11, %v6937_v2  ;;  %v7512_v2 = vld [vmem:[#allocation52_spill] sm:$0xff] }
 0x6ae   : > { %v7018_v53 = vadd.f32 %v3440_v62, %v3392_v1 }
 0x6b0   : > { %3491 = vmatmul.bf16.gmra.mxu3 %v7509_v5  ;;  %3540 = vmatmul.bf16.gmra.mxu2 %v7510_v63 }
 0x6b3   : > { %v3394_v44 = vpop.f32.mrf.mxu3  ;;  %v3443_v31 = vpop.f32.mrf.mxu2 }
 0x6b4   : > { %v3395_v35 = vadd.f32 %v3394_v44, %v6947_v48 }
 0x6b6   : > { %v7023_v40 = vadd.f32 %v3443_v31, %v3395_v35 }
 0x6bb   : > { %v3396_v58 = vpop.f32.mrf.mxu3  ;;  %v3445_v55 = vpop.f32.mrf.mxu2 }
 0x6bc   : > { %v3397_v45 = vadd.f32 %v3396_v58, %v6954_v25  ;;  %v7514_v25 = vld [vmem:[#allocation48_spill] sm:$0xff] }
 0x6be   : > { %v7026_v12 = vadd.f32 %v3445_v55, %v3397_v45 }
 0x6c0   : > { %3496 = vmatmul.bf16.gmra.mxu3 %v7511_v54  ;;  %3545 = vmatmul.bf16.gmra.mxu2 %v7512_v2 }
 0x6c3   : > { %v3399_v16 = vpop.f32.mrf.mxu3  ;;  %v3448_v13 = vpop.f32.mrf.mxu2 }
 0x6c4   : > { %v3400_v52 = vadd.f32 %v3399_v16, %v6960_v10 }
 0x6c6   : > { %v7031_v43 = vadd.f32 %v3448_v13, %v3400_v52  ;;  %v3665_v13 = vld [vmem:[%s7180_s6] sm:$0xff] }
 0x6c7   : > { %3669 = vperm.xlu1 %4791, %v3665_v13  }
 0x6cb   : > { %v3401_v36 = vpop.f32.mrf.mxu3  ;;  %v3450_v48 = vpop.f32.mrf.mxu2 }
 0x6cc   : > { %v3402_v51 = vadd.f32 %v3401_v36, %v6964_v42  ;;  %v7516_v42 = vld [vmem:[#allocation124_spill] sm:$0xff] }
 0x6ce   : > { %v7034_v24 = vadd.f32 %v3450_v48, %v3402_v51 }
 0x6d0   : > { %3501 = vmatmul.bf16.gmra.mxu3 %v7513_v56  ;;  %3550 = vmatmul.bf16.gmra.mxu2 %v7514_v25  ;;  %v7519_v56 = vld [vmem:[#allocation36_spill] sm:$0xff] }
 0x6d3   : > { %v3404_v20 = vpop.f32.mrf.mxu3  ;;  %v3453_v22 = vpop.f32.mrf.mxu2 }
 0x6d4   : > { %v3405_v6 = vadd.f32 %v3404_v20, %v6970_v28 }
 0x6d6   : > { %v7039_v19 = vadd.f32 %v3453_v22, %v3405_v6 }
 0x6db   : > { %v3406_v7 = vpop.f32.mrf.mxu3  ;;  %v3455_v10 = vpop.f32.mrf.mxu2 }
 0x6dc   : > { %v3407_v49 = vadd.f32 %v3406_v7, %v6974_v47  ;;  %v7518_v47 = vld [vmem:[#allocation125_spill] sm:$0xff] }
 0x6de   : > { %v7042_v18 = vadd.f32 %v3455_v10, %v3407_v49  ;;  %v7520_v10 = vld [vmem:[#allocation32_spill] sm:$0xff] }
 0x6df   : > { %v3666_v49 = vld [vmem:[%s7180_s6 + $0x8] sm:$0xff] }
 0x6e0   : > { %3506 = vmatmul.bf16.gmra.mxu3 %v7515_v8  ;;  %3555 = vmatmul.bf16.gmra.mxu2 %v7516_v42 }
 0x6e1   : > { %3674 = vperm.xlu2 %4792, %v3666_v49  }
 0x6e3   : > { %v3409_v3 = vpop.f32.mrf.mxu3  ;;  %v3458_v59 = vpop.f32.mrf.mxu2 }
 0x6e4   : > { %v3410_v15 = vadd.f32 %v3409_v3, %v6980_v23 }
 0x6e6   : > { %v7047_v9 = vadd.f32 %v3458_v59, %v3410_v15  ;;  %v7521_v15 = vld [vmem:[#allocation28_spill] sm:$0xff] }
 0x6eb   : > { %v3411_v60 = vpop.f32.mrf.mxu3  ;;  %v3460_v28 = vpop.f32.mrf.mxu2 }
 0x6ec   : > { %v3412_v17 = vadd.f32 %v3411_v60, %v6984_v38 }
 0x6ee   : > { %v7050_v39 = vadd.f32 %v3460_v28, %v3412_v17 }
 0x6f0   : > { %3511 = vmatmul.bf16.gmra.mxu3 %v7517_v41  ;;  %3560 = vmatmul.bf16.gmra.mxu2 %v7518_v47  ;;  %v7522_v41 = vld [vmem:[#allocation15_spill] sm:$0xff] }
 0x6f3   : > { %v3414_v0 = vpop.f32.mrf.mxu3  ;;  %v3463_v50 = vpop.f32.mrf.mxu2 }
 0x6f4   : > { %v3415_v27 = vadd.f32 %v3414_v0, %v6990_v29 }
 0x6f6   : > { %v7055_v26 = vadd.f32 %v3463_v50, %v3415_v27  ;;  %v7523_v27 = vld [vmem:[#allocation21_spill] sm:$0xff] }
 0x6fb   : > { %v3416_v21 = vpop.f32.mrf.mxu3  ;;  %v3465_v23 = vpop.f32.mrf.mxu2 }
 0x6fc   : > { %v3417_v14 = vadd.f32 %v3416_v21, %v6994_v61 }
 0x6fe   : > { %v7058_v11 = vadd.f32 %v3465_v23, %v3417_v14 }
 0x700   : > { %3574 = vmatmul.bf16.vlgmr.msrb.gmra.mxu3 %v6593_v30  ;;  %v7068_v30 = vld [vmem:[%s7179_s5] sm:$0xff] }
 0x701   : > { %3691 = vmatmul.bf16.vlgmr.msrb.gmra.mxu0 %v7068_v30 }
 0x703   : > { %v3477_v38 = vpop.f32.mrf.mxu3  ;;  %v3526_v62 = vpop.f32.mrf.mxu2 }
 0x704   : > { %v3478_v1 = vadd.f32 %v3477_v38, %v6999_v57 }
 0x706   : > { %v3527_v5 = vadd.f32 %v3526_v62, %v3478_v1 }
 0x70b   : > { %v3479_v63 = vpop.f32.mrf.mxu3  ;;  %v3528_v44 = vpop.f32.mrf.mxu2 }
 0x70c   : > { %v3480_v31 = vadd.f32 %v3479_v63, %v7002_v34 }
 0x70e   : > { %v3529_v29 = vadd.f32 %v3528_v44, %v3480_v31 }
 0x710   : > { %3579 = vmatmul.bf16.gmra.mxu3 %v6622_v4 }
 0x713   : > { %v3482_v35 = vpop.f32.mrf.mxu3  ;;  %v3531_v58 = vpop.f32.mrf.mxu2 }
 0x714   : > { %v3483_v61 = vadd.f32 %v3482_v35, %v7007_v46 }
 0x716   : > { %v3532_v55 = vadd.f32 %v3531_v58, %v3483_v61 }
 0x71b   : > { %v3484_v57 = vpop.f32.mrf.mxu3  ;;  %v3533_v45 = vpop.f32.mrf.mxu2 }
 0x71c   : > { %v3485_v54 = vadd.f32 %v3484_v57, %v7010_v33 }
 0x71e   : > { %v3534_v34 = vadd.f32 %v3533_v45, %v3485_v54 }
 0x720   : > { %3584 = vmatmul.bf16.gmra.mxu3 %v6644_v32 }
 0x723   : > { %v3487_v4 = vpop.f32.mrf.mxu3  ;;  %v3536_v2 = vpop.f32.mrf.mxu2 }
 0x724   : > { %v3488_v16 = vadd.f32 %v3487_v4, %v7015_v37 }
 0x726   : > { %v3537_v46 = vadd.f32 %v3536_v2, %v3488_v16 }
 0x72b   : > { %v3489_v52 = vpop.f32.mrf.mxu3  ;;  %v3538_v36 = vpop.f32.mrf.mxu2 }
 0x72c   : > { %v3490_v48 = vadd.f32 %v3489_v52, %v7018_v53 }
 0x72e   : > { %v3539_v51 = vadd.f32 %v3538_v36, %v3490_v48 }
 0x730   : > { %3589 = vmatmul.bf16.gmra.mxu3 %v7519_v56 }
 0x733   : > { %v3492_v33 = vpop.f32.mrf.mxu3  ;;  %v3541_v25 = vpop.f32.mrf.mxu2 }
 0x734   : > { %v3493_v32 = vadd.f32 %v3492_v33, %v7023_v40 }
 0x736   : > { %v3542_v20 = vadd.f32 %v3541_v25, %v3493_v32 }
 0x73b   : > { %v3494_v22 = vpop.f32.mrf.mxu3  ;;  %v3543_v37 = vpop.f32.mrf.mxu2 }
 0x73c   : > { %v3495_v6 = vadd.f32 %v3494_v22, %v7026_v12 }
 0x73e   : > { %v3544_v7 = vadd.f32 %v3543_v37, %v3495_v6 }
 0x740   : > { %3594 = vmatmul.bf16.gmra.mxu3 %v7520_v10 }
 0x743   : > { %v3497_v53 = vpop.f32.mrf.mxu3  ;;  %v3546_v8 = vpop.f32.mrf.mxu2 }
 0x744   : > { %v3498_v42 = vadd.f32 %v3497_v53, %v7031_v43 }
 0x746   : > { %v3547_v3 = vadd.f32 %v3546_v8, %v3498_v42 }
 0x74b   : > { %v3499_v59 = vpop.f32.mrf.mxu3  ;;  %v3548_v13 = vpop.f32.mrf.mxu2 }
 0x74c   : > { %v3500_v40 = vadd.f32 %v3499_v59, %v7034_v24 }
 0x74e   : > { %v3549_v32 = vadd.f32 %v3548_v13, %v3500_v40 }
 0x750   : > { %3599 = vmatmul.bf16.gmra.mxu3 %v7521_v15 }
 0x753   : > { %v3502_v60 = vpop.f32.mrf.mxu3  ;;  %v3551_v25 = vpop.f32.mrf.mxu2 }
 0x754   : > { %v3503_v12 = vadd.f32 %v3502_v60, %v7039_v19 }
 0x756   : > { %v3552_v53 = vadd.f32 %v3551_v25, %v3503_v12 }
 0x75b   : > { %v3504_v28 = vpop.f32.mrf.mxu3 }
 0x75c   : > { %v3505_v17 = vadd.f32 %v3504_v28, %v7042_v18 }
 0x760   : > { %3604 = vmatmul.bf16.gmra.mxu3 %v7522_v41 }
 0x763   : > { %v3507_v47 = vpop.f32.mrf.mxu3 }
 0x764   : > { %v3508_v0 = vadd.f32 %v3507_v47, %v7047_v9 }
 0x76b   : > { %v3509_v50 = vpop.f32.mrf.mxu3 }
 0x76c   : > { %v3510_v43 = vadd.f32 %v3509_v50, %v7050_v39 }
 0x770   : > { %3609 = vmatmul.bf16.gmra.mxu3 %v7523_v27 }
 0x773   : > { %v3512_v21 = vpop.f32.mrf.mxu3 }
 0x774   : > { %v7095_v24 = vadd.f32 %v3512_v21, %v7055_v26 }
 0x77b   : > { %v3514_v23 = vpop.f32.mrf.mxu3 }
 0x77c   : > { %v7098_v19 = vadd.f32 %v3514_v23, %v7058_v11 }
 0x783   : > { %v3575_v14 = vpop.f32.mrf.mxu3 }
 0x784   : > { %v3576_v18 = vadd.f32 %v3575_v14, %v3527_v5 }
 0x786   : > { %v3616_v1 = vmax.f32 %v3576_v18, 0.0 }
 0x78b   : > { %v3577_v38 = vpop.f32.mrf.mxu3 }
 0x78c   : > { %v3578_v62 = vadd.f32 %v3577_v38, %v3529_v29 }
 0x78e   : > { %v3618_v63 = vmax.f32 %v3578_v62, 0.0 }
 0x790   : > { %v7100_v9 = vpack.c.bf16 %v3618_v63, %v3616_v1 }
 0x793   : > { %v3580_v44 = vpop.f32.mrf.mxu3 }
 0x794   : > { %v3581_v39 = vadd.f32 %v3580_v44, %v3532_v55 }
 0x796   : > { %v3620_v58 = vmax.f32 %v3581_v39, 0.0 }
 0x79b   : > { %v3582_v31 = vpop.f32.mrf.mxu3 }
 0x79c   : > { %v3583_v35 = vadd.f32 %v3582_v31, %v3534_v34 }
 0x79e   : > { %v3622_v61 = vmax.f32 %v3583_v35, 0.0 }
 0x7a0   : > { %v3652_v26 = vpack.c.bf16 %v3622_v61, %v3620_v58 }
 0x7a3   : > { %v3585_v57 = vpop.f32.mrf.mxu3 }
 0x7a4   : > { %v3586_v45 = vadd.f32 %v3585_v57, %v3537_v46 }
 0x7a6   : > { %v3624_v4 = vmax.f32 %v3586_v45, 0.0 }
 0x7ab   : > { %v3587_v54 = vpop.f32.mrf.mxu3 }
 0x7ac   : > { %v3588_v11 = vadd.f32 %v3587_v54, %v3539_v51  ;;  %v3553_v51 = vpop.f32.mrf.mxu2 }
 0x7ae   : > { %v3626_v2 = vmax.f32 %v3588_v11, 0.0 }
 0x7b0   : > { %v3654_v5 = vpack.c.bf16 %v3626_v2, %v3624_v4 }
 0x7b3   : > { %v3590_v16 = vpop.f32.mrf.mxu3 }
 0x7b4   : > { %v3591_v29 = vadd.f32 %v3590_v16, %v3542_v20  ;;  %v3556_v8 = vpop.f32.mrf.mxu2  ;;  %v3554_v20 = vadd.f32 %v3553_v51, %v3505_v17 }
 0x7b5   : > { %v3557_v47 = vadd.f32 %v3556_v8, %v3508_v0 }
 0x7b6   : > { %v3628_v48 = vmax.f32 %v3591_v29, 0.0 }
 0x7bb   : > { %v3592_v52 = vpop.f32.mrf.mxu3 }
 0x7bc   : > { %v3593_v36 = vadd.f32 %v3592_v52, %v3544_v7  ;;  %v3558_v41 = vpop.f32.mrf.mxu2 }
 0x7bd   : > { %v3559_v40 = vadd.f32 %v3558_v41, %v3510_v43  ;;  %v3692_v43 = vpop.f32.mrf.mxu0 }
 0x7be   : > { %v3630_v56 = vmax.f32 %v3593_v36, 0.0 }
 0x7c0   : > { %v3656_v55 = vpack.c.bf16 %v3630_v56, %v3628_v48 }
 0x7c3   : > { %v3595_v33 = vpop.f32.mrf.mxu3 }
 0x7c4   : > { %v3596_v34 = vadd.f32 %v3595_v33, %v3547_v3  ;;  %v3561_v23 = vpop.f32.mrf.mxu2 }
 0x7c5   : > { %v3562_v17 = vadd.f32 %v3561_v23, %v7095_v24  ;;  %v3670_v24 = vpop.permute.xlu1 %3669  ;;  %v3694_v58 = vpop.f32.mrf.mxu0 }
 0x7c6   : > { %v3632_v46 = vmax.f32 %v3596_v34, 0.0  ;;  %v3693_v61 = vadd.f32 %v3692_v43, %v3670_v24 }
 0x7cb   : > { %v3597_v22 = vpop.f32.mrf.mxu3 }
 0x7cc   : > { %v3598_v37 = vadd.f32 %v3597_v22, %v3549_v32  ;;  %v3563_v62 = vpop.f32.mrf.mxu2  ;;  %v3751_v32 = vlaneseq }
 0x7cd   : > { %v3564_v1 = vadd.f32 %v3563_v62, %v7098_v19  ;;  %v3675_v19 = vpop.permute.xlu2 %3674 }
 0x7ce   : > { %v3634_v6 = vmax.f32 %v3598_v37, 0.0  ;;  %v3695_v57 = vadd.f32 %v3694_v58, %v3675_v19 }
 0x7d0   : > { %v3658_v10 = vpack.c.bf16 %v3634_v6, %v3632_v46  ;;  %v3711_v45 = vmax.f32 %v3693_v61, %v3695_v57  ;;  %v3752_v6 = vshrl.u32 %v3751_v32, 7 }
 0x7d2   : > { %v3712_v54 = vrot.slane %v3711_v45, 4 }
 0x7d3   : > { %v3600_v49 = vpop.f32.mrf.mxu3 }
 0x7d4   : > { %v3601_v42 = vadd.f32 %v3600_v49, %v3552_v53  ;;  %v3713_v11 = vmax.f32 %v3711_v45, %v3712_v54  ;;  %v3753_v53 = vadd.s32 8, %v3752_v6 }
 0x7d6   : > { %v3636_v15 = vmax.f32 %v3601_v42, 0.0  ;;  %v3714_v4 = vrot.slane %v3713_v11, 2 }
 0x7d8   : > { %v3715_v2 = vmax.f32 %v3713_v11, %v3714_v4 }
 0x7da   : > { %v3716_v16 = vrot.slane %v3715_v2, 1 }
 0x7db   : > { %v3602_v59 = vpop.f32.mrf.mxu3 }
 0x7dc   : > { %v3603_v7 = vadd.f32 %v3602_v59, %v3554_v20  ;;  %v3717_v29 = vmax.f32 %v3715_v2, %v3716_v16  ;;  %v3754_v20 = vstv %s3981_s20  ;;  %v3775_v59 = vstv %s315_s21 }
 0x7dd   : > { %vm7107_vm0 = vcmp.eq.s32.totalorder %v3752_v6, %v3754_v20  ;;  %vm7111_vm1 = vcmp.eq.s32.totalorder %v3753_v53, %v3754_v20  ;;  %vm7115_vm2 = vcmp.eq.s32.totalorder %v3752_v6, %v3775_v59  ;;  %vm7119_vm3 = vcmp.eq.s32.totalorder %v3753_v53, %v3775_v59 }
 0x7de   : > { %v3638_v60 = vmax.f32 %v3603_v7, 0.0  ;;  %v3725_v13 = vsub.f32 %v3693_v61, %v3717_v29 }
 0x7e0   : > { %v3660_v28 = vpack.c.bf16 %v3638_v60, %v3636_v15 }
 0x7e3   : > { %v3605_v3 = vpop.f32.mrf.mxu3 }
 0x7e4   : > { %v3606_v50 = vadd.f32 %v3605_v3, %v3557_v47 }
 0x7e6   : > { %v3640_v14 = vmax.f32 %v3606_v50, 0.0 }
 0x7eb   : > { %v3607_v27 = vpop.f32.mrf.mxu3 }
 0x7ec   : > { %v3608_v21 = vadd.f32 %v3607_v27, %v3559_v40 }
 0x7ee   : > { %v3642_v18 = vmax.f32 %v3608_v21, 0.0 }
 0x7f0   : > { %v3662_v38 = vpack.c.bf16 %v3642_v18, %v3640_v14 }
 0x7f3   : > { %v3610_v12 = vpop.f32.mrf.mxu3 }
 0x7f4   : > { %v3611_v63 = vadd.f32 %v3610_v12, %v3562_v17 }
 0x7f6   : > { %v3644_v31 = vmax.f32 %v3611_v63, 0.0 }
 0x7fb   : > { %v3612_v44 = vpop.f32.mrf.mxu3 }
 0x7fc   : > { %v3613_v39 = vadd.f32 %v3612_v44, %v3564_v1 }
 0x7fe   : > { %v3646_v35 = vmax.f32 %v3613_v39, 0.0 }
 0x800   : > { %v3664_v0 = vpack.c.bf16 %v3646_v35, %v3644_v31 }
 0x802   : > { %3697 = vmatpush.bf16.msrb.mxu1 %v3664_v0 }
 0x806   : > { %3698 = vmatpush.bf16.msrb.mxu1 %v3662_v38 }
 0x80a   : > { %3699 = vmatpush.bf16.msrb.mxu1 %v3660_v28 }
 0x80e   : > { %3700 = vmatpush.bf16.msrb.mxu1 %v3658_v10 }
 0x812   : > { %3701 = vmatpush.bf16.msrb.mxu1 %v3656_v55 }
 0x816   : > { %3702 = vmatpush.bf16.msrb.mxu1 %v3654_v5  ;;  %v3727_v5 = vsub.f32 %v3695_v57, %v3717_v29 }
 0x818   : > { %v3733_v52 = vmul.f32 1.442695, %v3727_v5 }
 0x81a   : > { %3703 = vmatpush.bf16.msrb.mxu1 %v3652_v26  ;;  %v3729_v26 = vmul.f32 1.442695, %v3725_v13 }
 0x81c   : > { %5305 = vpow2.f32 %v3729_v26 }
 0x81d   : > { %5307 = vpow2.f32 %v3733_v52 }
 0x81e   : > { %3704 = vmatpush.bf16.msrb.mxu1 %v7100_v9 }
 0x821   : > { %3705 = vmatmul.bf16.vlgmr.msrb.gmra.mxu1 %v7068_v30 }
 0x822   : > { %v5306_v30 = vpop.eup %5305 }
 0x823   : > { %v5308_v9 = vpop.eup %5307  ;;  %v3757_v40 = vsel %vm7107_vm0, %v5306_v30, 0.0  ;;  %v3778_v23 = vsel %vm7115_vm2, %v5306_v30, 0.0 }
 0x824   : > { %v3737_v36 = vadd.f32 %v5308_v9, %v5306_v30  ;;  %v3759_v50 = vsel %vm7111_vm1, %v5308_v9, 0.0  ;;  %v3780_v14 = vsel %vm7119_vm3, %v5308_v9, 0.0 }
 0x825   : > { %v3761_v12 = vadd.f32 %v3759_v50, %v3757_v40  ;;  %v3782_v62 = vadd.f32 %v3780_v14, %v3778_v23 }
 0x826   : > { %v3738_v56 = vrot.slane %v3737_v36, 4 }
 0x827   : > { %v3762_v1 = vrot.slane %v3761_v12, 4  ;;  %v3783_v63 = vrot.slane %v3782_v62, 4 }
 0x828   : > { %v3739_v55 = vadd.f32 %v3738_v56, %v3737_v36 }
 0x829   : > { %v3763_v35 = vadd.f32 %v3762_v1, %v3761_v12  ;;  %v3784_v0 = vadd.f32 %v3783_v63, %v3782_v62 }
 0x82a   : > { %v3740_v22 = vrot.slane %v3739_v55, 2 }
 0x82b   : > { %v3764_v54 = vrot.slane %v3763_v35, 2  ;;  %v3785_v11 = vrot.slane %v3784_v0, 2 }
 0x82c   : > { %v3741_v51 = vadd.f32 %v3740_v22, %v3739_v55 }
 0x82d   : > { %v3765_v5 = vadd.f32 %v3764_v54, %v3763_v35  ;;  %v3786_v26 = vadd.f32 %v3785_v11, %v3784_v0 }
 0x82e   : > { %v3742_v8 = vrot.slane %v3741_v51, 1 }
 0x82f   : > { %v3787_v22 = vrot.slane %v3786_v26, 1 }
 0x830   : > { %v3743_v28 = vadd.f32 %v3742_v8, %v3741_v51 }
 0x832   : > { %5309 = vrcp.f32 %v3743_v28  ;;  %vm3801_vm4 = vweird.f32 %v3743_v28  ;;  %v3807_v36 = vand.u32 2147483648, %v3743_v28  ;;  %v3805_v55 = vand.u32 2147483647, %v3743_v28 }
 0x834   : > { %vm3806_vm7 = vcmp.eq.f32.partialorder %v3805_v55, 8.507059e+37 }
 0x838   : > { %v5310_v17 = vpop.eup %5309 }
 0x839   : > { %v3797_v39 = vmul.f32 %v5310_v17, %v3743_v28  ;;  %vm3802_vm5 = vweird.f32 %v5310_v17 }
 0x83a   : > { %vm3803_vm6 = vmor %vm3801_vm4, %vm3802_vm5  ;;  %vm3855_vm4 = vcmask 1040384   ;;  %vm3860_vm5 = vcmp.lt.s32.totalorder %v3751_v32, 256 }
 0x83b   : > { %v3798_v45 = vsub.f32 1.0, %v3797_v39 }
 0x83d   : > { %v3799_v13 = vmul.f32 %v5310_v17, %v3798_v45 }
 0x83f   : > { %v3800_v56 = vadd.f32 %v5310_v17, %v3799_v13 }
 0x841   : > { %v3804_v6 = vsel %vm3803_vm6, %v5310_v17, %v3800_v56 }
 0x89e   : > { %v3706_v48 = vpop.f32.mrf.mxu1 }
 0x89f   : > { %v3707_v34 = vadd.f32 %v3706_v48, %v3670_v24 }
 0x8a6   : > { %v3708_v33 = vpop.f32.mrf.mxu1 }
 0x8a7   : > { %v3709_v25 = vadd.f32 %v3708_v33, %v3675_v19 }
 0x8a9   : > { %v3718_v37 = vmax.f32 %v3707_v34, %v3709_v25 }
 0x8ab   : > { %v3719_v46 = vrot.slane %v3718_v37, 4 }
 0x8ad   : > { %v3720_v10 = vmax.f32 %v3718_v37, %v3719_v46  ;;  %v3808_v46 = vor.u32 1.1754944e-38, %v3807_v36 }
 0x8af   : > { %v3721_v49 = vrot.slane %v3720_v10, 2  ;;  %v3809_v8 = vsel %vm3806_vm7, %v3808_v46, %v3804_v6 }
 0x8b1   : > { %v3722_v42 = vmax.f32 %v3720_v10, %v3721_v49  ;;  %v3788_v49 = vadd.f32 %v3787_v22, %v3786_v26 }
 0x8b3   : > { %v3723_v7 = vrot.slane %v3722_v42, 1 }
 0x8b5   : > { %v3724_v47 = vmax.f32 %v3722_v42, %v3723_v7  ;;  %v3826_v7 = vmul.f32 %v3809_v8, %v3788_v49 }
 0x8b7   : > { %v3726_v27 = vsub.f32 %v3707_v34, %v3724_v47  ;;  %v3728_v21 = vsub.f32 %v3709_v25, %v3724_v47  ;;  %v3766_v34 = vrot.slane %v3765_v5, 1  ;;  %vm3836_vm13 = vcmp.lt.f32.partialorder %v3826_v7, 0.5 }
 0x8b9   : > { %v3731_v18 = vmul.f32 1.442695, %v3726_v27  ;;  %v3735_v38 = vmul.f32 1.442695, %v3728_v21  ;;  %v3767_v51 = vadd.f32 %v3766_v34, %v3765_v5 }
 0x8bb   : > { %5311 = vpow2.f32 %v3731_v18  ;;  %v3824_v59 = vmul.f32 %v3809_v8, %v3767_v51 }
 0x8bc   : > { %5313 = vpow2.f32 %v3735_v38 }
 0x8bd   : > { %v3828_v47 = vadd.f32 %v3826_v7, %v3824_v59  ;;  %v3840_v14 = vadd.f32 2.0, %v3824_v59  ;;  %vm3838_vm12 = vcmp.lt.f32.partialorder %v3824_v59, 1.0 }
 0x8bf   : > { %v3842_v18 = vadd.f32 2.0, %v3828_v47  ;;  %vm3834_vm14 = vcmp.lt.f32.partialorder %v3828_v47, 1.0 }
 0x8c1   : > { %v5312_v44 = vpop.eup %5311  ;;  %v3844_v39 = vsel %vm3838_vm12, %v3840_v14, %v3842_v18 }
 0x8c2   : > { %v5314_v31 = vpop.eup %5313  ;;  %v3758_v24 = vsel %vm7107_vm0, %v5312_v44, 0.0  ;;  %v3779_v61 = vsel %vm7115_vm2, %v5312_v44, 0.0  ;;  %v3846_v0 = vsel %vm3836_vm13, %v3828_v47, %v3844_v39  ;;  %vm3830_vm2 = vcmp.lt.f32.partialorder %v3824_v59, 0.01 }
 0x8c3   : > { %v3744_v43 = vadd.f32 %v5314_v31, %v5312_v44  ;;  %v3760_v19 = vsel %vm7111_vm1, %v5314_v31, 0.0  ;;  %v3781_v57 = vsel %vm7119_vm3, %v5314_v31, 0.0 }
 0x8c4   : > { %v3768_v2 = vadd.f32 %v3760_v19, %v3758_v24  ;;  %v3789_v16 = vadd.f32 %v3781_v57, %v3779_v61  ;;  %v4562_v24 = vadd.f32 -1.0, %v3826_v7  ;;  %v3848_v61 = vsel %vm3834_vm14, %v3824_v59, %v3846_v0 }
 0x8c5   : > { %v3745_v58 = vrot.slane %v3744_v43, 4 }
 0x8c6   : > { %v3769_v30 = vrot.slane %v3768_v2, 4  ;;  %v3790_v9 = vrot.slane %v3789_v16, 4  ;;  %v3850_v11 = vsel %vm3830_vm2, %v4562_v24, %v3848_v61 }
 0x8c7   : > { %v3746_v4 = vadd.f32 %v3745_v58, %v3744_v43 }
 0x8c8   : > { %v3770_v25 = vadd.f32 %v3769_v30, %v3768_v2  ;;  %v3791_v37 = vadd.f32 %v3790_v9, %v3789_v16 }
 0x8c9   : > { %v3747_v29 = vrot.slane %v3746_v4, 2 }
 0x8ca   : > { %v3771_v10 = vrot.slane %v3770_v25, 2  ;;  %v3792_v53 = vrot.slane %v3791_v37, 2 }
 0x8cb   : > { %v3748_v52 = vadd.f32 %v3747_v29, %v3746_v4 }
 0x8cc   : > { %v3772_v42 = vadd.f32 %v3771_v10, %v3770_v25  ;;  %v3793_v15 = vadd.f32 %v3792_v53, %v3791_v37 }
 0x8cd   : > { %v3749_v48 = vrot.slane %v3748_v52, 1 }
 0x8ce   : > { %v3773_v41 = vrot.slane %v3772_v42, 1  ;;  %v3794_v40 = vrot.slane %v3793_v15, 1 }
 0x8cf   : > { %v3750_v33 = vadd.f32 %v3749_v48, %v3748_v52 }
 0x8d0   : > { %v3774_v38 = vadd.f32 %v3773_v41, %v3772_v42  ;;  %v3795_v12 = vadd.f32 %v3794_v40, %v3793_v15 }
 0x8d1   : > { %5315 = vrcp.f32 %v3750_v33  ;;  %v3821_v3 = vand.u32 2147483648, %v3750_v33  ;;  %v3819_v27 = vand.u32 2147483647, %v3750_v33  ;;  %vm3815_vm9 = vweird.f32 %v3750_v33 }
 0x8d3   : > { %v3822_v23 = vor.u32 1.1754944e-38, %v3821_v3  ;;  %vm3820_vm11 = vcmp.eq.f32.partialorder %v3819_v27, 8.507059e+37 }
 0x8d7   : > { %v5316_v20 = vpop.eup %5315 }
 0x8d8   : > { %v3811_v60 = vmul.f32 %v5316_v20, %v3750_v33  ;;  %vm3816_vm8 = vweird.f32 %v5316_v20 }
 0x8d9   : > { %vm3817_vm10 = vmor %vm3815_vm9, %vm3816_vm8 }
 0x8da   : > { %v3812_v28 = vsub.f32 1.0, %v3811_v60 }
 0x8dc   : > { %v3813_v50 = vmul.f32 %v5316_v20, %v3812_v28 }
 0x8de   : > { %v3814_v21 = vadd.f32 %v5316_v20, %v3813_v50 }
 0x8e0   : > { %v3818_v62 = vsel %vm3817_vm10, %v5316_v20, %v3814_v21 }
 0x8e1   : > { %v3823_v17 = vsel %vm3820_vm11, %v3822_v23, %v3818_v62 }
 0x8e2   : > { %v3825_v1 = vmul.f32 %v3823_v17, %v3774_v38  ;;  %v3827_v63 = vmul.f32 %v3823_v17, %v3795_v12 }
 0x8e4   : > { %v3829_v44 = vadd.f32 %v3827_v63, %v3825_v1  ;;  %v3841_v31 = vadd.f32 2.0, %v3825_v1  ;;  %vm3839_vm15 = vcmp.lt.f32.partialorder %v3825_v1, 1.0  ;;  %vm3837_vm0 = vcmp.lt.f32.partialorder %v3827_v63, 0.5 }
 0x8e5   : > { %v4563_v19 = vadd.f32 -1.0, %v3827_v63  ;;  %vm3831_vm3 = vcmp.lt.f32.partialorder %v3825_v1, 0.01 }
 0x8e6   : > { %v3843_v35 = vadd.f32 2.0, %v3829_v44  ;;  %vm3835_vm1 = vcmp.lt.f32.partialorder %v3829_v44, 1.0 }
 0x8e8   : > { %v3845_v43 = vsel %vm3839_vm15, %v3841_v31, %v3843_v35 }
 0x8e9   : > { %v3847_v58 = vsel %vm3837_vm0, %v3829_v44, %v3845_v43 }
 0x8ea   : > { %v3849_v57 = vsel %vm3835_vm1, %v3825_v1, %v3847_v58 }
 0x8eb   : > { %v3851_v45 = vsel %vm3831_vm3, %v4563_v19, %v3849_v57 }
 0x8ec   : > { %v3854_v54 = vrot.slane %v3851_v45, 7 }
 0x8ee   : > { %v3856_v4 = vsel %vm3855_vm4, %v3850_v11, %v3854_v54 }
 0x8ef   : > { %3862 = vst.msk [vmem:[%s313_s0] sm:$0x3] %vm3860_vm5, %v3856_v4 }
 0x8f0   : > { %5481 = shalt.err (!%p5478_p10)
}
 0x8f1   : > { %4724 = dma.vmem_to_hbm [thread:$0]  (%p5651_p5), %s3877_s2, 32, %s3879_s10, %s3864_s15  }
 0x8f2 PF: > { %s3890_s18 = sand.u32 1, %s5514_s28   ;;  %p7532_p12 = scmp.ge.s32.totalorder %s5526_s8, 2 }
 0x8f3   : > { %s3891_s16 = scalar_lea.sflag [#allocation6], %s3890_s18 }
 0x8f4   : > { %p4738_p13 = pnand %p7532_p12, %p5617_p6 }
 0x8f6   : > { %p4739_p0 = pneg %p4738_p13 }
 0x8f8   : > { %5509 = dma.done.wait (%p4739_p0), %s3891_s16, 32  }
 0x8f9   : > { %5511 = vsyncadd (%p4739_p0), %s3891_s16, 4294967264  ;;  %p29_p3 = scmp.ge.s32.totalorder %s5638_s27, 4   ;;  %s7533_s28 = smov %s5518_s29 }
 0x8fa   : > { %s7534_s29 = smov %s5522_s30  ;;  %s7535_s30 = smov %s5647_s13 }
 0x8fb   : > { %s7536_s8 = smov %s5638_s27  ;;  %31 = sbr.rel (!%p29_p3) target bundleno = 12 (0xc), region = 97 }
 0x900   :  { %3897 = vsyncpa [#allocation5], 1 }
 0x901   :  { %3899 = vsyncpa [#allocation5 + $0x1], 1 }
 0x902   :  { %3900 = vsyncpa [#allocation8], 1 }
 0x903   :  { %3901 = vsyncpa [#allocation6], 1 }
 0x904   :  { %3903 = vsyncpa [#allocation6 + $0x1], 1 }

</bundles_post_ra>
